<compile_context>
chip_gen: v7x
topology: tpu7x:2x2x1
jax: 0.10.0
libtpu: 0.0.40
codegen_flags: <defaults>
</compile_context>

<pallas_src>
import jax
import jax.numpy as jnp
from jax import lax
from jax.experimental import pallas as pl
from jax.experimental.pallas import tpu as pltpu

BN_EPS = 1e-5   # PyTorch BatchNorm1d default
K = 5           # conv kernel size
DIL = 2         # conv dilation
PAD = 4         # conv padding (both sides) -> "same" length output


def _fused_forward_kernel(x_ref, w0_ref, b0_ref, w_ref, b_ref,
                          gamma_ref, beta_ref,
                          wih_ref, whh_ref, blstm_ref, wfc_ref, bfc_ref,
                          o_ref, pad_scr, hall_scr):
    # x_ref   : (N, L, Cin) f32        channels-last input
    # w0_ref  : (K*C, C)  bf16         layer-0 conv weight, Cin zero-padded to C
    # w_ref   : (K*C, C)  bf16         shared conv weight (layers 1..3)
    # b0/b    : (1, C) f32             gamma/beta: (1, C) f32
    # wih_ref : (C, 4H) bf16    whh_ref: (H, 4H) bf16    blstm_ref: (1, 4H) f32
    # wfc_ref : (H, 1) bf16     bfc_ref: (1, 1) f32
    # o_ref   : (N, L, 1) f32
    # pad_scr : (N, L + 2*PAD, C) f32  length-padded activation scratch
    # hall_scr: (N, L, H) f32          all LSTM hidden states
    N, L, Cin = x_ref.shape
    C = pad_scr.shape[2]
    H = hall_scr.shape[2]

    # Zero once: the 4-sample halo at both ends (and layer-0's channel pad)
    # stays zero across all four conv layers; only the interior is rewritten.
    pad_scr[...] = jnp.zeros_like(pad_scr)
    pad_scr[:, PAD:PAD + L, 0:Cin] = x_ref[...]

    gamma = gamma_ref[...]
    beta = beta_ref[...]

    def conv_bn_relu(w_kc_ref, bias_ref):
        # im2col: concat the 5 dilated taps along channels -> one MXU matmul.
        taps = [pad_scr[:, DIL * k:DIL * k + L, :] for k in range(K)]
        slab = jnp.concatenate(taps, axis=-1).reshape(N * L, K * C)
        acc = jnp.dot(slab.astype(jnp.bfloat16), w_kc_ref[...],
                      preferred_element_type=jnp.float32) + bias_ref[...]
        # BatchNorm1d, training-mode biased batch stats over (N, L), one pass.
        mean = jnp.mean(acc, axis=0, keepdims=True)
        var = jnp.mean(acc * acc, axis=0, keepdims=True) - mean * mean
        var = jnp.maximum(var, 0.0)
        y = (acc - mean) * lax.rsqrt(var + BN_EPS) * gamma + beta
        return jnp.maximum(y, 0.0)                       # (N*L, C)

    a = conv_bn_relu(w0_ref, b0_ref)                      # conv0 -> bn -> relu
    for _ in range(3):                                    # shared conv x3
        pad_scr[:, PAD:PAD + L, :] = a.reshape(N, L, C)
        a = conv_bn_relu(w_ref, b_ref)

    # ---- LSTM (batch_first, zero init state, PyTorch i,f,g,o gate order) ----
    # Hoist the input projection for all timesteps out of the recurrence.
    xproj = (jnp.dot(a.astype(jnp.bfloat16), wih_ref[...],
                     preferred_element_type=jnp.float32)
             + blstm_ref[...]).reshape(N, L, 4 * H)
    whh = whh_ref[...]                                    # (H, 4H) bf16

    h = jnp.zeros((N, H), jnp.float32)
    c = jnp.zeros((N, H), jnp.float32)
    for t in range(L):                                    # static unroll (L=16)
        gates = xproj[:, t, :] + jnp.dot(
            h.astype(jnp.bfloat16), whh, preferred_element_type=jnp.float32)
        i_g = jax.nn.sigmoid(gates[:, 0 * H:1 * H])
        f_g = jax.nn.sigmoid(gates[:, 1 * H:2 * H])
        g_g = jnp.tanh(gates[:, 2 * H:3 * H])
        o_g = jax.nn.sigmoid(gates[:, 3 * H:4 * H])
        c = f_g * c + i_g * g_g
        h = o_g * jnp.tanh(c)
        hall_scr[:, t:t + 1, :] = h.reshape(N, 1, H)

    # Final Linear(H, 1), hoisted out of the time loop: one matmul, one store.
    h_flat = hall_scr[...].reshape(N * L, H)
    out = jnp.dot(h_flat.astype(jnp.bfloat16), wfc_ref[...],
                  preferred_element_type=jnp.float32) + bfc_ref[...]
    o_ref[...] = out.reshape(N, L, 1)


def _prep_conv_weight(w_oik, c_pad):
    # PyTorch Conv1d weight (Cout, Cin, K) -> (K*c_pad, Cout), channels
    # zero-padded to c_pad, ordered [k, c] to match the in-kernel im2col slab.
    cout, cin, k = w_oik.shape
    w_kio = jnp.transpose(w_oik, (2, 1, 0))               # (K, Cin, Cout)
    w_kio = jnp.pad(w_kio, ((0, 0), (0, c_pad - cin), (0, 0)))
    return w_kio.reshape(k * c_pad, cout).astype(jnp.bfloat16)


def forward(x_ncl, p):
    """Matches MyLSTM_lessdil.forward: 4x [conv->bn->relu] -> LSTM -> Linear."""
    N, _, L = x_ncl.shape
    C = p["w"].shape[0]          # num_conv_filters
    H = p["w_hh"].shape[1]       # lstm hidden / final_fc_layer
    x_nlc = jnp.transpose(x_ncl, (0, 2, 1))               # (N, C, L) -> (N, L, C)

    w0 = _prep_conv_weight(p["w0"], C)
    w = _prep_conv_weight(p["w"], C)
    vmem = pl.BlockSpec(memory_space=pltpu.MemorySpace.VMEM)

    return pl.pallas_call(
        _fused_forward_kernel,
        out_shape=jax.ShapeDtypeStruct((N, L, 1), jnp.float32),
        in_specs=[vmem] * 12,
        out_specs=vmem,
        scratch_shapes=[pltpu.VMEM((N, L + 2 * PAD, C), jnp.float32),
                        pltpu.VMEM((N, L, H), jnp.float32)],
    )(x_nlc, w0, p["b0"].reshape(1, C), w, p["b"].reshape(1, C),
      p["gamma"].reshape(1, C), p["beta"].reshape(1, C),
      p["w_ih"].T.astype(jnp.bfloat16), p["w_hh"].T.astype(jnp.bfloat16),
      (p["b_ih"] + p["b_hh"]).reshape(1, 4 * H),
      p["w_fc"].T.astype(jnp.bfloat16), p["b_fc"].reshape(1, 1))
    # TODO(synk): BatchNorm running-stat updates (training-mode side effect)
    # are not reproduced; they do not affect the returned output.
    # TODO(synk): matmuls use bf16 operands with f32 accumulation (TPU-native);
    # for bit-level fp32 parity with PyTorch use f32 + lax.Precision.HIGHEST.


def init_params(key, in_channels=4, num_conv_filters=32, final_fc_layer=32):
    ks = jax.random.split(key, 10)
    s = 0.1
    ncf, h = num_conv_filters, final_fc_layer
    return dict(
        w0=s * jax.random.normal(ks[0], (ncf, in_channels, 5), jnp.float32),
        b0=s * jax.random.normal(ks[1], (ncf,), jnp.float32),
        w=s * jax.random.normal(ks[2], (ncf, ncf, 5), jnp.float32),
        b=s * jax.random.normal(ks[3], (ncf,), jnp.float32),
        gamma=1.0 + s * jax.random.normal(ks[4], (ncf,), jnp.float32),
        beta=s * jax.random.normal(ks[5], (ncf,), jnp.float32),
        w_ih=s * jax.random.normal(ks[6], (4 * h, ncf), jnp.float32),
        w_hh=s * jax.random.normal(ks[7], (4 * h, h), jnp.float32),
        b_ih=s * jax.random.normal(ks[8], (4 * h,), jnp.float32),
        b_hh=jnp.zeros((4 * h,), jnp.float32),
        w_fc=s * jax.random.normal(ks[9], (1, h), jnp.float32),
        b_fc=jnp.zeros((1,), jnp.float32),
    )


if __name__ == "__main__":
    key = jax.random.PRNGKey(0)
    k_x, k_p = jax.random.split(key)

    N, C_in, L = 2, 4, 16                      # (batch, in_channels, seq_len)
    x = jax.random.normal(k_x, (N, C_in, L), jnp.float32)
    params = init_params(k_p, in_channels=C_in)

    out = jax.jit(forward)(x, params)
    out = jax.block_until_ready(out)
    assert out.shape == (N, L, 1), out.shape
    assert jnp.all(jnp.isfinite(out))
    print("KERNEL_OK")
</pallas_src>

<mosaic_0001>
module attributes {stable_mosaic.version = 11 : i64} {
  func.func @_fused_forward_kernel(%arg0: memref<2x16x4xf32, #tpu.memory_space<vmem>>, %arg1: memref<160x32xbf16, #tpu.memory_space<vmem>>, %arg2: memref<1x32xf32, #tpu.memory_space<vmem>>, %arg3: memref<160x32xbf16, #tpu.memory_space<vmem>>, %arg4: memref<1x32xf32, #tpu.memory_space<vmem>>, %arg5: memref<1x32xf32, #tpu.memory_space<vmem>>, %arg6: memref<1x32xf32, #tpu.memory_space<vmem>>, %arg7: memref<32x128xbf16, #tpu.memory_space<vmem>>, %arg8: memref<32x128xbf16, #tpu.memory_space<vmem>>, %arg9: memref<1x128xf32, #tpu.memory_space<vmem>>, %arg10: memref<32x1xbf16, #tpu.memory_space<vmem>>, %arg11: memref<1x1xf32, #tpu.memory_space<vmem>>, %arg12: memref<2x16x1xf32, #tpu.memory_space<vmem>>, %arg13: memref<2x24x32xf32, #tpu.memory_space<vmem>>, %arg14: memref<2x16x32xf32, #tpu.memory_space<vmem>>) attributes {dimension_semantics = [], scalar_prefetch = 0 : i64, scratch_operands = 2 : i64, tpu.core_type = #tpu.core_type<tc>} {
    %cst = arith.constant 0.000000e+00 : f32
    %0 = vector.broadcast %cst : f32 to vector<2x24x32xf32>
    %c0 = arith.constant 0 : index
    %c0_0 = arith.constant 0 : index
    %c0_1 = arith.constant 0 : index
    %1 = vector.load %arg13[%c0, %c0_0, %c0_1] : memref<2x24x32xf32, #tpu.memory_space<vmem>>, vector<2x24x32xf32>
    tpu.vector_store %arg13[%c0, %c0_0, %c0_1], %0 {strides = array<i32>} : memref<2x24x32xf32, #tpu.memory_space<vmem>>, vector<2x24x32xf32>,
    %c0_2 = arith.constant 0 : index
    %c0_3 = arith.constant 0 : index
    %c0_4 = arith.constant 0 : index
    %2 = vector.load %arg0[%c0_2, %c0_3, %c0_4] : memref<2x16x4xf32, #tpu.memory_space<vmem>>, vector<2x16x4xf32>
    %c0_5 = arith.constant 0 : index
    %c4 = arith.constant 4 : index
    %c0_6 = arith.constant 0 : index
    %3 = vector.load %arg13[%c0_5, %c4, %c0_6] : memref<2x24x32xf32, #tpu.memory_space<vmem>>, vector<2x16x4xf32>
    tpu.vector_store %arg13[%c0_5, %c4, %c0_6], %2 {strides = array<i32>} : memref<2x24x32xf32, #tpu.memory_space<vmem>>, vector<2x16x4xf32>,
    %c0_7 = arith.constant 0 : index
    %c0_8 = arith.constant 0 : index
    %4 = vector.load %arg5[%c0_7, %c0_8] : memref<1x32xf32, #tpu.memory_space<vmem>>, vector<1x32xf32>
    %c0_9 = arith.constant 0 : index
    %c0_10 = arith.constant 0 : index
    %5 = vector.load %arg6[%c0_9, %c0_10] : memref<1x32xf32, #tpu.memory_space<vmem>>, vector<1x32xf32>
    %c0_11 = arith.constant 0 : index
    %c0_12 = arith.constant 0 : index
    %c0_13 = arith.constant 0 : index
    %6 = vector.load %arg13[%c0_11, %c0_12, %c0_13] : memref<2x24x32xf32, #tpu.memory_space<vmem>>, vector<2x16x32xf32>
    %c0_14 = arith.constant 0 : index
    %c2 = arith.constant 2 : index
    %c0_15 = arith.constant 0 : index
    %7 = vector.load %arg13[%c0_14, %c2, %c0_15] : memref<2x24x32xf32, #tpu.memory_space<vmem>>, vector<2x16x32xf32>
    %c0_16 = arith.constant 0 : index
    %c4_17 = arith.constant 4 : index
    %c0_18 = arith.constant 0 : index
    %8 = vector.load %arg13[%c0_16, %c4_17, %c0_18] : memref<2x24x32xf32, #tpu.memory_space<vmem>>, vector<2x16x32xf32>
    %c0_19 = arith.constant 0 : index
    %c6 = arith.constant 6 : index
    %c0_20 = arith.constant 0 : index
    %9 = vector.load %arg13[%c0_19, %c6, %c0_20] : memref<2x24x32xf32, #tpu.memory_space<vmem>>, vector<2x16x32xf32>
    %c0_21 = arith.constant 0 : index
    %c8 = arith.constant 8 : index
    %c0_22 = arith.constant 0 : index
    %10 = vector.load %arg13[%c0_21, %c8, %c0_22] : memref<2x24x32xf32, #tpu.memory_space<vmem>>, vector<2x16x32xf32>
    %11 = tpu.concatenate %6, %7, %8, %9, %10 in 2 : vector<2x16x32xf32>, vector<2x16x32xf32>, vector<2x16x32xf32>, vector<2x16x32xf32>, vector<2x16x32xf32> -> vector<2x16x160xf32>
    %12 = vector.shape_cast %11 : vector<2x16x160xf32> to vector<32x160xf32>
    %13 = arith.truncf %12 : vector<32x160xf32> to vector<32x160xbf16>
    %c0_23 = arith.constant 0 : index
    %c0_24 = arith.constant 0 : index
    %14 = vector.load %arg1[%c0_23, %c0_24] : memref<160x32xbf16, #tpu.memory_space<vmem>>, vector<160x32xbf16>
    %cst_25 = arith.constant dense<0.000000e+00> : vector<32x32xf32>
    %15 = tpu.matmul %13, %14, %cst_25 {dimension_numbers = #tpu.dot_dimension_numbers<[1], [0], [0], [1], [0, 0, 1, 1], [], []>} : vector<32x160xbf16>, vector<160x32xbf16>, vector<32x32xf32> -> vector<32x32xf32>
    %c0_26 = arith.constant 0 : index
    %c0_27 = arith.constant 0 : index
    %16 = vector.load %arg2[%c0_26, %c0_27] : memref<1x32xf32, #tpu.memory_space<vmem>>, vector<1x32xf32>
    %17 = vector.broadcast %16 : vector<1x32xf32> to vector<32x32xf32>
    %18 = arith.addf %15, %17 : vector<32x32xf32>
    %cst_28 = arith.constant dense<0.000000e+00> : vector<32xf32>
    %19 = vector.multi_reduction <add>, %18, %cst_28 [0] : vector<32x32xf32> to vector<32xf32>
    %20 = vector.shape_cast %19 : vector<32xf32> to vector<1x32xf32>
    %cst_29 = arith.constant 3.200000e+01 : f32
    %21 = vector.broadcast %cst_29 : f32 to vector<1x32xf32>
    %22 = arith.divf %20, %21 : vector<1x32xf32>
    %23 = arith.mulf %18, %18 : vector<32x32xf32>
    %cst_30 = arith.constant dense<0.000000e+00> : vector<32xf32>
    %24 = vector.multi_reduction <add>, %23, %cst_30 [0] : vector<32x32xf32> to vector<32xf32>
    %25 = vector.shape_cast %24 : vector<32xf32> to vector<1x32xf32>
    %cst_31 = arith.constant 3.200000e+01 : f32
    %26 = vector.broadcast %cst_31 : f32 to vector<1x32xf32>
    %27 = arith.divf %25, %26 : vector<1x32xf32>
    %28 = arith.mulf %22, %22 : vector<1x32xf32>
    %29 = arith.subf %27, %28 : vector<1x32xf32>
    %cst_32 = arith.constant 0.000000e+00 : f32
    %30 = vector.broadcast %cst_32 : f32 to vector<1x32xf32>
    %31 = arith.maximumf %29, %30 : vector<1x32xf32>
    %32 = vector.broadcast %22 : vector<1x32xf32> to vector<32x32xf32>
    %33 = arith.subf %18, %32 : vector<32x32xf32>
    %cst_33 = arith.constant 9.99999974E-6 : f32
    %34 = vector.broadcast %cst_33 : f32 to vector<1x32xf32>
    %35 = arith.addf %31, %34 : vector<1x32xf32>
    %36 = math.rsqrt %35 : vector<1x32xf32>
    %37 = vector.broadcast %36 : vector<1x32xf32> to vector<32x32xf32>
    %38 = arith.mulf %33, %37 : vector<32x32xf32>
    %39 = vector.broadcast %4 : vector<1x32xf32> to vector<32x32xf32>
    %40 = arith.mulf %38, %39 : vector<32x32xf32>
    %41 = vector.broadcast %5 : vector<1x32xf32> to vector<32x32xf32>
    %42 = arith.addf %40, %41 : vector<32x32xf32>
    %cst_34 = arith.constant 0.000000e+00 : f32
    %43 = vector.broadcast %cst_34 : f32 to vector<32x32xf32>
    %44 = arith.maximumf %42, %43 : vector<32x32xf32>
    %45 = vector.shape_cast %44 : vector<32x32xf32> to vector<2x16x32xf32>
    %c0_35 = arith.constant 0 : index
    %c4_36 = arith.constant 4 : index
    %c0_37 = arith.constant 0 : index
    %46 = vector.load %arg13[%c0_35, %c4_36, %c0_37] : memref<2x24x32xf32, #tpu.memory_space<vmem>>, vector<2x16x32xf32>
    tpu.vector_store %arg13[%c0_35, %c4_36, %c0_37], %45 {strides = array<i32>} : memref<2x24x32xf32, #tpu.memory_space<vmem>>, vector<2x16x32xf32>,
    %c0_38 = arith.constant 0 : index
    %c0_39 = arith.constant 0 : index
    %c0_40 = arith.constant 0 : index
    %47 = vector.load %arg13[%c0_38, %c0_39, %c0_40] : memref<2x24x32xf32, #tpu.memory_space<vmem>>, vector<2x16x32xf32>
    %c0_41 = arith.constant 0 : index
    %c2_42 = arith.constant 2 : index
    %c0_43 = arith.constant 0 : index
    %48 = vector.load %arg13[%c0_41, %c2_42, %c0_43] : memref<2x24x32xf32, #tpu.memory_space<vmem>>, vector<2x16x32xf32>
    %c0_44 = arith.constant 0 : index
    %c4_45 = arith.constant 4 : index
    %c0_46 = arith.constant 0 : index
    %49 = vector.load %arg13[%c0_44, %c4_45, %c0_46] : memref<2x24x32xf32, #tpu.memory_space<vmem>>, vector<2x16x32xf32>
    %c0_47 = arith.constant 0 : index
    %c6_48 = arith.constant 6 : index
    %c0_49 = arith.constant 0 : index
    %50 = vector.load %arg13[%c0_47, %c6_48, %c0_49] : memref<2x24x32xf32, #tpu.memory_space<vmem>>, vector<2x16x32xf32>
    %c0_50 = arith.constant 0 : index
    %c8_51 = arith.constant 8 : index
    %c0_52 = arith.constant 0 : index
    %51 = vector.load %arg13[%c0_50, %c8_51, %c0_52] : memref<2x24x32xf32, #tpu.memory_space<vmem>>, vector<2x16x32xf32>
    %52 = tpu.concatenate %47, %48, %49, %50, %51 in 2 : vector<2x16x32xf32>, vector<2x16x32xf32>, vector<2x16x32xf32>, vector<2x16x32xf32>, vector<2x16x32xf32> -> vector<2x16x160xf32>
    %53 = vector.shape_cast %52 : vector<2x16x160xf32> to vector<32x160xf32>
    %54 = arith.truncf %53 : vector<32x160xf32> to vector<32x160xbf16>
    %c0_53 = arith.constant 0 : index
    %c0_54 = arith.constant 0 : index
    %55 = vector.load %arg3[%c0_53, %c0_54] : memref<160x32xbf16, #tpu.memory_space<vmem>>, vector<160x32xbf16>
    %cst_55 = arith.constant dense<0.000000e+00> : vector<32x32xf32>
    %56 = tpu.matmul %54, %55, %cst_55 {dimension_numbers = #tpu.dot_dimension_numbers<[1], [0], [0], [1], [0, 0, 1, 1], [], []>} : vector<32x160xbf16>, vector<160x32xbf16>, vector<32x32xf32> -> vector<32x32xf32>
    %c0_56 = arith.constant 0 : index
    %c0_57 = arith.constant 0 : index
    %57 = vector.load %arg4[%c0_56, %c0_57] : memref<1x32xf32, #tpu.memory_space<vmem>>, vector<1x32xf32>
    %58 = vector.broadcast %57 : vector<1x32xf32> to vector<32x32xf32>
    %59 = arith.addf %56, %58 : vector<32x32xf32>
    %cst_58 = arith.constant dense<0.000000e+00> : vector<32xf32>
    %60 = vector.multi_reduction <add>, %59, %cst_58 [0] : vector<32x32xf32> to vector<32xf32>
    %61 = vector.shape_cast %60 : vector<32xf32> to vector<1x32xf32>
    %cst_59 = arith.constant 3.200000e+01 : f32
    %62 = vector.broadcast %cst_59 : f32 to vector<1x32xf32>
    %63 = arith.divf %61, %62 : vector<1x32xf32>
    %64 = arith.mulf %59, %59 : vector<32x32xf32>
    %cst_60 = arith.constant dense<0.000000e+00> : vector<32xf32>
    %65 = vector.multi_reduction <add>, %64, %cst_60 [0] : vector<32x32xf32> to vector<32xf32>
    %66 = vector.shape_cast %65 : vector<32xf32> to vector<1x32xf32>
    %cst_61 = arith.constant 3.200000e+01 : f32
    %67 = vector.broadcast %cst_61 : f32 to vector<1x32xf32>
    %68 = arith.divf %66, %67 : vector<1x32xf32>
    %69 = arith.mulf %63, %63 : vector<1x32xf32>
    %70 = arith.subf %68, %69 : vector<1x32xf32>
    %cst_62 = arith.constant 0.000000e+00 : f32
    %71 = vector.broadcast %cst_62 : f32 to vector<1x32xf32>
    %72 = arith.maximumf %70, %71 : vector<1x32xf32>
    %73 = vector.broadcast %63 : vector<1x32xf32> to vector<32x32xf32>
    %74 = arith.subf %59, %73 : vector<32x32xf32>
    %cst_63 = arith.constant 9.99999974E-6 : f32
    %75 = vector.broadcast %cst_63 : f32 to vector<1x32xf32>
    %76 = arith.addf %72, %75 : vector<1x32xf32>
    %77 = math.rsqrt %76 : vector<1x32xf32>
    %78 = vector.broadcast %77 : vector<1x32xf32> to vector<32x32xf32>
    %79 = arith.mulf %74, %78 : vector<32x32xf32>
    %80 = vector.broadcast %4 : vector<1x32xf32> to vector<32x32xf32>
    %81 = arith.mulf %79, %80 : vector<32x32xf32>
    %82 = vector.broadcast %5 : vector<1x32xf32> to vector<32x32xf32>
    %83 = arith.addf %81, %82 : vector<32x32xf32>
    %cst_64 = arith.constant 0.000000e+00 : f32
    %84 = vector.broadcast %cst_64 : f32 to vector<32x32xf32>
    %85 = arith.maximumf %83, %84 : vector<32x32xf32>
    %86 = vector.shape_cast %85 : vector<32x32xf32> to vector<2x16x32xf32>
    %c0_65 = arith.constant 0 : index
    %c4_66 = arith.constant 4 : index
    %c0_67 = arith.constant 0 : index
    %87 = vector.load %arg13[%c0_65, %c4_66, %c0_67] : memref<2x24x32xf32, #tpu.memory_space<vmem>>, vector<2x16x32xf32>
    tpu.vector_store %arg13[%c0_65, %c4_66, %c0_67], %86 {strides = array<i32>} : memref<2x24x32xf32, #tpu.memory_space<vmem>>, vector<2x16x32xf32>,
    %c0_68 = arith.constant 0 : index
    %c0_69 = arith.constant 0 : index
    %c0_70 = arith.constant 0 : index
    %88 = vector.load %arg13[%c0_68, %c0_69, %c0_70] : memref<2x24x32xf32, #tpu.memory_space<vmem>>, vector<2x16x32xf32>
    %c0_71 = arith.constant 0 : index
    %c2_72 = arith.constant 2 : index
    %c0_73 = arith.constant 0 : index
    %89 = vector.load %arg13[%c0_71, %c2_72, %c0_73] : memref<2x24x32xf32, #tpu.memory_space<vmem>>, vector<2x16x32xf32>
    %c0_74 = arith.constant 0 : index
    %c4_75 = arith.constant 4 : index
    %c0_76 = arith.constant 0 : index
    %90 = vector.load %arg13[%c0_74, %c4_75, %c0_76] : memref<2x24x32xf32, #tpu.memory_space<vmem>>, vector<2x16x32xf32>
    %c0_77 = arith.constant 0 : index
    %c6_78 = arith.constant 6 : index
    %c0_79 = arith.constant 0 : index
    %91 = vector.load %arg13[%c0_77, %c6_78, %c0_79] : memref<2x24x32xf32, #tpu.memory_space<vmem>>, vector<2x16x32xf32>
    %c0_80 = arith.constant 0 : index
    %c8_81 = arith.constant 8 : index
    %c0_82 = arith.constant 0 : index
    %92 = vector.load %arg13[%c0_80, %c8_81, %c0_82] : memref<2x24x32xf32, #tpu.memory_space<vmem>>, vector<2x16x32xf32>
    %93 = tpu.concatenate %88, %89, %90, %91, %92 in 2 : vector<2x16x32xf32>, vector<2x16x32xf32>, vector<2x16x32xf32>, vector<2x16x32xf32>, vector<2x16x32xf32> -> vector<2x16x160xf32>
    %94 = vector.shape_cast %93 : vector<2x16x160xf32> to vector<32x160xf32>
    %95 = arith.truncf %94 : vector<32x160xf32> to vector<32x160xbf16>
    %c0_83 = arith.constant 0 : index
    %c0_84 = arith.constant 0 : index
    %96 = vector.load %arg3[%c0_83, %c0_84] : memref<160x32xbf16, #tpu.memory_space<vmem>>, vector<160x32xbf16>
    %cst_85 = arith.constant dense<0.000000e+00> : vector<32x32xf32>
    %97 = tpu.matmul %95, %96, %cst_85 {dimension_numbers = #tpu.dot_dimension_numbers<[1], [0], [0], [1], [0, 0, 1, 1], [], []>} : vector<32x160xbf16>, vector<160x32xbf16>, vector<32x32xf32> -> vector<32x32xf32>
    %c0_86 = arith.constant 0 : index
    %c0_87 = arith.constant 0 : index
    %98 = vector.load %arg4[%c0_86, %c0_87] : memref<1x32xf32, #tpu.memory_space<vmem>>, vector<1x32xf32>
    %99 = vector.broadcast %98 : vector<1x32xf32> to vector<32x32xf32>
    %100 = arith.addf %97, %99 : vector<32x32xf32>
    %cst_88 = arith.constant dense<0.000000e+00> : vector<32xf32>
    %101 = vector.multi_reduction <add>, %100, %cst_88 [0] : vector<32x32xf32> to vector<32xf32>
    %102 = vector.shape_cast %101 : vector<32xf32> to vector<1x32xf32>
    %cst_89 = arith.constant 3.200000e+01 : f32
    %103 = vector.broadcast %cst_89 : f32 to vector<1x32xf32>
    %104 = arith.divf %102, %103 : vector<1x32xf32>
    %105 = arith.mulf %100, %100 : vector<32x32xf32>
    %cst_90 = arith.constant dense<0.000000e+00> : vector<32xf32>
    %106 = vector.multi_reduction <add>, %105, %cst_90 [0] : vector<32x32xf32> to vector<32xf32>
    %107 = vector.shape_cast %106 : vector<32xf32> to vector<1x32xf32>
    %cst_91 = arith.constant 3.200000e+01 : f32
    %108 = vector.broadcast %cst_91 : f32 to vector<1x32xf32>
    %109 = arith.divf %107, %108 : vector<1x32xf32>
    %110 = arith.mulf %104, %104 : vector<1x32xf32>
    %111 = arith.subf %109, %110 : vector<1x32xf32>
    %cst_92 = arith.constant 0.000000e+00 : f32
    %112 = vector.broadcast %cst_92 : f32 to vector<1x32xf32>
    %113 = arith.maximumf %111, %112 : vector<1x32xf32>
    %114 = vector.broadcast %104 : vector<1x32xf32> to vector<32x32xf32>
    %115 = arith.subf %100, %114 : vector<32x32xf32>
    %cst_93 = arith.constant 9.99999974E-6 : f32
    %116 = vector.broadcast %cst_93 : f32 to vector<1x32xf32>
    %117 = arith.addf %113, %116 : vector<1x32xf32>
    %118 = math.rsqrt %117 : vector<1x32xf32>
    %119 = vector.broadcast %118 : vector<1x32xf32> to vector<32x32xf32>
    %120 = arith.mulf %115, %119 : vector<32x32xf32>
    %121 = vector.broadcast %4 : vector<1x32xf32> to vector<32x32xf32>
    %122 = arith.mulf %120, %121 : vector<32x32xf32>
    %123 = vector.broadcast %5 : vector<1x32xf32> to vector<32x32xf32>
    %124 = arith.addf %122, %123 : vector<32x32xf32>
    %cst_94 = arith.constant 0.000000e+00 : f32
    %125 = vector.broadcast %cst_94 : f32 to vector<32x32xf32>
    %126 = arith.maximumf %124, %125 : vector<32x32xf32>
    %127 = vector.shape_cast %126 : vector<32x32xf32> to vector<2x16x32xf32>
    %c0_95 = arith.constant 0 : index
    %c4_96 = arith.constant 4 : index
    %c0_97 = arith.constant 0 : index
    %128 = vector.load %arg13[%c0_95, %c4_96, %c0_97] : memref<2x24x32xf32, #tpu.memory_space<vmem>>, vector<2x16x32xf32>
    tpu.vector_store %arg13[%c0_95, %c4_96, %c0_97], %127 {strides = array<i32>} : memref<2x24x32xf32, #tpu.memory_space<vmem>>, vector<2x16x32xf32>,
    %c0_98 = arith.constant 0 : index
    %c0_99 = arith.constant 0 : index
    %c0_100 = arith.constant 0 : index
    %129 = vector.load %arg13[%c0_98, %c0_99, %c0_100] : memref<2x24x32xf32, #tpu.memory_space<vmem>>, vector<2x16x32xf32>
    %c0_101 = arith.constant 0 : index
    %c2_102 = arith.constant 2 : index
    %c0_103 = arith.constant 0 : index
    %130 = vector.load %arg13[%c0_101, %c2_102, %c0_103] : memref<2x24x32xf32, #tpu.memory_space<vmem>>, vector<2x16x32xf32>
    %c0_104 = arith.constant 0 : index
    %c4_105 = arith.constant 4 : index
    %c0_106 = arith.constant 0 : index
    %131 = vector.load %arg13[%c0_104, %c4_105, %c0_106] : memref<2x24x32xf32, #tpu.memory_space<vmem>>, vector<2x16x32xf32>
    %c0_107 = arith.constant 0 : index
    %c6_108 = arith.constant 6 : index
    %c0_109 = arith.constant 0 : index
    %132 = vector.load %arg13[%c0_107, %c6_108, %c0_109] : memref<2x24x32xf32, #tpu.memory_space<vmem>>, vector<2x16x32xf32>
    %c0_110 = arith.constant 0 : index
    %c8_111 = arith.constant 8 : index
    %c0_112 = arith.constant 0 : index
    %133 = vector.load %arg13[%c0_110, %c8_111, %c0_112] : memref<2x24x32xf32, #tpu.memory_space<vmem>>, vector<2x16x32xf32>
    %134 = tpu.concatenate %129, %130, %131, %132, %133 in 2 : vector<2x16x32xf32>, vector<2x16x32xf32>, vector<2x16x32xf32>, vector<2x16x32xf32>, vector<2x16x32xf32> -> vector<2x16x160xf32>
    %135 = vector.shape_cast %134 : vector<2x16x160xf32> to vector<32x160xf32>
    %136 = arith.truncf %135 : vector<32x160xf32> to vector<32x160xbf16>
    %c0_113 = arith.constant 0 : index
    %c0_114 = arith.constant 0 : index
    %137 = vector.load %arg3[%c0_113, %c0_114] : memref<160x32xbf16, #tpu.memory_space<vmem>>, vector<160x32xbf16>
    %cst_115 = arith.constant dense<0.000000e+00> : vector<32x32xf32>
    %138 = tpu.matmul %136, %137, %cst_115 {dimension_numbers = #tpu.dot_dimension_numbers<[1], [0], [0], [1], [0, 0, 1, 1], [], []>} : vector<32x160xbf16>, vector<160x32xbf16>, vector<32x32xf32> -> vector<32x32xf32>
    %c0_116 = arith.constant 0 : index
    %c0_117 = arith.constant 0 : index
    %139 = vector.load %arg4[%c0_116, %c0_117] : memref<1x32xf32, #tpu.memory_space<vmem>>, vector<1x32xf32>
    %140 = vector.broadcast %139 : vector<1x32xf32> to vector<32x32xf32>
    %141 = arith.addf %138, %140 : vector<32x32xf32>
    %cst_118 = arith.constant dense<0.000000e+00> : vector<32xf32>
    %142 = vector.multi_reduction <add>, %141, %cst_118 [0] : vector<32x32xf32> to vector<32xf32>
    %143 = vector.shape_cast %142 : vector<32xf32> to vector<1x32xf32>
    %cst_119 = arith.constant 3.200000e+01 : f32
    %144 = vector.broadcast %cst_119 : f32 to vector<1x32xf32>
    %145 = arith.divf %143, %144 : vector<1x32xf32>
    %146 = arith.mulf %141, %141 : vector<32x32xf32>
    %cst_120 = arith.constant dense<0.000000e+00> : vector<32xf32>
    %147 = vector.multi_reduction <add>, %146, %cst_120 [0] : vector<32x32xf32> to vector<32xf32>
    %148 = vector.shape_cast %147 : vector<32xf32> to vector<1x32xf32>
    %cst_121 = arith.constant 3.200000e+01 : f32
    %149 = vector.broadcast %cst_121 : f32 to vector<1x32xf32>
    %150 = arith.divf %148, %149 : vector<1x32xf32>
    %151 = arith.mulf %145, %145 : vector<1x32xf32>
    %152 = arith.subf %150, %151 : vector<1x32xf32>
    %cst_122 = arith.constant 0.000000e+00 : f32
    %153 = vector.broadcast %cst_122 : f32 to vector<1x32xf32>
    %154 = arith.maximumf %152, %153 : vector<1x32xf32>
    %155 = vector.broadcast %145 : vector<1x32xf32> to vector<32x32xf32>
    %156 = arith.subf %141, %155 : vector<32x32xf32>
    %cst_123 = arith.constant 9.99999974E-6 : f32
    %157 = vector.broadcast %cst_123 : f32 to vector<1x32xf32>
    %158 = arith.addf %154, %157 : vector<1x32xf32>
    %159 = math.rsqrt %158 : vector<1x32xf32>
    %160 = vector.broadcast %159 : vector<1x32xf32> to vector<32x32xf32>
    %161 = arith.mulf %156, %160 : vector<32x32xf32>
    %162 = vector.broadcast %4 : vector<1x32xf32> to vector<32x32xf32>
    %163 = arith.mulf %161, %162 : vector<32x32xf32>
    %164 = vector.broadcast %5 : vector<1x32xf32> to vector<32x32xf32>
    %165 = arith.addf %163, %164 : vector<32x32xf32>
    %cst_124 = arith.constant 0.000000e+00 : f32
    %166 = vector.broadcast %cst_124 : f32 to vector<32x32xf32>
    %167 = arith.maximumf %165, %166 : vector<32x32xf32>
    %168 = arith.truncf %167 : vector<32x32xf32> to vector<32x32xbf16>
    %c0_125 = arith.constant 0 : index
    %c0_126 = arith.constant 0 : index
    %169 = vector.load %arg7[%c0_125, %c0_126] : memref<32x128xbf16, #tpu.memory_space<vmem>>, vector<32x128xbf16>
    %cst_127 = arith.constant dense<0.000000e+00> : vector<32x128xf32>
    %170 = tpu.matmul %168, %169, %cst_127 {dimension_numbers = #tpu.dot_dimension_numbers<[1], [0], [0], [1], [0, 0, 1, 1], [], []>} : vector<32x32xbf16>, vector<32x128xbf16>, vector<32x128xf32> -> vector<32x128xf32>
    %c0_128 = arith.constant 0 : index
    %c0_129 = arith.constant 0 : index
    %171 = vector.load %arg9[%c0_128, %c0_129] : memref<1x128xf32, #tpu.memory_space<vmem>>, vector<1x128xf32>
    %172 = vector.broadcast %171 : vector<1x128xf32> to vector<32x128xf32>
    %173 = arith.addf %170, %172 : vector<32x128xf32>
    %174 = vector.shape_cast %173 : vector<32x128xf32> to vector<2x16x128xf32>
    %c0_130 = arith.constant 0 : index
    %c0_131 = arith.constant 0 : index
    %175 = vector.load %arg8[%c0_130, %c0_131] : memref<32x128xbf16, #tpu.memory_space<vmem>>, vector<32x128xbf16>
    %cst_132 = arith.constant 0.000000e+00 : f32
    %176 = vector.broadcast %cst_132 : f32 to vector<2x32xf32>
    %cst_133 = arith.constant 0.000000e+00 : f32
    %177 = vector.broadcast %cst_133 : f32 to vector<2x32xf32>
    %178 = vector.extract_strided_slice %174 {offsets = [0, 0, 0], sizes = [2, 1, 128], strides = [1, 1, 1]} : vector<2x16x128xf32> to vector<2x1x128xf32>
    %179 = vector.shape_cast %178 : vector<2x1x128xf32> to vector<2x128xf32>
    %180 = arith.truncf %176 : vector<2x32xf32> to vector<2x32xbf16>
    %cst_134 = arith.constant dense<0.000000e+00> : vector<2x128xf32>
    %181 = tpu.matmul %180, %175, %cst_134 {dimension_numbers = #tpu.dot_dimension_numbers<[1], [0], [0], [1], [0, 0, 1, 1], [], []>} : vector<2x32xbf16>, vector<32x128xbf16>, vector<2x128xf32> -> vector<2x128xf32>
    %182 = arith.addf %179, %181 : vector<2x128xf32>
    %183 = vector.extract_strided_slice %182 {offsets = [0, 0], sizes = [2, 32], strides = [1, 1]} : vector<2x128xf32> to vector<2x32xf32>
    %184 = arith.negf %183 : vector<2x32xf32>
    %185 = math.exp %184 : vector<2x32xf32>
    %cst_135 = arith.constant 1.000000e+00 : f32
    %186 = vector.broadcast %cst_135 : f32 to vector<2x32xf32>
    %187 = arith.addf %186, %185 : vector<2x32xf32>
    %188 = arith.divf %186, %187 : vector<2x32xf32>
    %189 = vector.extract_strided_slice %182 {offsets = [0, 32], sizes = [2, 32], strides = [1, 1]} : vector<2x128xf32> to vector<2x32xf32>
    %190 = arith.negf %189 : vector<2x32xf32>
    %191 = math.exp %190 : vector<2x32xf32>
    %cst_136 = arith.constant 1.000000e+00 : f32
    %192 = vector.broadcast %cst_136 : f32 to vector<2x32xf32>
    %193 = arith.addf %192, %191 : vector<2x32xf32>
    %194 = arith.divf %192, %193 : vector<2x32xf32>
    %195 = vector.extract_strided_slice %182 {offsets = [0, 64], sizes = [2, 32], strides = [1, 1]} : vector<2x128xf32> to vector<2x32xf32>
    %196 = math.tanh %195 : vector<2x32xf32>
    %197 = vector.extract_strided_slice %182 {offsets = [0, 96], sizes = [2, 32], strides = [1, 1]} : vector<2x128xf32> to vector<2x32xf32>
    %198 = arith.negf %197 : vector<2x32xf32>
    %199 = math.exp %198 : vector<2x32xf32>
    %cst_137 = arith.constant 1.000000e+00 : f32
    %200 = vector.broadcast %cst_137 : f32 to vector<2x32xf32>
    %201 = arith.addf %200, %199 : vector<2x32xf32>
    %202 = arith.divf %200, %201 : vector<2x32xf32>
    %203 = arith.mulf %194, %177 : vector<2x32xf32>
    %204 = arith.mulf %188, %196 : vector<2x32xf32>
    %205 = arith.addf %203, %204 : vector<2x32xf32>
    %206 = math.tanh %205 : vector<2x32xf32>
    %207 = arith.mulf %202, %206 : vector<2x32xf32>
    %208 = vector.shape_cast %207 : vector<2x32xf32> to vector<2x1x32xf32>
    %c0_138 = arith.constant 0 : index
    %c0_139 = arith.constant 0 : index
    %c0_140 = arith.constant 0 : index
    %209 = vector.load %arg14[%c0_138, %c0_139, %c0_140] : memref<2x16x32xf32, #tpu.memory_space<vmem>>, vector<2x1x32xf32>
    tpu.vector_store %arg14[%c0_138, %c0_139, %c0_140], %208 {strides = array<i32>} : memref<2x16x32xf32, #tpu.memory_space<vmem>>, vector<2x1x32xf32>,
    %210 = vector.extract_strided_slice %174 {offsets = [0, 1, 0], sizes = [2, 1, 128], strides = [1, 1, 1]} : vector<2x16x128xf32> to vector<2x1x128xf32>
    %211 = vector.shape_cast %210 : vector<2x1x128xf32> to vector<2x128xf32>
    %212 = arith.truncf %207 : vector<2x32xf32> to vector<2x32xbf16>
    %cst_141 = arith.constant dense<0.000000e+00> : vector<2x128xf32>
    %213 = tpu.matmul %212, %175, %cst_141 {dimension_numbers = #tpu.dot_dimension_numbers<[1], [0], [0], [1], [0, 0, 1, 1], [], []>} : vector<2x32xbf16>, vector<32x128xbf16>, vector<2x128xf32> -> vector<2x128xf32>
    %214 = arith.addf %211, %213 : vector<2x128xf32>
    %215 = vector.extract_strided_slice %214 {offsets = [0, 0], sizes = [2, 32], strides = [1, 1]} : vector<2x128xf32> to vector<2x32xf32>
    %216 = arith.negf %215 : vector<2x32xf32>
    %217 = math.exp %216 : vector<2x32xf32>
    %cst_142 = arith.constant 1.000000e+00 : f32
    %218 = vector.broadcast %cst_142 : f32 to vector<2x32xf32>
    %219 = arith.addf %218, %217 : vector<2x32xf32>
    %220 = arith.divf %218, %219 : vector<2x32xf32>
    %221 = vector.extract_strided_slice %214 {offsets = [0, 32], sizes = [2, 32], strides = [1, 1]} : vector<2x128xf32> to vector<2x32xf32>
    %222 = arith.negf %221 : vector<2x32xf32>
    %223 = math.exp %222 : vector<2x32xf32>
    %cst_143 = arith.constant 1.000000e+00 : f32
    %224 = vector.broadcast %cst_143 : f32 to vector<2x32xf32>
    %225 = arith.addf %224, %223 : vector<2x32xf32>
    %226 = arith.divf %224, %225 : vector<2x32xf32>
    %227 = vector.extract_strided_slice %214 {offsets = [0, 64], sizes = [2, 32], strides = [1, 1]} : vector<2x128xf32> to vector<2x32xf32>
    %228 = math.tanh %227 : vector<2x32xf32>
    %229 = vector.extract_strided_slice %214 {offsets = [0, 96], sizes = [2, 32], strides = [1, 1]} : vector<2x128xf32> to vector<2x32xf32>
    %230 = arith.negf %229 : vector<2x32xf32>
    %231 = math.exp %230 : vector<2x32xf32>
    %cst_144 = arith.constant 1.000000e+00 : f32
    %232 = vector.broadcast %cst_144 : f32 to vector<2x32xf32>
    %233 = arith.addf %232, %231 : vector<2x32xf32>
    %234 = arith.divf %232, %233 : vector<2x32xf32>
    %235 = arith.mulf %226, %205 : vector<2x32xf32>
    %236 = arith.mulf %220, %228 : vector<2x32xf32>
    %237 = arith.addf %235, %236 : vector<2x32xf32>
    %238 = math.tanh %237 : vector<2x32xf32>
    %239 = arith.mulf %234, %238 : vector<2x32xf32>
    %240 = vector.shape_cast %239 : vector<2x32xf32> to vector<2x1x32xf32>
    %c0_145 = arith.constant 0 : index
    %c1 = arith.constant 1 : index
    %c0_146 = arith.constant 0 : index
    %241 = vector.load %arg14[%c0_145, %c1, %c0_146] : memref<2x16x32xf32, #tpu.memory_space<vmem>>, vector<2x1x32xf32>
    tpu.vector_store %arg14[%c0_145, %c1, %c0_146], %240 {strides = array<i32>} : memref<2x16x32xf32, #tpu.memory_space<vmem>>, vector<2x1x32xf32>,
    %242 = vector.extract_strided_slice %174 {offsets = [0, 2, 0], sizes = [2, 1, 128], strides = [1, 1, 1]} : vector<2x16x128xf32> to vector<2x1x128xf32>
    %243 = vector.shape_cast %242 : vector<2x1x128xf32> to vector<2x128xf32>
    %244 = arith.truncf %239 : vector<2x32xf32> to vector<2x32xbf16>
    %cst_147 = arith.constant dense<0.000000e+00> : vector<2x128xf32>
    %245 = tpu.matmul %244, %175, %cst_147 {dimension_numbers = #tpu.dot_dimension_numbers<[1], [0], [0], [1], [0, 0, 1, 1], [], []>} : vector<2x32xbf16>, vector<32x128xbf16>, vector<2x128xf32> -> vector<2x128xf32>
    %246 = arith.addf %243, %245 : vector<2x128xf32>
    %247 = vector.extract_strided_slice %246 {offsets = [0, 0], sizes = [2, 32], strides = [1, 1]} : vector<2x128xf32> to vector<2x32xf32>
    %248 = arith.negf %247 : vector<2x32xf32>
    %249 = math.exp %248 : vector<2x32xf32>
    %cst_148 = arith.constant 1.000000e+00 : f32
    %250 = vector.broadcast %cst_148 : f32 to vector<2x32xf32>
    %251 = arith.addf %250, %249 : vector<2x32xf32>
    %252 = arith.divf %250, %251 : vector<2x32xf32>
    %253 = vector.extract_strided_slice %246 {offsets = [0, 32], sizes = [2, 32], strides = [1, 1]} : vector<2x128xf32> to vector<2x32xf32>
    %254 = arith.negf %253 : vector<2x32xf32>
    %255 = math.exp %254 : vector<2x32xf32>
    %cst_149 = arith.constant 1.000000e+00 : f32
    %256 = vector.broadcast %cst_149 : f32 to vector<2x32xf32>
    %257 = arith.addf %256, %255 : vector<2x32xf32>
    %258 = arith.divf %256, %257 : vector<2x32xf32>
    %259 = vector.extract_strided_slice %246 {offsets = [0, 64], sizes = [2, 32], strides = [1, 1]} : vector<2x128xf32> to vector<2x32xf32>
    %260 = math.tanh %259 : vector<2x32xf32>
    %261 = vector.extract_strided_slice %246 {offsets = [0, 96], sizes = [2, 32], strides = [1, 1]} : vector<2x128xf32> to vector<2x32xf32>
    %262 = arith.negf %261 : vector<2x32xf32>
    %263 = math.exp %262 : vector<2x32xf32>
    %cst_150 = arith.constant 1.000000e+00 : f32
    %264 = vector.broadcast %cst_150 : f32 to vector<2x32xf32>
    %265 = arith.addf %264, %263 : vector<2x32xf32>
    %266 = arith.divf %264, %265 : vector<2x32xf32>
    %267 = arith.mulf %258, %237 : vector<2x32xf32>
    %268 = arith.mulf %252, %260 : vector<2x32xf32>
    %269 = arith.addf %267, %268 : vector<2x32xf32>
    %270 = math.tanh %269 : vector<2x32xf32>
    %271 = arith.mulf %266, %270 : vector<2x32xf32>
    %272 = vector.shape_cast %271 : vector<2x32xf32> to vector<2x1x32xf32>
    %c0_151 = arith.constant 0 : index
    %c2_152 = arith.constant 2 : index
    %c0_153 = arith.constant 0 : index
    %273 = vector.load %arg14[%c0_151, %c2_152, %c0_153] : memref<2x16x32xf32, #tpu.memory_space<vmem>>, vector<2x1x32xf32>
    tpu.vector_store %arg14[%c0_151, %c2_152, %c0_153], %272 {strides = array<i32>} : memref<2x16x32xf32, #tpu.memory_space<vmem>>, vector<2x1x32xf32>,
    %274 = vector.extract_strided_slice %174 {offsets = [0, 3, 0], sizes = [2, 1, 128], strides = [1, 1, 1]} : vector<2x16x128xf32> to vector<2x1x128xf32>
    %275 = vector.shape_cast %274 : vector<2x1x128xf32> to vector<2x128xf32>
    %276 = arith.truncf %271 : vector<2x32xf32> to vector<2x32xbf16>
    %cst_154 = arith.constant dense<0.000000e+00> : vector<2x128xf32>
    %277 = tpu.matmul %276, %175, %cst_154 {dimension_numbers = #tpu.dot_dimension_numbers<[1], [0], [0], [1], [0, 0, 1, 1], [], []>} : vector<2x32xbf16>, vector<32x128xbf16>, vector<2x128xf32> -> vector<2x128xf32>
    %278 = arith.addf %275, %277 : vector<2x128xf32>
    %279 = vector.extract_strided_slice %278 {offsets = [0, 0], sizes = [2, 32], strides = [1, 1]} : vector<2x128xf32> to vector<2x32xf32>
    %280 = arith.negf %279 : vector<2x32xf32>
    %281 = math.exp %280 : vector<2x32xf32>
    %cst_155 = arith.constant 1.000000e+00 : f32
    %282 = vector.broadcast %cst_155 : f32 to vector<2x32xf32>
    %283 = arith.addf %282, %281 : vector<2x32xf32>
    %284 = arith.divf %282, %283 : vector<2x32xf32>
    %285 = vector.extract_strided_slice %278 {offsets = [0, 32], sizes = [2, 32], strides = [1, 1]} : vector<2x128xf32> to vector<2x32xf32>
    %286 = arith.negf %285 : vector<2x32xf32>
    %287 = math.exp %286 : vector<2x32xf32>
    %cst_156 = arith.constant 1.000000e+00 : f32
    %288 = vector.broadcast %cst_156 : f32 to vector<2x32xf32>
    %289 = arith.addf %288, %287 : vector<2x32xf32>
    %290 = arith.divf %288, %289 : vector<2x32xf32>
    %291 = vector.extract_strided_slice %278 {offsets = [0, 64], sizes = [2, 32], strides = [1, 1]} : vector<2x128xf32> to vector<2x32xf32>
    %292 = math.tanh %291 : vector<2x32xf32>
    %293 = vector.extract_strided_slice %278 {offsets = [0, 96], sizes = [2, 32], strides = [1, 1]} : vector<2x128xf32> to vector<2x32xf32>
    %294 = arith.negf %293 : vector<2x32xf32>
    %295 = math.exp %294 : vector<2x32xf32>
    %cst_157 = arith.constant 1.000000e+00 : f32
    %296 = vector.broadcast %cst_157 : f32 to vector<2x32xf32>
    %297 = arith.addf %296, %295 : vector<2x32xf32>
    %298 = arith.divf %296, %297 : vector<2x32xf32>
    %299 = arith.mulf %290, %269 : vector<2x32xf32>
    %300 = arith.mulf %284, %292 : vector<2x32xf32>
    %301 = arith.addf %299, %300 : vector<2x32xf32>
    %302 = math.tanh %301 : vector<2x32xf32>
    %303 = arith.mulf %298, %302 : vector<2x32xf32>
    %304 = vector.shape_cast %303 : vector<2x32xf32> to vector<2x1x32xf32>
    %c0_158 = arith.constant 0 : index
    %c3 = arith.constant 3 : index
    %c0_159 = arith.constant 0 : index
    %305 = vector.load %arg14[%c0_158, %c3, %c0_159] : memref<2x16x32xf32, #tpu.memory_space<vmem>>, vector<2x1x32xf32>
    tpu.vector_store %arg14[%c0_158, %c3, %c0_159], %304 {strides = array<i32>} : memref<2x16x32xf32, #tpu.memory_space<vmem>>, vector<2x1x32xf32>,
    %306 = vector.extract_strided_slice %174 {offsets = [0, 4, 0], sizes = [2, 1, 128], strides = [1, 1, 1]} : vector<2x16x128xf32> to vector<2x1x128xf32>
    %307 = vector.shape_cast %306 : vector<2x1x128xf32> to vector<2x128xf32>
    %308 = arith.truncf %303 : vector<2x32xf32> to vector<2x32xbf16>
    %cst_160 = arith.constant dense<0.000000e+00> : vector<2x128xf32>
    %309 = tpu.matmul %308, %175, %cst_160 {dimension_numbers = #tpu.dot_dimension_numbers<[1], [0], [0], [1], [0, 0, 1, 1], [], []>} : vector<2x32xbf16>, vector<32x128xbf16>, vector<2x128xf32> -> vector<2x128xf32>
    %310 = arith.addf %307, %309 : vector<2x128xf32>
    %311 = vector.extract_strided_slice %310 {offsets = [0, 0], sizes = [2, 32], strides = [1, 1]} : vector<2x128xf32> to vector<2x32xf32>
    %312 = arith.negf %311 : vector<2x32xf32>
    %313 = math.exp %312 : vector<2x32xf32>
    %cst_161 = arith.constant 1.000000e+00 : f32
    %314 = vector.broadcast %cst_161 : f32 to vector<2x32xf32>
    %315 = arith.addf %314, %313 : vector<2x32xf32>
    %316 = arith.divf %314, %315 : vector<2x32xf32>
    %317 = vector.extract_strided_slice %310 {offsets = [0, 32], sizes = [2, 32], strides = [1, 1]} : vector<2x128xf32> to vector<2x32xf32>
    %318 = arith.negf %317 : vector<2x32xf32>
    %319 = math.exp %318 : vector<2x32xf32>
    %cst_162 = arith.constant 1.000000e+00 : f32
    %320 = vector.broadcast %cst_162 : f32 to vector<2x32xf32>
    %321 = arith.addf %320, %319 : vector<2x32xf32>
    %322 = arith.divf %320, %321 : vector<2x32xf32>
    %323 = vector.extract_strided_slice %310 {offsets = [0, 64], sizes = [2, 32], strides = [1, 1]} : vector<2x128xf32> to vector<2x32xf32>
    %324 = math.tanh %323 : vector<2x32xf32>
    %325 = vector.extract_strided_slice %310 {offsets = [0, 96], sizes = [2, 32], strides = [1, 1]} : vector<2x128xf32> to vector<2x32xf32>
    %326 = arith.negf %325 : vector<2x32xf32>
    %327 = math.exp %326 : vector<2x32xf32>
    %cst_163 = arith.constant 1.000000e+00 : f32
    %328 = vector.broadcast %cst_163 : f32 to vector<2x32xf32>
    %329 = arith.addf %328, %327 : vector<2x32xf32>
    %330 = arith.divf %328, %329 : vector<2x32xf32>
    %331 = arith.mulf %322, %301 : vector<2x32xf32>
    %332 = arith.mulf %316, %324 : vector<2x32xf32>
    %333 = arith.addf %331, %332 : vector<2x32xf32>
    %334 = math.tanh %333 : vector<2x32xf32>
    %335 = arith.mulf %330, %334 : vector<2x32xf32>
    %336 = vector.shape_cast %335 : vector<2x32xf32> to vector<2x1x32xf32>
    %c0_164 = arith.constant 0 : index
    %c4_165 = arith.constant 4 : index
    %c0_166 = arith.constant 0 : index
    %337 = vector.load %arg14[%c0_164, %c4_165, %c0_166] : memref<2x16x32xf32, #tpu.memory_space<vmem>>, vector<2x1x32xf32>
    tpu.vector_store %arg14[%c0_164, %c4_165, %c0_166], %336 {strides = array<i32>} : memref<2x16x32xf32, #tpu.memory_space<vmem>>, vector<2x1x32xf32>,
    %338 = vector.extract_strided_slice %174 {offsets = [0, 5, 0], sizes = [2, 1, 128], strides = [1, 1, 1]} : vector<2x16x128xf32> to vector<2x1x128xf32>
    %339 = vector.shape_cast %338 : vector<2x1x128xf32> to vector<2x128xf32>
    %340 = arith.truncf %335 : vector<2x32xf32> to vector<2x32xbf16>
    %cst_167 = arith.constant dense<0.000000e+00> : vector<2x128xf32>
    %341 = tpu.matmul %340, %175, %cst_167 {dimension_numbers = #tpu.dot_dimension_numbers<[1], [0], [0], [1], [0, 0, 1, 1], [], []>} : vector<2x32xbf16>, vector<32x128xbf16>, vector<2x128xf32> -> vector<2x128xf32>
    %342 = arith.addf %339, %341 : vector<2x128xf32>
    %343 = vector.extract_strided_slice %342 {offsets = [0, 0], sizes = [2, 32], strides = [1, 1]} : vector<2x128xf32> to vector<2x32xf32>
    %344 = arith.negf %343 : vector<2x32xf32>
    %345 = math.exp %344 : vector<2x32xf32>
    %cst_168 = arith.constant 1.000000e+00 : f32
    %346 = vector.broadcast %cst_168 : f32 to vector<2x32xf32>
    %347 = arith.addf %346, %345 : vector<2x32xf32>
    %348 = arith.divf %346, %347 : vector<2x32xf32>
    %349 = vector.extract_strided_slice %342 {offsets = [0, 32], sizes = [2, 32], strides = [1, 1]} : vector<2x128xf32> to vector<2x32xf32>
    %350 = arith.negf %349 : vector<2x32xf32>
    %351 = math.exp %350 : vector<2x32xf32>
    %cst_169 = arith.constant 1.000000e+00 : f32
    %352 = vector.broadcast %cst_169 : f32 to vector<2x32xf32>
    %353 = arith.addf %352, %351 : vector<2x32xf32>
    %354 = arith.divf %352, %353 : vector<2x32xf32>
    %355 = vector.extract_strided_slice %342 {offsets = [0, 64], sizes = [2, 32], strides = [1, 1]} : vector<2x128xf32> to vector<2x32xf32>
    %356 = math.tanh %355 : vector<2x32xf32>
    %357 = vector.extract_strided_slice %342 {offsets = [0, 96], sizes = [2, 32], strides = [1, 1]} : vector<2x128xf32> to vector<2x32xf32>
    %358 = arith.negf %357 : vector<2x32xf32>
    %359 = math.exp %358 : vector<2x32xf32>
    %cst_170 = arith.constant 1.000000e+00 : f32
    %360 = vector.broadcast %cst_170 : f32 to vector<2x32xf32>
    %361 = arith.addf %360, %359 : vector<2x32xf32>
    %362 = arith.divf %360, %361 : vector<2x32xf32>
    %363 = arith.mulf %354, %333 : vector<2x32xf32>
    %364 = arith.mulf %348, %356 : vector<2x32xf32>
    %365 = arith.addf %363, %364 : vector<2x32xf32>
    %366 = math.tanh %365 : vector<2x32xf32>
    %367 = arith.mulf %362, %366 : vector<2x32xf32>
    %368 = vector.shape_cast %367 : vector<2x32xf32> to vector<2x1x32xf32>
    %c0_171 = arith.constant 0 : index
    %c5 = arith.constant 5 : index
    %c0_172 = arith.constant 0 : index
    %369 = vector.load %arg14[%c0_171, %c5, %c0_172] : memref<2x16x32xf32, #tpu.memory_space<vmem>>, vector<2x1x32xf32>
    tpu.vector_store %arg14[%c0_171, %c5, %c0_172], %368 {strides = array<i32>} : memref<2x16x32xf32, #tpu.memory_space<vmem>>, vector<2x1x32xf32>,
    %370 = vector.extract_strided_slice %174 {offsets = [0, 6, 0], sizes = [2, 1, 128], strides = [1, 1, 1]} : vector<2x16x128xf32> to vector<2x1x128xf32>
    %371 = vector.shape_cast %370 : vector<2x1x128xf32> to vector<2x128xf32>
    %372 = arith.truncf %367 : vector<2x32xf32> to vector<2x32xbf16>
    %cst_173 = arith.constant dense<0.000000e+00> : vector<2x128xf32>
    %373 = tpu.matmul %372, %175, %cst_173 {dimension_numbers = #tpu.dot_dimension_numbers<[1], [0], [0], [1], [0, 0, 1, 1], [], []>} : vector<2x32xbf16>, vector<32x128xbf16>, vector<2x128xf32> -> vector<2x128xf32>
    %374 = arith.addf %371, %373 : vector<2x128xf32>
    %375 = vector.extract_strided_slice %374 {offsets = [0, 0], sizes = [2, 32], strides = [1, 1]} : vector<2x128xf32> to vector<2x32xf32>
    %376 = arith.negf %375 : vector<2x32xf32>
    %377 = math.exp %376 : vector<2x32xf32>
    %cst_174 = arith.constant 1.000000e+00 : f32
    %378 = vector.broadcast %cst_174 : f32 to vector<2x32xf32>
    %379 = arith.addf %378, %377 : vector<2x32xf32>
    %380 = arith.divf %378, %379 : vector<2x32xf32>
    %381 = vector.extract_strided_slice %374 {offsets = [0, 32], sizes = [2, 32], strides = [1, 1]} : vector<2x128xf32> to vector<2x32xf32>
    %382 = arith.negf %381 : vector<2x32xf32>
    %383 = math.exp %382 : vector<2x32xf32>
    %cst_175 = arith.constant 1.000000e+00 : f32
    %384 = vector.broadcast %cst_175 : f32 to vector<2x32xf32>
    %385 = arith.addf %384, %383 : vector<2x32xf32>
    %386 = arith.divf %384, %385 : vector<2x32xf32>
    %387 = vector.extract_strided_slice %374 {offsets = [0, 64], sizes = [2, 32], strides = [1, 1]} : vector<2x128xf32> to vector<2x32xf32>
    %388 = math.tanh %387 : vector<2x32xf32>
    %389 = vector.extract_strided_slice %374 {offsets = [0, 96], sizes = [2, 32], strides = [1, 1]} : vector<2x128xf32> to vector<2x32xf32>
    %390 = arith.negf %389 : vector<2x32xf32>
    %391 = math.exp %390 : vector<2x32xf32>
    %cst_176 = arith.constant 1.000000e+00 : f32
    %392 = vector.broadcast %cst_176 : f32 to vector<2x32xf32>
    %393 = arith.addf %392, %391 : vector<2x32xf32>
    %394 = arith.divf %392, %393 : vector<2x32xf32>
    %395 = arith.mulf %386, %365 : vector<2x32xf32>
    %396 = arith.mulf %380, %388 : vector<2x32xf32>
    %397 = arith.addf %395, %396 : vector<2x32xf32>
    %398 = math.tanh %397 : vector<2x32xf32>
    %399 = arith.mulf %394, %398 : vector<2x32xf32>
    %400 = vector.shape_cast %399 : vector<2x32xf32> to vector<2x1x32xf32>
    %c0_177 = arith.constant 0 : index
    %c6_178 = arith.constant 6 : index
    %c0_179 = arith.constant 0 : index
    %401 = vector.load %arg14[%c0_177, %c6_178, %c0_179] : memref<2x16x32xf32, #tpu.memory_space<vmem>>, vector<2x1x32xf32>
    tpu.vector_store %arg14[%c0_177, %c6_178, %c0_179], %400 {strides = array<i32>} : memref<2x16x32xf32, #tpu.memory_space<vmem>>, vector<2x1x32xf32>,
    %402 = vector.extract_strided_slice %174 {offsets = [0, 7, 0], sizes = [2, 1, 128], strides = [1, 1, 1]} : vector<2x16x128xf32> to vector<2x1x128xf32>
    %403 = vector.shape_cast %402 : vector<2x1x128xf32> to vector<2x128xf32>
    %404 = arith.truncf %399 : vector<2x32xf32> to vector<2x32xbf16>
    %cst_180 = arith.constant dense<0.000000e+00> : vector<2x128xf32>
    %405 = tpu.matmul %404, %175, %cst_180 {dimension_numbers = #tpu.dot_dimension_numbers<[1], [0], [0], [1], [0, 0, 1, 1], [], []>} : vector<2x32xbf16>, vector<32x128xbf16>, vector<2x128xf32> -> vector<2x128xf32>
    %406 = arith.addf %403, %405 : vector<2x128xf32>
    %407 = vector.extract_strided_slice %406 {offsets = [0, 0], sizes = [2, 32], strides = [1, 1]} : vector<2x128xf32> to vector<2x32xf32>
    %408 = arith.negf %407 : vector<2x32xf32>
    %409 = math.exp %408 : vector<2x32xf32>
    %cst_181 = arith.constant 1.000000e+00 : f32
    %410 = vector.broadcast %cst_181 : f32 to vector<2x32xf32>
    %411 = arith.addf %410, %409 : vector<2x32xf32>
    %412 = arith.divf %410, %411 : vector<2x32xf32>
    %413 = vector.extract_strided_slice %406 {offsets = [0, 32], sizes = [2, 32], strides = [1, 1]} : vector<2x128xf32> to vector<2x32xf32>
    %414 = arith.negf %413 : vector<2x32xf32>
    %415 = math.exp %414 : vector<2x32xf32>
    %cst_182 = arith.constant 1.000000e+00 : f32
    %416 = vector.broadcast %cst_182 : f32 to vector<2x32xf32>
    %417 = arith.addf %416, %415 : vector<2x32xf32>
    %418 = arith.divf %416, %417 : vector<2x32xf32>
    %419 = vector.extract_strided_slice %406 {offsets = [0, 64], sizes = [2, 32], strides = [1, 1]} : vector<2x128xf32> to vector<2x32xf32>
    %420 = math.tanh %419 : vector<2x32xf32>
    %421 = vector.extract_strided_slice %406 {offsets = [0, 96], sizes = [2, 32], strides = [1, 1]} : vector<2x128xf32> to vector<2x32xf32>
    %422 = arith.negf %421 : vector<2x32xf32>
    %423 = math.exp %422 : vector<2x32xf32>
    %cst_183 = arith.constant 1.000000e+00 : f32
    %424 = vector.broadcast %cst_183 : f32 to vector<2x32xf32>
    %425 = arith.addf %424, %423 : vector<2x32xf32>
    %426 = arith.divf %424, %425 : vector<2x32xf32>
    %427 = arith.mulf %418, %397 : vector<2x32xf32>
    %428 = arith.mulf %412, %420 : vector<2x32xf32>
    %429 = arith.addf %427, %428 : vector<2x32xf32>
    %430 = math.tanh %429 : vector<2x32xf32>
    %431 = arith.mulf %426, %430 : vector<2x32xf32>
    %432 = vector.shape_cast %431 : vector<2x32xf32> to vector<2x1x32xf32>
    %c0_184 = arith.constant 0 : index
    %c7 = arith.constant 7 : index
    %c0_185 = arith.constant 0 : index
    %433 = vector.load %arg14[%c0_184, %c7, %c0_185] : memref<2x16x32xf32, #tpu.memory_space<vmem>>, vector<2x1x32xf32>
    tpu.vector_store %arg14[%c0_184, %c7, %c0_185], %432 {strides = array<i32>} : memref<2x16x32xf32, #tpu.memory_space<vmem>>, vector<2x1x32xf32>,
    %434 = vector.extract_strided_slice %174 {offsets = [0, 8, 0], sizes = [2, 1, 128], strides = [1, 1, 1]} : vector<2x16x128xf32> to vector<2x1x128xf32>
    %435 = vector.shape_cast %434 : vector<2x1x128xf32> to vector<2x128xf32>
    %436 = arith.truncf %431 : vector<2x32xf32> to vector<2x32xbf16>
    %cst_186 = arith.constant dense<0.000000e+00> : vector<2x128xf32>
    %437 = tpu.matmul %436, %175, %cst_186 {dimension_numbers = #tpu.dot_dimension_numbers<[1], [0], [0], [1], [0, 0, 1, 1], [], []>} : vector<2x32xbf16>, vector<32x128xbf16>, vector<2x128xf32> -> vector<2x128xf32>
    %438 = arith.addf %435, %437 : vector<2x128xf32>
    %439 = vector.extract_strided_slice %438 {offsets = [0, 0], sizes = [2, 32], strides = [1, 1]} : vector<2x128xf32> to vector<2x32xf32>
    %440 = arith.negf %439 : vector<2x32xf32>
    %441 = math.exp %440 : vector<2x32xf32>
    %cst_187 = arith.constant 1.000000e+00 : f32
    %442 = vector.broadcast %cst_187 : f32 to vector<2x32xf32>
    %443 = arith.addf %442, %441 : vector<2x32xf32>
    %444 = arith.divf %442, %443 : vector<2x32xf32>
    %445 = vector.extract_strided_slice %438 {offsets = [0, 32], sizes = [2, 32], strides = [1, 1]} : vector<2x128xf32> to vector<2x32xf32>
    %446 = arith.negf %445 : vector<2x32xf32>
    %447 = math.exp %446 : vector<2x32xf32>
    %cst_188 = arith.constant 1.000000e+00 : f32
    %448 = vector.broadcast %cst_188 : f32 to vector<2x32xf32>
    %449 = arith.addf %448, %447 : vector<2x32xf32>
    %450 = arith.divf %448, %449 : vector<2x32xf32>
    %451 = vector.extract_strided_slice %438 {offsets = [0, 64], sizes = [2, 32], strides = [1, 1]} : vector<2x128xf32> to vector<2x32xf32>
    %452 = math.tanh %451 : vector<2x32xf32>
    %453 = vector.extract_strided_slice %438 {offsets = [0, 96], sizes = [2, 32], strides = [1, 1]} : vector<2x128xf32> to vector<2x32xf32>
    %454 = arith.negf %453 : vector<2x32xf32>
    %455 = math.exp %454 : vector<2x32xf32>
    %cst_189 = arith.constant 1.000000e+00 : f32
    %456 = vector.broadcast %cst_189 : f32 to vector<2x32xf32>
    %457 = arith.addf %456, %455 : vector<2x32xf32>
    %458 = arith.divf %456, %457 : vector<2x32xf32>
    %459 = arith.mulf %450, %429 : vector<2x32xf32>
    %460 = arith.mulf %444, %452 : vector<2x32xf32>
    %461 = arith.addf %459, %460 : vector<2x32xf32>
    %462 = math.tanh %461 : vector<2x32xf32>
    %463 = arith.mulf %458, %462 : vector<2x32xf32>
    %464 = vector.shape_cast %463 : vector<2x32xf32> to vector<2x1x32xf32>
    %c0_190 = arith.constant 0 : index
    %c8_191 = arith.constant 8 : index
    %c0_192 = arith.constant 0 : index
    %465 = vector.load %arg14[%c0_190, %c8_191, %c0_192] : memref<2x16x32xf32, #tpu.memory_space<vmem>>, vector<2x1x32xf32>
    tpu.vector_store %arg14[%c0_190, %c8_191, %c0_192], %464 {strides = array<i32>} : memref<2x16x32xf32, #tpu.memory_space<vmem>>, vector<2x1x32xf32>,
    %466 = vector.extract_strided_slice %174 {offsets = [0, 9, 0], sizes = [2, 1, 128], strides = [1, 1, 1]} : vector<2x16x128xf32> to vector<2x1x128xf32>
    %467 = vector.shape_cast %466 : vector<2x1x128xf32> to vector<2x128xf32>
    %468 = arith.truncf %463 : vector<2x32xf32> to vector<2x32xbf16>
    %cst_193 = arith.constant dense<0.000000e+00> : vector<2x128xf32>
    %469 = tpu.matmul %468, %175, %cst_193 {dimension_numbers = #tpu.dot_dimension_numbers<[1], [0], [0], [1], [0, 0, 1, 1], [], []>} : vector<2x32xbf16>, vector<32x128xbf16>, vector<2x128xf32> -> vector<2x128xf32>
    %470 = arith.addf %467, %469 : vector<2x128xf32>
    %471 = vector.extract_strided_slice %470 {offsets = [0, 0], sizes = [2, 32], strides = [1, 1]} : vector<2x128xf32> to vector<2x32xf32>
    %472 = arith.negf %471 : vector<2x32xf32>
    %473 = math.exp %472 : vector<2x32xf32>
    %cst_194 = arith.constant 1.000000e+00 : f32
    %474 = vector.broadcast %cst_194 : f32 to vector<2x32xf32>
    %475 = arith.addf %474, %473 : vector<2x32xf32>
    %476 = arith.divf %474, %475 : vector<2x32xf32>
    %477 = vector.extract_strided_slice %470 {offsets = [0, 32], sizes = [2, 32], strides = [1, 1]} : vector<2x128xf32> to vector<2x32xf32>
    %478 = arith.negf %477 : vector<2x32xf32>
    %479 = math.exp %478 : vector<2x32xf32>
    %cst_195 = arith.constant 1.000000e+00 : f32
    %480 = vector.broadcast %cst_195 : f32 to vector<2x32xf32>
    %481 = arith.addf %480, %479 : vector<2x32xf32>
    %482 = arith.divf %480, %481 : vector<2x32xf32>
    %483 = vector.extract_strided_slice %470 {offsets = [0, 64], sizes = [2, 32], strides = [1, 1]} : vector<2x128xf32> to vector<2x32xf32>
    %484 = math.tanh %483 : vector<2x32xf32>
    %485 = vector.extract_strided_slice %470 {offsets = [0, 96], sizes = [2, 32], strides = [1, 1]} : vector<2x128xf32> to vector<2x32xf32>
    %486 = arith.negf %485 : vector<2x32xf32>
    %487 = math.exp %486 : vector<2x32xf32>
    %cst_196 = arith.constant 1.000000e+00 : f32
    %488 = vector.broadcast %cst_196 : f32 to vector<2x32xf32>
    %489 = arith.addf %488, %487 : vector<2x32xf32>
    %490 = arith.divf %488, %489 : vector<2x32xf32>
    %491 = arith.mulf %482, %461 : vector<2x32xf32>
    %492 = arith.mulf %476, %484 : vector<2x32xf32>
    %493 = arith.addf %491, %492 : vector<2x32xf32>
    %494 = math.tanh %493 : vector<2x32xf32>
    %495 = arith.mulf %490, %494 : vector<2x32xf32>
    %496 = vector.shape_cast %495 : vector<2x32xf32> to vector<2x1x32xf32>
    %c0_197 = arith.constant 0 : index
    %c9 = arith.constant 9 : index
    %c0_198 = arith.constant 0 : index
    %497 = vector.load %arg14[%c0_197, %c9, %c0_198] : memref<2x16x32xf32, #tpu.memory_space<vmem>>, vector<2x1x32xf32>
    tpu.vector_store %arg14[%c0_197, %c9, %c0_198], %496 {strides = array<i32>} : memref<2x16x32xf32, #tpu.memory_space<vmem>>, vector<2x1x32xf32>,
    %498 = vector.extract_strided_slice %174 {offsets = [0, 10, 0], sizes = [2, 1, 128], strides = [1, 1, 1]} : vector<2x16x128xf32> to vector<2x1x128xf32>
    %499 = vector.shape_cast %498 : vector<2x1x128xf32> to vector<2x128xf32>
    %500 = arith.truncf %495 : vector<2x32xf32> to vector<2x32xbf16>
    %cst_199 = arith.constant dense<0.000000e+00> : vector<2x128xf32>
    %501 = tpu.matmul %500, %175, %cst_199 {dimension_numbers = #tpu.dot_dimension_numbers<[1], [0], [0], [1], [0, 0, 1, 1], [], []>} : vector<2x32xbf16>, vector<32x128xbf16>, vector<2x128xf32> -> vector<2x128xf32>
    %502 = arith.addf %499, %501 : vector<2x128xf32>
    %503 = vector.extract_strided_slice %502 {offsets = [0, 0], sizes = [2, 32], strides = [1, 1]} : vector<2x128xf32> to vector<2x32xf32>
    %504 = arith.negf %503 : vector<2x32xf32>
    %505 = math.exp %504 : vector<2x32xf32>
    %cst_200 = arith.constant 1.000000e+00 : f32
    %506 = vector.broadcast %cst_200 : f32 to vector<2x32xf32>
    %507 = arith.addf %506, %505 : vector<2x32xf32>
    %508 = arith.divf %506, %507 : vector<2x32xf32>
    %509 = vector.extract_strided_slice %502 {offsets = [0, 32], sizes = [2, 32], strides = [1, 1]} : vector<2x128xf32> to vector<2x32xf32>
    %510 = arith.negf %509 : vector<2x32xf32>
    %511 = math.exp %510 : vector<2x32xf32>
    %cst_201 = arith.constant 1.000000e+00 : f32
    %512 = vector.broadcast %cst_201 : f32 to vector<2x32xf32>
    %513 = arith.addf %512, %511 : vector<2x32xf32>
    %514 = arith.divf %512, %513 : vector<2x32xf32>
    %515 = vector.extract_strided_slice %502 {offsets = [0, 64], sizes = [2, 32], strides = [1, 1]} : vector<2x128xf32> to vector<2x32xf32>
    %516 = math.tanh %515 : vector<2x32xf32>
    %517 = vector.extract_strided_slice %502 {offsets = [0, 96], sizes = [2, 32], strides = [1, 1]} : vector<2x128xf32> to vector<2x32xf32>
    %518 = arith.negf %517 : vector<2x32xf32>
    %519 = math.exp %518 : vector<2x32xf32>
    %cst_202 = arith.constant 1.000000e+00 : f32
    %520 = vector.broadcast %cst_202 : f32 to vector<2x32xf32>
    %521 = arith.addf %520, %519 : vector<2x32xf32>
    %522 = arith.divf %520, %521 : vector<2x32xf32>
    %523 = arith.mulf %514, %493 : vector<2x32xf32>
    %524 = arith.mulf %508, %516 : vector<2x32xf32>
    %525 = arith.addf %523, %524 : vector<2x32xf32>
    %526 = math.tanh %525 : vector<2x32xf32>
    %527 = arith.mulf %522, %526 : vector<2x32xf32>
    %528 = vector.shape_cast %527 : vector<2x32xf32> to vector<2x1x32xf32>
    %c0_203 = arith.constant 0 : index
    %c10 = arith.constant 10 : index
    %c0_204 = arith.constant 0 : index
    %529 = vector.load %arg14[%c0_203, %c10, %c0_204] : memref<2x16x32xf32, #tpu.memory_space<vmem>>, vector<2x1x32xf32>
    tpu.vector_store %arg14[%c0_203, %c10, %c0_204], %528 {strides = array<i32>} : memref<2x16x32xf32, #tpu.memory_space<vmem>>, vector<2x1x32xf32>,
    %530 = vector.extract_strided_slice %174 {offsets = [0, 11, 0], sizes = [2, 1, 128], strides = [1, 1, 1]} : vector<2x16x128xf32> to vector<2x1x128xf32>
    %531 = vector.shape_cast %530 : vector<2x1x128xf32> to vector<2x128xf32>
    %532 = arith.truncf %527 : vector<2x32xf32> to vector<2x32xbf16>
    %cst_205 = arith.constant dense<0.000000e+00> : vector<2x128xf32>
    %533 = tpu.matmul %532, %175, %cst_205 {dimension_numbers = #tpu.dot_dimension_numbers<[1], [0], [0], [1], [0, 0, 1, 1], [], []>} : vector<2x32xbf16>, vector<32x128xbf16>, vector<2x128xf32> -> vector<2x128xf32>
    %534 = arith.addf %531, %533 : vector<2x128xf32>
    %535 = vector.extract_strided_slice %534 {offsets = [0, 0], sizes = [2, 32], strides = [1, 1]} : vector<2x128xf32> to vector<2x32xf32>
    %536 = arith.negf %535 : vector<2x32xf32>
    %537 = math.exp %536 : vector<2x32xf32>
    %cst_206 = arith.constant 1.000000e+00 : f32
    %538 = vector.broadcast %cst_206 : f32 to vector<2x32xf32>
    %539 = arith.addf %538, %537 : vector<2x32xf32>
    %540 = arith.divf %538, %539 : vector<2x32xf32>
    %541 = vector.extract_strided_slice %534 {offsets = [0, 32], sizes = [2, 32], strides = [1, 1]} : vector<2x128xf32> to vector<2x32xf32>
    %542 = arith.negf %541 : vector<2x32xf32>
    %543 = math.exp %542 : vector<2x32xf32>
    %cst_207 = arith.constant 1.000000e+00 : f32
    %544 = vector.broadcast %cst_207 : f32 to vector<2x32xf32>
    %545 = arith.addf %544, %543 : vector<2x32xf32>
    %546 = arith.divf %544, %545 : vector<2x32xf32>
    %547 = vector.extract_strided_slice %534 {offsets = [0, 64], sizes = [2, 32], strides = [1, 1]} : vector<2x128xf32> to vector<2x32xf32>
    %548 = math.tanh %547 : vector<2x32xf32>
    %549 = vector.extract_strided_slice %534 {offsets = [0, 96], sizes = [2, 32], strides = [1, 1]} : vector<2x128xf32> to vector<2x32xf32>
    %550 = arith.negf %549 : vector<2x32xf32>
    %551 = math.exp %550 : vector<2x32xf32>
    %cst_208 = arith.constant 1.000000e+00 : f32
    %552 = vector.broadcast %cst_208 : f32 to vector<2x32xf32>
    %553 = arith.addf %552, %551 : vector<2x32xf32>
    %554 = arith.divf %552, %553 : vector<2x32xf32>
    %555 = arith.mulf %546, %525 : vector<2x32xf32>
    %556 = arith.mulf %540, %548 : vector<2x32xf32>
    %557 = arith.addf %555, %556 : vector<2x32xf32>
    %558 = math.tanh %557 : vector<2x32xf32>
    %559 = arith.mulf %554, %558 : vector<2x32xf32>
    %560 = vector.shape_cast %559 : vector<2x32xf32> to vector<2x1x32xf32>
    %c0_209 = arith.constant 0 : index
    %c11 = arith.constant 11 : index
    %c0_210 = arith.constant 0 : index
    %561 = vector.load %arg14[%c0_209, %c11, %c0_210] : memref<2x16x32xf32, #tpu.memory_space<vmem>>, vector<2x1x32xf32>
    tpu.vector_store %arg14[%c0_209, %c11, %c0_210], %560 {strides = array<i32>} : memref<2x16x32xf32, #tpu.memory_space<vmem>>, vector<2x1x32xf32>,
    %562 = vector.extract_strided_slice %174 {offsets = [0, 12, 0], sizes = [2, 1, 128], strides = [1, 1, 1]} : vector<2x16x128xf32> to vector<2x1x128xf32>
    %563 = vector.shape_cast %562 : vector<2x1x128xf32> to vector<2x128xf32>
    %564 = arith.truncf %559 : vector<2x32xf32> to vector<2x32xbf16>
    %cst_211 = arith.constant dense<0.000000e+00> : vector<2x128xf32>
    %565 = tpu.matmul %564, %175, %cst_211 {dimension_numbers = #tpu.dot_dimension_numbers<[1], [0], [0], [1], [0, 0, 1, 1], [], []>} : vector<2x32xbf16>, vector<32x128xbf16>, vector<2x128xf32> -> vector<2x128xf32>
    %566 = arith.addf %563, %565 : vector<2x128xf32>
    %567 = vector.extract_strided_slice %566 {offsets = [0, 0], sizes = [2, 32], strides = [1, 1]} : vector<2x128xf32> to vector<2x32xf32>
    %568 = arith.negf %567 : vector<2x32xf32>
    %569 = math.exp %568 : vector<2x32xf32>
    %cst_212 = arith.constant 1.000000e+00 : f32
    %570 = vector.broadcast %cst_212 : f32 to vector<2x32xf32>
    %571 = arith.addf %570, %569 : vector<2x32xf32>
    %572 = arith.divf %570, %571 : vector<2x32xf32>
    %573 = vector.extract_strided_slice %566 {offsets = [0, 32], sizes = [2, 32], strides = [1, 1]} : vector<2x128xf32> to vector<2x32xf32>
    %574 = arith.negf %573 : vector<2x32xf32>
    %575 = math.exp %574 : vector<2x32xf32>
    %cst_213 = arith.constant 1.000000e+00 : f32
    %576 = vector.broadcast %cst_213 : f32 to vector<2x32xf32>
    %577 = arith.addf %576, %575 : vector<2x32xf32>
    %578 = arith.divf %576, %577 : vector<2x32xf32>
    %579 = vector.extract_strided_slice %566 {offsets = [0, 64], sizes = [2, 32], strides = [1, 1]} : vector<2x128xf32> to vector<2x32xf32>
    %580 = math.tanh %579 : vector<2x32xf32>
    %581 = vector.extract_strided_slice %566 {offsets = [0, 96], sizes = [2, 32], strides = [1, 1]} : vector<2x128xf32> to vector<2x32xf32>
    %582 = arith.negf %581 : vector<2x32xf32>
    %583 = math.exp %582 : vector<2x32xf32>
    %cst_214 = arith.constant 1.000000e+00 : f32
    %584 = vector.broadcast %cst_214 : f32 to vector<2x32xf32>
    %585 = arith.addf %584, %583 : vector<2x32xf32>
    %586 = arith.divf %584, %585 : vector<2x32xf32>
    %587 = arith.mulf %578, %557 : vector<2x32xf32>
    %588 = arith.mulf %572, %580 : vector<2x32xf32>
    %589 = arith.addf %587, %588 : vector<2x32xf32>
    %590 = math.tanh %589 : vector<2x32xf32>
    %591 = arith.mulf %586, %590 : vector<2x32xf32>
    %592 = vector.shape_cast %591 : vector<2x32xf32> to vector<2x1x32xf32>
    %c0_215 = arith.constant 0 : index
    %c12 = arith.constant 12 : index
    %c0_216 = arith.constant 0 : index
    %593 = vector.load %arg14[%c0_215, %c12, %c0_216] : memref<2x16x32xf32, #tpu.memory_space<vmem>>, vector<2x1x32xf32>
    tpu.vector_store %arg14[%c0_215, %c12, %c0_216], %592 {strides = array<i32>} : memref<2x16x32xf32, #tpu.memory_space<vmem>>, vector<2x1x32xf32>,
    %594 = vector.extract_strided_slice %174 {offsets = [0, 13, 0], sizes = [2, 1, 128], strides = [1, 1, 1]} : vector<2x16x128xf32> to vector<2x1x128xf32>
    %595 = vector.shape_cast %594 : vector<2x1x128xf32> to vector<2x128xf32>
    %596 = arith.truncf %591 : vector<2x32xf32> to vector<2x32xbf16>
    %cst_217 = arith.constant dense<0.000000e+00> : vector<2x128xf32>
    %597 = tpu.matmul %596, %175, %cst_217 {dimension_numbers = #tpu.dot_dimension_numbers<[1], [0], [0], [1], [0, 0, 1, 1], [], []>} : vector<2x32xbf16>, vector<32x128xbf16>, vector<2x128xf32> -> vector<2x128xf32>
    %598 = arith.addf %595, %597 : vector<2x128xf32>
    %599 = vector.extract_strided_slice %598 {offsets = [0, 0], sizes = [2, 32], strides = [1, 1]} : vector<2x128xf32> to vector<2x32xf32>
    %600 = arith.negf %599 : vector<2x32xf32>
    %601 = math.exp %600 : vector<2x32xf32>
    %cst_218 = arith.constant 1.000000e+00 : f32
    %602 = vector.broadcast %cst_218 : f32 to vector<2x32xf32>
    %603 = arith.addf %602, %601 : vector<2x32xf32>
    %604 = arith.divf %602, %603 : vector<2x32xf32>
    %605 = vector.extract_strided_slice %598 {offsets = [0, 32], sizes = [2, 32], strides = [1, 1]} : vector<2x128xf32> to vector<2x32xf32>
    %606 = arith.negf %605 : vector<2x32xf32>
    %607 = math.exp %606 : vector<2x32xf32>
    %cst_219 = arith.constant 1.000000e+00 : f32
    %608 = vector.broadcast %cst_219 : f32 to vector<2x32xf32>
    %609 = arith.addf %608, %607 : vector<2x32xf32>
    %610 = arith.divf %608, %609 : vector<2x32xf32>
    %611 = vector.extract_strided_slice %598 {offsets = [0, 64], sizes = [2, 32], strides = [1, 1]} : vector<2x128xf32> to vector<2x32xf32>
    %612 = math.tanh %611 : vector<2x32xf32>
    %613 = vector.extract_strided_slice %598 {offsets = [0, 96], sizes = [2, 32], strides = [1, 1]} : vector<2x128xf32> to vector<2x32xf32>
    %614 = arith.negf %613 : vector<2x32xf32>
    %615 = math.exp %614 : vector<2x32xf32>
    %cst_220 = arith.constant 1.000000e+00 : f32
    %616 = vector.broadcast %cst_220 : f32 to vector<2x32xf32>
    %617 = arith.addf %616, %615 : vector<2x32xf32>
    %618 = arith.divf %616, %617 : vector<2x32xf32>
    %619 = arith.mulf %610, %589 : vector<2x32xf32>
    %620 = arith.mulf %604, %612 : vector<2x32xf32>
    %621 = arith.addf %619, %620 : vector<2x32xf32>
    %622 = math.tanh %621 : vector<2x32xf32>
    %623 = arith.mulf %618, %622 : vector<2x32xf32>
    %624 = vector.shape_cast %623 : vector<2x32xf32> to vector<2x1x32xf32>
    %c0_221 = arith.constant 0 : index
    %c13 = arith.constant 13 : index
    %c0_222 = arith.constant 0 : index
    %625 = vector.load %arg14[%c0_221, %c13, %c0_222] : memref<2x16x32xf32, #tpu.memory_space<vmem>>, vector<2x1x32xf32>
    tpu.vector_store %arg14[%c0_221, %c13, %c0_222], %624 {strides = array<i32>} : memref<2x16x32xf32, #tpu.memory_space<vmem>>, vector<2x1x32xf32>,
    %626 = vector.extract_strided_slice %174 {offsets = [0, 14, 0], sizes = [2, 1, 128], strides = [1, 1, 1]} : vector<2x16x128xf32> to vector<2x1x128xf32>
    %627 = vector.shape_cast %626 : vector<2x1x128xf32> to vector<2x128xf32>
    %628 = arith.truncf %623 : vector<2x32xf32> to vector<2x32xbf16>
    %cst_223 = arith.constant dense<0.000000e+00> : vector<2x128xf32>
    %629 = tpu.matmul %628, %175, %cst_223 {dimension_numbers = #tpu.dot_dimension_numbers<[1], [0], [0], [1], [0, 0, 1, 1], [], []>} : vector<2x32xbf16>, vector<32x128xbf16>, vector<2x128xf32> -> vector<2x128xf32>
    %630 = arith.addf %627, %629 : vector<2x128xf32>
    %631 = vector.extract_strided_slice %630 {offsets = [0, 0], sizes = [2, 32], strides = [1, 1]} : vector<2x128xf32> to vector<2x32xf32>
    %632 = arith.negf %631 : vector<2x32xf32>
    %633 = math.exp %632 : vector<2x32xf32>
    %cst_224 = arith.constant 1.000000e+00 : f32
    %634 = vector.broadcast %cst_224 : f32 to vector<2x32xf32>
    %635 = arith.addf %634, %633 : vector<2x32xf32>
    %636 = arith.divf %634, %635 : vector<2x32xf32>
    %637 = vector.extract_strided_slice %630 {offsets = [0, 32], sizes = [2, 32], strides = [1, 1]} : vector<2x128xf32> to vector<2x32xf32>
    %638 = arith.negf %637 : vector<2x32xf32>
    %639 = math.exp %638 : vector<2x32xf32>
    %cst_225 = arith.constant 1.000000e+00 : f32
    %640 = vector.broadcast %cst_225 : f32 to vector<2x32xf32>
    %641 = arith.addf %640, %639 : vector<2x32xf32>
    %642 = arith.divf %640, %641 : vector<2x32xf32>
    %643 = vector.extract_strided_slice %630 {offsets = [0, 64], sizes = [2, 32], strides = [1, 1]} : vector<2x128xf32> to vector<2x32xf32>
    %644 = math.tanh %643 : vector<2x32xf32>
    %645 = vector.extract_strided_slice %630 {offsets = [0, 96], sizes = [2, 32], strides = [1, 1]} : vector<2x128xf32> to vector<2x32xf32>
    %646 = arith.negf %645 : vector<2x32xf32>
    %647 = math.exp %646 : vector<2x32xf32>
    %cst_226 = arith.constant 1.000000e+00 : f32
    %648 = vector.broadcast %cst_226 : f32 to vector<2x32xf32>
    %649 = arith.addf %648, %647 : vector<2x32xf32>
    %650 = arith.divf %648, %649 : vector<2x32xf32>
    %651 = arith.mulf %642, %621 : vector<2x32xf32>
    %652 = arith.mulf %636, %644 : vector<2x32xf32>
    %653 = arith.addf %651, %652 : vector<2x32xf32>
    %654 = math.tanh %653 : vector<2x32xf32>
    %655 = arith.mulf %650, %654 : vector<2x32xf32>
    %656 = vector.shape_cast %655 : vector<2x32xf32> to vector<2x1x32xf32>
    %c0_227 = arith.constant 0 : index
    %c14 = arith.constant 14 : index
    %c0_228 = arith.constant 0 : index
    %657 = vector.load %arg14[%c0_227, %c14, %c0_228] : memref<2x16x32xf32, #tpu.memory_space<vmem>>, vector<2x1x32xf32>
    tpu.vector_store %arg14[%c0_227, %c14, %c0_228], %656 {strides = array<i32>} : memref<2x16x32xf32, #tpu.memory_space<vmem>>, vector<2x1x32xf32>,
    %658 = vector.extract_strided_slice %174 {offsets = [0, 15, 0], sizes = [2, 1, 128], strides = [1, 1, 1]} : vector<2x16x128xf32> to vector<2x1x128xf32>
    %659 = vector.shape_cast %658 : vector<2x1x128xf32> to vector<2x128xf32>
    %660 = arith.truncf %655 : vector<2x32xf32> to vector<2x32xbf16>
    %cst_229 = arith.constant dense<0.000000e+00> : vector<2x128xf32>
    %661 = tpu.matmul %660, %175, %cst_229 {dimension_numbers = #tpu.dot_dimension_numbers<[1], [0], [0], [1], [0, 0, 1, 1], [], []>} : vector<2x32xbf16>, vector<32x128xbf16>, vector<2x128xf32> -> vector<2x128xf32>
    %662 = arith.addf %659, %661 : vector<2x128xf32>
    %663 = vector.extract_strided_slice %662 {offsets = [0, 0], sizes = [2, 32], strides = [1, 1]} : vector<2x128xf32> to vector<2x32xf32>
    %664 = arith.negf %663 : vector<2x32xf32>
    %665 = math.exp %664 : vector<2x32xf32>
    %cst_230 = arith.constant 1.000000e+00 : f32
    %666 = vector.broadcast %cst_230 : f32 to vector<2x32xf32>
    %667 = arith.addf %666, %665 : vector<2x32xf32>
    %668 = arith.divf %666, %667 : vector<2x32xf32>
    %669 = vector.extract_strided_slice %662 {offsets = [0, 32], sizes = [2, 32], strides = [1, 1]} : vector<2x128xf32> to vector<2x32xf32>
    %670 = arith.negf %669 : vector<2x32xf32>
    %671 = math.exp %670 : vector<2x32xf32>
    %cst_231 = arith.constant 1.000000e+00 : f32
    %672 = vector.broadcast %cst_231 : f32 to vector<2x32xf32>
    %673 = arith.addf %672, %671 : vector<2x32xf32>
    %674 = arith.divf %672, %673 : vector<2x32xf32>
    %675 = vector.extract_strided_slice %662 {offsets = [0, 64], sizes = [2, 32], strides = [1, 1]} : vector<2x128xf32> to vector<2x32xf32>
    %676 = math.tanh %675 : vector<2x32xf32>
    %677 = vector.extract_strided_slice %662 {offsets = [0, 96], sizes = [2, 32], strides = [1, 1]} : vector<2x128xf32> to vector<2x32xf32>
    %678 = arith.negf %677 : vector<2x32xf32>
    %679 = math.exp %678 : vector<2x32xf32>
    %cst_232 = arith.constant 1.000000e+00 : f32
    %680 = vector.broadcast %cst_232 : f32 to vector<2x32xf32>
    %681 = arith.addf %680, %679 : vector<2x32xf32>
    %682 = arith.divf %680, %681 : vector<2x32xf32>
    %683 = arith.mulf %674, %653 : vector<2x32xf32>
    %684 = arith.mulf %668, %676 : vector<2x32xf32>
    %685 = arith.addf %683, %684 : vector<2x32xf32>
    %686 = math.tanh %685 : vector<2x32xf32>
    %687 = arith.mulf %682, %686 : vector<2x32xf32>
    %688 = vector.shape_cast %687 : vector<2x32xf32> to vector<2x1x32xf32>
    %c0_233 = arith.constant 0 : index
    %c15 = arith.constant 15 : index
    %c0_234 = arith.constant 0 : index
    %689 = vector.load %arg14[%c0_233, %c15, %c0_234] : memref<2x16x32xf32, #tpu.memory_space<vmem>>, vector<2x1x32xf32>
    tpu.vector_store %arg14[%c0_233, %c15, %c0_234], %688 {strides = array<i32>} : memref<2x16x32xf32, #tpu.memory_space<vmem>>, vector<2x1x32xf32>,
    %c0_235 = arith.constant 0 : index
    %c0_236 = arith.constant 0 : index
    %c0_237 = arith.constant 0 : index
    %690 = vector.load %arg14[%c0_235, %c0_236, %c0_237] : memref<2x16x32xf32, #tpu.memory_space<vmem>>, vector<2x16x32xf32>
    %691 = vector.shape_cast %690 : vector<2x16x32xf32> to vector<32x32xf32>
    %692 = arith.truncf %691 : vector<32x32xf32> to vector<32x32xbf16>
    %c0_238 = arith.constant 0 : index
    %c0_239 = arith.constant 0 : index
    %693 = vector.load %arg10[%c0_238, %c0_239] : memref<32x1xbf16, #tpu.memory_space<vmem>>, vector<32x1xbf16>
    %cst_240 = arith.constant dense<0.000000e+00> : vector<32x1xf32>
    %694 = tpu.matmul %692, %693, %cst_240 {dimension_numbers = #tpu.dot_dimension_numbers<[1], [0], [0], [1], [0, 0, 1, 1], [], []>} : vector<32x32xbf16>, vector<32x1xbf16>, vector<32x1xf32> -> vector<32x1xf32>
    %c0_241 = arith.constant 0 : index
    %c0_242 = arith.constant 0 : index
    %695 = vector.load %arg11[%c0_241, %c0_242] : memref<1x1xf32, #tpu.memory_space<vmem>>, vector<1x1xf32>
    %696 = vector.broadcast %695 : vector<1x1xf32> to vector<32x1xf32>
    %697 = arith.addf %694, %696 : vector<32x1xf32>
    %698 = vector.shape_cast %697 : vector<32x1xf32> to vector<2x16x1xf32>
    %c0_243 = arith.constant 0 : index
    %c0_244 = arith.constant 0 : index
    %c0_245 = arith.constant 0 : index
    %699 = vector.load %arg12[%c0_243, %c0_244, %c0_245] : memref<2x16x1xf32, #tpu.memory_space<vmem>>, vector<2x16x1xf32>
    tpu.vector_store %arg12[%c0_243, %c0_244, %c0_245], %698 {strides = array<i32>} : memref<2x16x1xf32, #tpu.memory_space<vmem>>, vector<2x16x1xf32>,
    return
  }
}

</mosaic_0001>

<bundles_post_ra>
// kernel: forward.1
= control target key start
LH: loop header
LB: loop body
LE: loop exit
PB: predicated region body
PF: predicated region fallthrough
CT: control target
= control target key end

     0   :  { %vm44_vm0 = vcmask 261120   ;;  %vm55_vm1 = vcmask 31744   ;;  %v4154_v0 = vmov 0.0   ;;  %v4155_v4 = vmov 0   ;;  %s4157_s19 = smov 96   ;;  %s4158_s20 = smov 64   ;;  %s5221_s0 = inlined_call_operand.vmem [shape: f32[2,16,4], index: 0, kind: input, shape index: {}]   ;;  %s5222_s1 = inlined_call_operand.vmem [shape: bf16[160,32], index: 1, kind: input, shape index: {}]   ;;  %s5223_s3 = inlined_call_operand.vmem [shape: bf16[160,32], index: 3, kind: input, shape index: {}]   ;;  %s5224_s2 = inlined_call_operand.vmem [shape: f32[1,32], index: 2, kind: input, shape index: {}]   ;;  %s5225_s5 = inlined_call_operand.vmem [shape: f32[1,32], index: 5, kind: input, shape index: {}]   ;;  %s5226_s6 = inlined_call_operand.vmem [shape: f32[1,32], index: 6, kind: input, shape index: {}]   ;;  %s5227_s4 = inlined_call_operand.vmem [shape: f32[1,32], index: 4, kind: input, shape index: {}]   ;;  %s5228_s8 = inlined_call_operand.vmem [shape: bf16[32,128], index: 8, kind: input, shape index: {}]   ;;  %s5229_s7 = inlined_call_operand.vmem [shape: bf16[32,128], index: 7, kind: input, shape index: {}]   ;;  %s5230_s9 = inlined_call_operand.vmem [shape: f32[1,128], index: 9, kind: input, shape index: {}]   ;;  %s5231_s10 = inlined_call_operand.vmem [shape: bf16[32,1], index: 10, kind: input, shape index: {}]   ;;  %s5232_s11 = inlined_call_operand.<no memory space> [shape: f32[1,1], index: 11, kind: input, shape index: {}]   ;;  %s5233_s12 = inlined_call_operand.vmem [shape: f32[2,16,1], index: 12, kind: output, shape index: {}]  }
   0x1   :  { %45 = vst.msk [vmem:[#allocation2] sm:$0xff] %vm44_vm0, %v4154_v0  ;;  %46 = vst.msk [vmem:[#allocation2 + $0x8] sm:$0xff] %vm44_vm0, %v4154_v0  ;;  %v51_v1 = vld [vmem:[%s5221_s0] sm:$0xff]  ;;  %v52_v2 = vld [vmem:[%s5221_s0 + $0x8] sm:$0xff]  ;;  %239 = vmatprep.subr.bf16.mxu0 %v4155_v4  ;;  %537 = vmatprep.subr.bf16.mxu1 %v4155_v4  ;;  %vm132_vm2 = vcmask 523264   ;;  %vm137_vm3 = vcmask 785408  }
   0x2   :  { %47 = vst.msk [vmem:[#allocation2 + $0x10] sm:$0xff] %vm44_vm0, %v4154_v0  ;;  %v54_v3 = vld [vmem:[%s5221_s0 + $0x18] sm:$0xff]  ;;  %48 = vst.msk [vmem:[#allocation2 + $0x18] sm:$0xff] %vm44_vm0, %v4154_v0  ;;  %v53_v5 = vld [vmem:[%s5221_s0 + $0x10] sm:$0xff]  ;;  %s4156_s0 = smov 32   ;;  %vm4159_vm4 = vmmov 0  }
   0x3   :  { %49 = vst.msk [vmem:[#allocation2 + $0x20] sm:$0xff] %vm44_vm0, %v4154_v0  ;;  %50 = vst.msk [vmem:[#allocation2 + $0x28] sm:$0xff] %vm44_vm0, %v4154_v0  ;;  %v3840_v6 = vld [vmem:[%s5222_s1] sm:$0xff]   ;;  %v3841_v7 = vld [vmem:[%s5222_s1 + $0x8] sm:$0xff]   ;;  %vm1424_vm5 = vcmask 1041409   ;;  %vm1540_vm6 = vcmask 254977  }
   0x4   :  { %56 = vst.msk [vmem:[#allocation2 + $0x4] sm:$0xff] %vm55_vm1, %v51_v1  ;;  %57 = vst.msk [vmem:[#allocation2 + $0xc] sm:$0xff] %vm55_vm1, %v52_v2  ;;  %240 = vmatpush1.bf16.msra.mxu0 %v3840_v6  ;;  %v3842_v8 = vld [vmem:[%s5222_s1 + $0x10] sm:$0xff]   ;;  %v3843_v21 = vld [vmem:[%s5222_s1 + $0x18] sm:$0xff]   ;;  %vm1414_vm7 = vcmask 253952   ;;  %vm1793_vm8 = vcmask 257027  }
   0x5   :  { %59 = vst.msk [vmem:[#allocation2 + $0x24] sm:$0xff] %vm55_vm1, %v54_v3  ;;  %58 = vst.msk [vmem:[#allocation2 + $0x1c] sm:$0xff] %vm55_vm1, %v53_v5  ;;  %241 = vmatprep.subr.bf16.mxu0 %v4155_v4  ;;  %v3844_v27 = vld [vmem:[%s5222_s1 + $0x20] sm:$0xff]   ;;  %v3845_v32 = vld [vmem:[%s5222_s1 + $0x28] sm:$0xff]   ;;  %vm1666_vm9 = vcmask 256002   ;;  %vm2047_vm10 = vcmask 259077  }
   0x6   :  { %v3846_v33 = vld [vmem:[%s5222_s1 + $0x30] sm:$0xff]   ;;  %v3847_v34 = vld [vmem:[%s5222_s1 + $0x38] sm:$0xff]   ;;  %v3848_v35 = vld [vmem:[%s5222_s1 + $0x40] sm:$0xff]   ;;  %vm1920_vm11 = vcmask 258052   ;;  %vm2301_vm12 = vcmask 261127   ;;  %vm2174_vm13 = vcmask 260102  }
   0x7   :  { %v3849_v36 = vld [vmem:[%s5222_s1 + $0x48] sm:$0xff]   ;;  %vm3392_vm14 = vcmask 7168  }
   0x8   :  { %242 = vmatpush1.bf16.msra.mxu0 %v3841_v7 }
   0x9   :  { %243 = vmatprep.subr.bf16.mxu0 %v4155_v4 }
   0xb   :  { %v66_v9 = vld [vmem:[#allocation2 + $0x2] sm:$0xff]  ;;  %v67_v10 = vld [vmem:[#allocation2 + $0xa] sm:$0xff] }
   0xc   :  { %v74_v11 = vld [vmem:[#allocation2 + $0x6] sm:$0xff]  ;;  %v3720_v12 = vpack.i.bf16 %v67_v10, %v66_v9  ;;  %v75_v13 = vld [vmem:[#allocation2 + $0xe] sm:$0xff]  ;;  %v68_v17 = vld [vmem:[#allocation2 + $0x1a] sm:$0xff]  ;;  %244 = vmatpush1.bf16.msra.mxu0 %v3842_v8 }
   0xd   :  { %v70_v14 = vld [vmem:[#allocation2 + $0x4] sm:$0xff]  ;;  %v71_v15 = vld [vmem:[#allocation2 + $0xc] sm:$0xff]  ;;  %v3730_v16 = vpack.i.bf16 %v75_v13, %v74_v11  ;;  %v72_v20 = vld [vmem:[#allocation2 + $0x1c] sm:$0xff]  ;;  %245 = vmatprep.subr.bf16.mxu0 %v4155_v4 }
   0xe   :  { %v69_v18 = vld [vmem:[#allocation2 + $0x22] sm:$0xff]  ;;  %3721 = vrot.lane.b32.xlu0 %v3720_v12, %s4156_s0  ;;  %v3725_v19 = vpack.i.bf16 %v71_v15, %v70_v14  ;;  %v78_v30 = vld [vmem:[#allocation2 + $0x10] sm:$0xff]  ;;  %v64_v48 = vld [vmem:[#allocation2 + $0x18] sm:$0xff] }
   0xf   :  { %3731 = vrot.lane.b32.xlu1 %v3730_v16, %s4157_s19  ;;  %v3735_v22 = vpack.i.bf16 %v69_v18, %v68_v17  ;;  %v73_v23 = vld [vmem:[#allocation2 + $0x24] sm:$0xff]  ;;  %v3852_v14 = vld [vmem:[%s5223_s3 + $0x10] sm:$0xff]   ;;  %v3853_v15 = vld [vmem:[%s5223_s3 + $0x18] sm:$0xff]  }
  0x10   :  { %v76_v24 = vld [vmem:[#allocation2 + $0x1e] sm:$0xff]  ;;  %v77_v25 = vld [vmem:[#allocation2 + $0x26] sm:$0xff]  ;;  %v3740_v26 = vpack.i.bf16 %v73_v23, %v72_v20  ;;  %246 = vmatpush1.bf16.msra.mxu0 %v3843_v21  ;;  %v3856_v18 = vld [vmem:[%s5223_s3 + $0x30] sm:$0xff]  }
  0x11   :  { %v3745_v28 = vpack.i.bf16 %v77_v25, %v76_v24  ;;  %v63_v29 = vld [vmem:[#allocation2 + $0x8] sm:$0xff]  ;;  %247 = vmatprep.subr.bf16.mxu0 %v4155_v4  ;;  %v62_v41 = vld [vmem:[#allocation2] sm:$0xff] }
  0x12   :  { %3726 = vrot.lane.b32.xlu0 %v3725_v19, %s4158_s20  ;;  %v143_v31 = vpack.c.bf16 %v78_v30, %v63_v29  ;;  %v79_v45 = vld [vmem:[#allocation2 + $0x28] sm:$0xff]  ;;  %v65_v49 = vld [vmem:[#allocation2 + $0x20] sm:$0xff]  ;;  %v3857_v19 = vld [vmem:[%s5223_s3 + $0x38] sm:$0xff]  }
  0x13   :  { %3736 = vrot.lane.b32.xlu1 %v3735_v22, %s4156_s0  ;;  %v145_v57 = vpack.c.bf16 %v79_v45, %v65_v49  ;;  %v3850_v12 = vld [vmem:[%s5223_s3] sm:$0xff]   ;;  %v3851_v13 = vld [vmem:[%s5223_s3 + $0x8] sm:$0xff]  }
  0x14   :  { %3412 = vmatprep.mubr.msk.bf16.mxu0 %vm44_vm0, %v143_v31  ;;  %248 = vmatpush1.bf16.msra.mxu0 %v3844_v27  ;;  %v3854_v16 = vld [vmem:[%s5223_s3 + $0x20] sm:$0xff]   ;;  %v3855_v17 = vld [vmem:[%s5223_s3 + $0x28] sm:$0xff]  }
  0x15   :  { %249 = vmatprep.subr.bf16.mxu0 %v4155_v4  ;;  %538 = vmatpush1.bf16.msra.mxu1 %v3850_v12  ;;  %v3401_v20 = vld [vmem:[%s5224_s2] ss:$0 sm:$0xff] }
  0x16   :  { %3741 = vrot.lane.b32.xlu0 %v3740_v26, %s4158_s20  ;;  %539 = vmatprep.subr.bf16.mxu1 %v4155_v4  ;;  %v4361_v12 = vld [vmem:[%s5225_s5] ss:$0 sm:$0xff] }
  0x17   :  { %3746 = vrot.lane.b32.xlu1 %v3745_v28, %s4157_s19 }
  0x18   :  { %250 = vmatpush1.bf16.msra.mxu0 %v3845_v32 }
  0x19   :  { %251 = vmatprep.subr.bf16.mxu0 %v4155_v4  ;;  %540 = vmatpush1.bf16.msra.mxu1 %v3851_v13 }
  0x1a   :  { %541 = vmatprep.subr.bf16.mxu1 %v4155_v4 }
  0x1c   :  { %252 = vmatpush1.bf16.msra.mxu0 %v3846_v33 }
  0x1d   :  { %253 = vmatprep.subr.bf16.mxu0 %v4155_v4  ;;  %542 = vmatpush1.bf16.msra.mxu1 %v3852_v14 }
  0x1e   :  { %543 = vmatprep.subr.bf16.mxu1 %v4155_v4 }
  0x20   :  { %254 = vmatpush1.bf16.msra.mxu0 %v3847_v34 }
  0x21   :  { %255 = vmatprep.subr.bf16.mxu0 %v4155_v4  ;;  %544 = vmatpush1.bf16.msra.mxu1 %v3853_v15 }
  0x22   :  { %545 = vmatprep.subr.bf16.mxu1 %v4155_v4 }
  0x24   :  { %256 = vmatpush1.bf16.msra.mxu0 %v3848_v35 }
  0x25   :  { %257 = vmatprep.subr.bf16.mxu0 %v4155_v4  ;;  %546 = vmatpush1.bf16.msra.mxu1 %v3854_v16 }
  0x26   :  { %547 = vmatprep.subr.bf16.mxu1 %v4155_v4 }
  0x28   :  { %258 = vmatpush1.bf16.msra.mxu0 %v3849_v36 }
  0x29   :  { %822 = vmatprep.subr.bf16.mxu0 %v4155_v4  ;;  %548 = vmatpush1.bf16.msra.mxu1 %v3855_v17  ;;  %v4366_v17 = vld [vmem:[%s5226_s6] ss:$0 sm:$0xff] }
  0x2a   :  { %549 = vmatprep.subr.bf16.mxu1 %v4155_v4 }
  0x2d   :  { %550 = vmatpush1.bf16.msra.mxu1 %v3856_v18 }
  0x2e   :  { %551 = vmatprep.subr.bf16.mxu1 %v4155_v4 }
  0x31   :  { %552 = vmatpush1.bf16.msra.mxu1 %v3857_v19 }
  0x32   :  { %553 = vmatprep.subr.bf16.mxu1 %v4155_v4 }
  0x80   :  { %v3722_v37 = vpop.permute.xlu0 %3721 }
  0x81   :  { %v3732_v38 = vpop.permute.xlu1 %3731  ;;  %v3724_v39 = vunpack.i.h.bf16 %v3722_v37  ;;  %v3723_v40 = vunpack.i.l.bf16 %v3722_v37 }
  0x82   :  { %v3734_v42 = vunpack.i.h.bf16 %v3732_v38  ;;  %v3733_v43 = vunpack.i.l.bf16 %v3732_v38 }
  0x83   :  { %v128_v51 = vsel %vm44_vm0, %v62_v41, %v3723_v40  ;;  %v129_v52 = vsel %vm44_vm0, %v63_v29, %v3724_v39 }
  0x84   :  { %v3727_v44 = vpop.permute.xlu0 %3726 }
  0x85   :  { %v3729_v46 = vunpack.i.h.bf16 %v3727_v44  ;;  %v3728_v47 = vunpack.i.l.bf16 %v3727_v44  ;;  %v3737_v50 = vpop.permute.xlu1 %3736 }
  0x86   :  { %v3739_v53 = vunpack.i.h.bf16 %v3737_v50  ;;  %v3738_v54 = vunpack.i.l.bf16 %v3737_v50 }
  0x87   :  { %v133_v55 = vsel %vm132_vm2, %v128_v51, %v3728_v47  ;;  %v134_v56 = vsel %vm132_vm2, %v129_v52, %v3729_v46 }
  0x88   :  { %v131_v58 = vsel %vm44_vm0, %v65_v49, %v3739_v53  ;;  %v130_v59 = vsel %vm44_vm0, %v64_v48, %v3738_v54  ;;  %v3742_v60 = vpop.permute.xlu0 %3741  ;;  %v138_v61 = vsel %vm137_vm3, %v133_v55, %v3733_v43  ;;  %v139_v62 = vsel %vm137_vm3, %v134_v56, %v3734_v42 }
  0x89   :  { %v3744_v63 = vunpack.i.h.bf16 %v3742_v60  ;;  %v3743_v1 = vunpack.i.l.bf16 %v3742_v60  ;;  %v3747_v2 = vpop.permute.xlu1 %3746  ;;  %v142_v3 = vpack.c.bf16 %v139_v62, %v138_v61 }
  0x8a   :  { %v3749_v5 = vunpack.i.h.bf16 %v3747_v2  ;;  %v3748_v6 = vunpack.i.l.bf16 %v3747_v2 }
  0x8b   :  { %272 = vmatmul.mubr.bf16.vlgmr.msra.gmra.mrb[0].mxu0 %v142_v3  ;;  %v135_v7 = vsel %vm132_vm2, %v130_v59, %v3743_v1  ;;  %v136_v8 = vsel %vm132_vm2, %v131_v58, %v3744_v63 }
  0x8c   :  { %3413 = vmatprep.mubr.msk.bf16.mxu0 %vm44_vm0, %v145_v57  ;;  %v140_v9 = vsel %vm137_vm3, %v135_v7, %v3748_v6  ;;  %v141_v10 = vsel %vm137_vm3, %v136_v8, %v3749_v5 }
  0x8d   :  { %v144_v11 = vpack.c.bf16 %v141_v10, %v140_v9 }
  0x93   :  { %280 = vmatmul.mubr.bf16.gmra.mrb[4].mxu0 %v144_v11 }
 0x15e   :  { %v273_v21 = vpop.f32.mrb[0].mxu0 }
 0x15f   :  { %v274_v22 = vadd.f32 %v3401_v20, %v273_v21  ;;  %v275_v23 = vpop.f32.mrb[1].mxu0 }
 0x160   :  { %v276_v24 = vpop.f32.mrb[2].mxu0 }
 0x161   :  { %v303_v25 = vmul.f32 %v274_v22, %v274_v22  ;;  %v277_v26 = vadd.f32 %v3401_v20, %v276_v24  ;;  %v278_v27 = vpop.f32.mrb[3].mxu0  ;;  %v288_v28 = vsel %vm44_vm0, %v274_v22, 0.0 }
 0x163   :  { %v289_v29 = vsel %vm44_vm0, %v277_v26, 0.0  ;;  %v304_v30 = vmul.f32 %v277_v26, %v277_v26  ;;  %v307_v32 = vsel %vm44_vm0, %v303_v25, 0.0 }
 0x164   :  { %v290_v31 = vadd.f32 %v289_v29, %v288_v28 }
 0x165   :  { %v308_v33 = vsel %vm44_vm0, %v304_v30, 0.0  ;;  %v3858_v30 = vld [vmem:[%s5223_s3 + $0x40] sm:$0xff]  }
 0x166   :  { %v309_v34 = vadd.f32 %v308_v33, %v307_v32  ;;  %v281_v35 = vpop.f32.mrb[4].mxu0  ;;  %554 = vmatpush1.bf16.msra.mxu1 %v3858_v30  ;;  %v3860_v30 = vld [vmem:[%s5223_s3] sm:$0xff]  }
 0x167   :  { %v282_v36 = vadd.f32 %v3401_v20, %v281_v35  ;;  %v283_v37 = vpop.f32.mrb[5].mxu0  ;;  %555 = vmatprep.subr.bf16.mxu1 %v4155_v4  ;;  %823 = vmatpush1.bf16.msra.mxu0 %v3860_v30 }
 0x168   :  { %v284_v38 = vpop.f32.mrb[6].mxu0  ;;  %824 = vmatprep.subr.bf16.mxu0 %v4155_v4 }
 0x169   :  { %v291_v39 = vsel %vm44_vm0, %v282_v36, 0.0  ;;  %v305_v40 = vmul.f32 %v282_v36, %v282_v36  ;;  %v285_v41 = vadd.f32 %v3401_v20, %v284_v38  ;;  %v286_v42 = vpop.f32.mrb[7].mxu0 }
 0x16a   :  { %v292_v43 = vadd.f32 %v291_v39, %v290_v31  ;;  %v3859_v31 = vld [vmem:[%s5223_s3 + $0x48] sm:$0xff]  }
 0x16b   :  { %v310_v44 = vsel %vm44_vm0, %v305_v40, 0.0  ;;  %v293_v45 = vsel %vm44_vm0, %v285_v41, 0.0  ;;  %v306_v46 = vmul.f32 %v285_v41, %v285_v41  ;;  %556 = vmatpush1.bf16.msra.mxu1 %v3859_v31  ;;  %v3861_v31 = vld [vmem:[%s5223_s3 + $0x8] sm:$0xff]  }
 0x16c   :  { %v311_v47 = vadd.f32 %v310_v44, %v309_v34  ;;  %v294_v48 = vadd.f32 %v293_v45, %v292_v43  ;;  %1107 = vmatprep.subr.bf16.mxu1 %v4155_v4  ;;  %825 = vmatpush1.bf16.msra.mxu0 %v3861_v31 }
 0x16d   :  { %v312_v49 = vsel %vm44_vm0, %v306_v46, 0.0  ;;  %826 = vmatprep.subr.bf16.mxu0 %v4155_v4 }
 0x16e   :  { %v295_v50 = vrot.slane %v294_v48, 4  ;;  %v313_v51 = vadd.f32 %v312_v49, %v311_v47 }
 0x170   :  { %v296_v52 = vadd.f32 %v295_v50, %v294_v48  ;;  %v314_v53 = vrot.slane %v313_v51, 4 }
 0x172   :  { %v297_v54 = vrot.slane %v296_v52, 2  ;;  %v315_v55 = vadd.f32 %v314_v53, %v313_v51 }
 0x174   :  { %v298_v56 = vadd.f32 %v297_v54, %v296_v52  ;;  %v316_v57 = vrot.slane %v315_v55, 2 }
 0x176   :  { %v299_v58 = vrot.slane %v298_v56, 1  ;;  %v317_v59 = vadd.f32 %v316_v57, %v315_v55 }
 0x178   :  { %v300_v60 = vadd.f32 %v299_v58, %v298_v56  ;;  %v318_v61 = vrot.slane %v317_v59, 1 }
 0x17a   :  { %v302_v62 = vmul.f32 0.03125, %v300_v60  ;;  %v319_v63 = vadd.f32 %v318_v61, %v317_v59 }
 0x17c   :  { %v320_v1 = vmul.f32 0.03125, %v319_v63  ;;  %v321_v2 = vmul.f32 %v302_v62, %v302_v62  ;;  %v324_v3 = vsub.f32 %v274_v22, %v302_v62  ;;  %v325_v5 = vsub.f32 %v277_v26, %v302_v62 }
 0x17d   :  { %v326_v6 = vsub.f32 %v282_v36, %v302_v62  ;;  %v327_v7 = vsub.f32 %v285_v41, %v302_v62 }
 0x17e   :  { %v322_v8 = vsub.f32 %v320_v1, %v321_v2 }
 0x180   :  { %v323_v9 = vmax.f32 %v322_v8, 0.0 }
 0x182   :  { %v328_v10 = vadd.f32 1e-05, %v323_v9 }
 0x184   :  { %3886 = vrsqrt.f32 %v328_v10 }
 0x18e   :  { %v3887_v11 = vpop.eup %3886 }
 0x18f   :  { %v330_v13 = vmul.f32 %v3887_v11, %v324_v3  ;;  %v331_v14 = vmul.f32 %v3887_v11, %v325_v5  ;;  %v332_v15 = vmul.f32 %v3887_v11, %v326_v6  ;;  %v333_v16 = vmul.f32 %v3887_v11, %v327_v7 }
 0x191   :  { %v340_v18 = vmul.f32 %v4361_v12, %v330_v13  ;;  %v341_v19 = vmul.f32 %v4361_v12, %v331_v14  ;;  %v342_v20 = vmul.f32 %v4361_v12, %v332_v15  ;;  %v343_v21 = vmul.f32 %v4361_v12, %v333_v16 }
 0x193   :  { %v350_v22 = vadd.f32 %v4366_v17, %v340_v18  ;;  %v351_v23 = vadd.f32 %v4366_v17, %v341_v19  ;;  %v352_v24 = vadd.f32 %v4366_v17, %v342_v20  ;;  %v353_v25 = vadd.f32 %v4366_v17, %v343_v21 }
 0x195   :  { %v354_v26 = vmax.f32 %v350_v22, 0.0  ;;  %v355_v27 = vmax.f32 %v351_v23, 0.0  ;;  %v356_v28 = vmax.f32 %v352_v24, 0.0  ;;  %v357_v29 = vmax.f32 %v353_v25, 0.0 }
 0x197   :  { %358 = vst.msk [vmem:[#allocation2 + $0x4] sm:$0xff] %vm44_vm0, %v354_v26  ;;  %359 = vst.msk [vmem:[#allocation2 + $0xc] sm:$0xff] %vm44_vm0, %v355_v27 }
 0x198   :  { %360 = vst.msk [vmem:[#allocation2 + $0x1c] sm:$0xff] %vm44_vm0, %v356_v28  ;;  %361 = vst.msk [vmem:[#allocation2 + $0x24] sm:$0xff] %vm44_vm0, %v357_v29 }
 0x19e   :  { %v370_v32 = vld [vmem:[#allocation2 + $0x4] sm:$0xff]  ;;  %v371_v33 = vld [vmem:[#allocation2 + $0xc] sm:$0xff] }
 0x19f   :  { %v366_v34 = vld [vmem:[#allocation2 + $0x2] sm:$0xff]  ;;  %v3755_v35 = vpack.i.bf16 %v371_v33, %v370_v32  ;;  %v367_v36 = vld [vmem:[#allocation2 + $0xa] sm:$0xff]  ;;  %v368_v41 = vld [vmem:[#allocation2 + $0x1a] sm:$0xff] }
 0x1a0   :  { %v363_v37 = vld [vmem:[#allocation2 + $0x8] sm:$0xff]  ;;  %v378_v38 = vld [vmem:[#allocation2 + $0x10] sm:$0xff]  ;;  %v3750_v39 = vpack.i.bf16 %v367_v36, %v366_v34  ;;  %v376_v47 = vld [vmem:[#allocation2 + $0x1e] sm:$0xff] }
 0x1a1   :  { %v441_v40 = vpack.c.bf16 %v378_v38, %v363_v37  ;;  %v369_v42 = vld [vmem:[#allocation2 + $0x22] sm:$0xff]  ;;  %3756 = vrot.lane.b32.xlu1 %v3755_v35, %s4158_s20  ;;  %v375_v44 = vld [vmem:[#allocation2 + $0xe] sm:$0xff]  ;;  %v364_v18 = vld [vmem:[#allocation2 + $0x18] sm:$0xff] }
 0x1a2   :  { %v374_v43 = vld [vmem:[#allocation2 + $0x6] sm:$0xff]  ;;  %3751 = vrot.lane.b32.xlu0 %v3750_v39, %s4156_s0  ;;  %v3765_v45 = vpack.i.bf16 %v369_v42, %v368_v41  ;;  %v372_v49 = vld [vmem:[#allocation2 + $0x1c] sm:$0xff]  ;;  %v3862_v32 = vld [vmem:[%s5223_s3 + $0x10] sm:$0xff]  }
 0x1a3   :  { %3427 = vmatprep.mubr.msk.bf16.mxu1 %vm44_vm0, %v441_v40  ;;  %v3760_v46 = vpack.i.bf16 %v375_v44, %v374_v43  ;;  %v377_v48 = vld [vmem:[#allocation2 + $0x26] sm:$0xff]  ;;  %827 = vmatpush1.bf16.msra.mxu0 %v3862_v32  ;;  %v3863_v33 = vld [vmem:[%s5223_s3 + $0x18] sm:$0xff]   ;;  %v3866_v36 = vld [vmem:[%s5223_s3 + $0x30] sm:$0xff]  }
 0x1a4   :  { %v373_v50 = vld [vmem:[#allocation2 + $0x24] sm:$0xff]  ;;  %v3775_v51 = vpack.i.bf16 %v377_v48, %v376_v47  ;;  %828 = vmatprep.subr.bf16.mxu0 %v4155_v4  ;;  %v4443_v38 = vld [vmem:[%s5227_s4] ss:$0 sm:$0xff] }
 0x1a5   :  { %3766 = vrot.lane.b32.xlu1 %v3765_v45, %s4156_s0  ;;  %v3770_v52 = vpack.i.bf16 %v373_v50, %v372_v49  ;;  %v362_v59 = vld [vmem:[#allocation2] sm:$0xff]  ;;  %v379_v5 = vld [vmem:[#allocation2 + $0x28] sm:$0xff] }
 0x1a6   :  { %3761 = vrot.lane.b32.xlu0 %v3760_v46, %s4157_s19  ;;  %v365_v1 = vld [vmem:[#allocation2 + $0x20] sm:$0xff]  ;;  %v3865_v35 = vld [vmem:[%s5223_s3 + $0x28] sm:$0xff]  }
 0x1a7   :  { %v443_v16 = vpack.c.bf16 %v379_v5, %v365_v1  ;;  %829 = vmatpush1.bf16.msra.mxu0 %v3863_v33  ;;  %v3864_v34 = vld [vmem:[%s5223_s3 + $0x20] sm:$0xff]  }
 0x1a8   :  { %830 = vmatprep.subr.bf16.mxu0 %v4155_v4 }
 0x1a9   :  { %3776 = vrot.lane.b32.xlu1 %v3775_v51, %s4157_s19 }
 0x1aa   :  { %3771 = vrot.lane.b32.xlu0 %v3770_v52, %s4158_s20 }
 0x1ab   :  { %831 = vmatpush1.bf16.msra.mxu0 %v3864_v34 }
 0x1ac   :  { %832 = vmatprep.subr.bf16.mxu0 %v4155_v4 }
 0x1af   :  { %833 = vmatpush1.bf16.msra.mxu0 %v3865_v35 }
 0x1b0   :  { %834 = vmatprep.subr.bf16.mxu0 %v4155_v4 }
 0x1b3   :  { %835 = vmatpush1.bf16.msra.mxu0 %v3866_v36 }
 0x1b4   :  { %836 = vmatprep.subr.bf16.mxu0 %v4155_v4 }
 0x213   :  { %v3757_v53 = vpop.permute.xlu1 %3756 }
 0x214   :  { %v3752_v54 = vpop.permute.xlu0 %3751  ;;  %v3759_v57 = vunpack.i.h.bf16 %v3757_v53  ;;  %v3758_v58 = vunpack.i.l.bf16 %v3757_v53 }
 0x215   :  { %v3754_v55 = vunpack.i.h.bf16 %v3752_v54  ;;  %v3753_v56 = vunpack.i.l.bf16 %v3752_v54 }
 0x217   :  { %v428_v60 = vsel %vm44_vm0, %v362_v59, %v3753_v56  ;;  %v429_v61 = vsel %vm44_vm0, %v363_v37, %v3754_v55  ;;  %v3767_v62 = vpop.permute.xlu1 %3766  ;;  %v3867_v37 = vld [vmem:[%s5223_s3 + $0x38] sm:$0xff]  }
 0x218   :  { %v3762_v63 = vpop.permute.xlu0 %3761  ;;  %v3769_v6 = vunpack.i.h.bf16 %v3767_v62  ;;  %v3768_v7 = vunpack.i.l.bf16 %v3767_v62  ;;  %v432_v8 = vsel %vm132_vm2, %v428_v60, %v3758_v58  ;;  %v433_v9 = vsel %vm132_vm2, %v429_v61, %v3759_v57  ;;  %837 = vmatpush1.bf16.msra.mxu0 %v3867_v37 }
 0x219   :  { %v3764_v2 = vunpack.i.h.bf16 %v3762_v63  ;;  %v3763_v3 = vunpack.i.l.bf16 %v3762_v63  ;;  %838 = vmatprep.subr.bf16.mxu0 %v4155_v4 }
 0x21a   :  { %v431_v23 = vsel %vm44_vm0, %v365_v1, %v3769_v6  ;;  %v430_v24 = vsel %vm44_vm0, %v364_v18, %v3768_v7 }
 0x21b   :  { %v3777_v10 = vpop.permute.xlu1 %3776  ;;  %v436_v11 = vsel %vm137_vm3, %v432_v8, %v3763_v3  ;;  %v437_v13 = vsel %vm137_vm3, %v433_v9, %v3764_v2 }
 0x21c   :  { %v3772_v14 = vpop.permute.xlu0 %3771  ;;  %v440_v15 = vpack.c.bf16 %v437_v13, %v436_v11  ;;  %v3779_v19 = vunpack.i.h.bf16 %v3777_v10  ;;  %v3778_v20 = vunpack.i.l.bf16 %v3777_v10 }
 0x21d   :  { %v3774_v21 = vunpack.i.h.bf16 %v3772_v14  ;;  %v3773_v22 = vunpack.i.l.bf16 %v3772_v14 }
 0x21e   :  { %570 = vmatmul.mubr.bf16.vlgmr.msra.gmra.mrb[0].mxu1 %v440_v15 }
 0x21f   :  { %3428 = vmatprep.mubr.msk.bf16.mxu1 %vm44_vm0, %v443_v16  ;;  %v434_v25 = vsel %vm132_vm2, %v430_v24, %v3773_v22  ;;  %v435_v26 = vsel %vm132_vm2, %v431_v23, %v3774_v21 }
 0x220   :  { %v438_v27 = vsel %vm137_vm3, %v434_v25, %v3778_v20  ;;  %v439_v28 = vsel %vm137_vm3, %v435_v26, %v3779_v19 }
 0x221   :  { %v442_v29 = vpack.c.bf16 %v439_v28, %v438_v27 }
 0x226   :  { %578 = vmatmul.mubr.bf16.gmra.mrb[4].mxu1 %v442_v29 }
 0x2f1   :  { %v571_v39 = vpop.f32.mrb[0].mxu1 }
 0x2f2   :  { %v572_v40 = vadd.f32 %v4443_v38, %v571_v39  ;;  %v573_v41 = vpop.f32.mrb[1].mxu1 }
 0x2f3   :  { %v574_v42 = vpop.f32.mrb[2].mxu1 }
 0x2f4   :  { %v600_v43 = vmul.f32 %v572_v40, %v572_v40  ;;  %v575_v44 = vadd.f32 %v4443_v38, %v574_v42  ;;  %v576_v45 = vpop.f32.mrb[3].mxu1  ;;  %v586_v46 = vsel %vm44_vm0, %v572_v40, 0.0 }
 0x2f6   :  { %v587_v47 = vsel %vm44_vm0, %v575_v44, 0.0  ;;  %v601_v48 = vmul.f32 %v575_v44, %v575_v44  ;;  %v604_v50 = vsel %vm44_vm0, %v600_v43, 0.0 }
 0x2f7   :  { %v588_v49 = vadd.f32 %v587_v47, %v586_v46 }
 0x2f8   :  { %v605_v51 = vsel %vm44_vm0, %v601_v48, 0.0 }
 0x2f9   :  { %v606_v52 = vadd.f32 %v605_v51, %v604_v50  ;;  %v579_v53 = vpop.f32.mrb[4].mxu1  ;;  %v3869_v50 = vld [vmem:[%s5223_s3 + $0x48] sm:$0xff]  }
 0x2fa   :  { %v580_v54 = vadd.f32 %v4443_v38, %v579_v53  ;;  %v581_v55 = vpop.f32.mrb[5].mxu1 }
 0x2fb   :  { %v582_v56 = vpop.f32.mrb[6].mxu1 }
 0x2fc   :  { %v589_v57 = vsel %vm44_vm0, %v580_v54, 0.0  ;;  %v602_v58 = vmul.f32 %v580_v54, %v580_v54  ;;  %v583_v59 = vadd.f32 %v4443_v38, %v582_v56  ;;  %v584_v60 = vpop.f32.mrb[7].mxu1 }
 0x2fd   :  { %v590_v61 = vadd.f32 %v589_v57, %v588_v49  ;;  %v3868_v49 = vld [vmem:[%s5223_s3 + $0x40] sm:$0xff]  }
 0x2fe   :  { %v607_v62 = vsel %vm44_vm0, %v602_v58, 0.0  ;;  %v591_v63 = vsel %vm44_vm0, %v583_v59, 0.0  ;;  %v603_v1 = vmul.f32 %v583_v59, %v583_v59  ;;  %839 = vmatpush1.bf16.msra.mxu0 %v3868_v49 }
 0x2ff   :  { %v608_v2 = vadd.f32 %v607_v62, %v606_v52  ;;  %v592_v3 = vadd.f32 %v591_v63, %v590_v61  ;;  %840 = vmatprep.subr.bf16.mxu0 %v4155_v4 }
 0x300   :  { %v609_v5 = vsel %vm44_vm0, %v603_v1, 0.0 }
 0x301   :  { %v593_v6 = vrot.slane %v592_v3, 4  ;;  %v610_v7 = vadd.f32 %v609_v5, %v608_v2 }
 0x302   :  { %841 = vmatpush1.bf16.msra.mxu0 %v3869_v50  ;;  %v3870_v50 = vld [vmem:[%s5223_s3] sm:$0xff]  }
 0x303   :  { %v594_v8 = vadd.f32 %v593_v6, %v592_v3  ;;  %v611_v9 = vrot.slane %v610_v7, 4  ;;  %1108 = vmatpush1.bf16.msra.mxu1 %v3870_v50 }
 0x304   :  { %1109 = vmatprep.subr.bf16.mxu1 %v4155_v4 }
 0x305   :  { %v595_v10 = vrot.slane %v594_v8, 2  ;;  %v612_v11 = vadd.f32 %v611_v9, %v610_v7 }
 0x307   :  { %v596_v13 = vadd.f32 %v595_v10, %v594_v8  ;;  %v613_v14 = vrot.slane %v612_v11, 2 }
 0x309   :  { %v597_v15 = vrot.slane %v596_v13, 1  ;;  %v614_v16 = vadd.f32 %v613_v14, %v612_v11 }
 0x30b   :  { %v598_v18 = vadd.f32 %v597_v15, %v596_v13  ;;  %v615_v19 = vrot.slane %v614_v16, 1 }
 0x30d   :  { %v599_v20 = vmul.f32 0.03125, %v598_v18  ;;  %v616_v21 = vadd.f32 %v615_v19, %v614_v16 }
 0x30f   :  { %v617_v22 = vmul.f32 0.03125, %v616_v21  ;;  %v618_v23 = vmul.f32 %v599_v20, %v599_v20  ;;  %v621_v24 = vsub.f32 %v572_v40, %v599_v20  ;;  %v622_v25 = vsub.f32 %v575_v44, %v599_v20 }
 0x310   :  { %v623_v26 = vsub.f32 %v580_v54, %v599_v20  ;;  %v624_v27 = vsub.f32 %v583_v59, %v599_v20 }
 0x311   :  { %v619_v28 = vsub.f32 %v617_v22, %v618_v23 }
 0x313   :  { %v620_v29 = vmax.f32 %v619_v28, 0.0 }
 0x315   :  { %v625_v30 = vadd.f32 1e-05, %v620_v29 }
 0x317   :  { %3888 = vrsqrt.f32 %v625_v30 }
 0x321   :  { %v3889_v31 = vpop.eup %3888 }
 0x322   :  { %v627_v32 = vmul.f32 %v3889_v31, %v621_v24  ;;  %v628_v33 = vmul.f32 %v3889_v31, %v622_v25  ;;  %v629_v34 = vmul.f32 %v3889_v31, %v623_v26  ;;  %v630_v35 = vmul.f32 %v3889_v31, %v624_v27 }
 0x324   :  { %v631_v36 = vmul.f32 %v4361_v12, %v627_v32  ;;  %v632_v37 = vmul.f32 %v4361_v12, %v628_v33  ;;  %v633_v39 = vmul.f32 %v4361_v12, %v629_v34  ;;  %v634_v40 = vmul.f32 %v4361_v12, %v630_v35 }
 0x326   :  { %v635_v41 = vadd.f32 %v4366_v17, %v631_v36  ;;  %v636_v42 = vadd.f32 %v4366_v17, %v632_v37  ;;  %v637_v43 = vadd.f32 %v4366_v17, %v633_v39  ;;  %v638_v44 = vadd.f32 %v4366_v17, %v634_v40 }
 0x328   :  { %v639_v45 = vmax.f32 %v635_v41, 0.0  ;;  %v640_v46 = vmax.f32 %v636_v42, 0.0  ;;  %v641_v47 = vmax.f32 %v637_v43, 0.0  ;;  %v642_v48 = vmax.f32 %v638_v44, 0.0 }
 0x32a   :  { %643 = vst.msk [vmem:[#allocation2 + $0x4] sm:$0xff] %vm44_vm0, %v639_v45  ;;  %644 = vst.msk [vmem:[#allocation2 + $0xc] sm:$0xff] %vm44_vm0, %v640_v46 }
 0x32b   :  { %645 = vst.msk [vmem:[#allocation2 + $0x1c] sm:$0xff] %vm44_vm0, %v641_v47  ;;  %646 = vst.msk [vmem:[#allocation2 + $0x24] sm:$0xff] %vm44_vm0, %v642_v48 }
 0x331   :  { %v655_v51 = vld [vmem:[#allocation2 + $0x4] sm:$0xff]  ;;  %v656_v52 = vld [vmem:[#allocation2 + $0xc] sm:$0xff] }
 0x332   :  { %v651_v53 = vld [vmem:[#allocation2 + $0x2] sm:$0xff]  ;;  %v3785_v54 = vpack.i.bf16 %v656_v52, %v655_v51  ;;  %v652_v55 = vld [vmem:[#allocation2 + $0xa] sm:$0xff]  ;;  %v653_v60 = vld [vmem:[#allocation2 + $0x1a] sm:$0xff] }
 0x333   :  { %v648_v56 = vld [vmem:[#allocation2 + $0x8] sm:$0xff]  ;;  %v663_v57 = vld [vmem:[#allocation2 + $0x10] sm:$0xff]  ;;  %v3780_v58 = vpack.i.bf16 %v652_v55, %v651_v53  ;;  %v661_v3 = vld [vmem:[#allocation2 + $0x1e] sm:$0xff] }
 0x334   :  { %v726_v59 = vpack.c.bf16 %v663_v57, %v648_v56  ;;  %v654_v61 = vld [vmem:[#allocation2 + $0x22] sm:$0xff]  ;;  %3786 = vrot.lane.b32.xlu1 %v3785_v54, %s4158_s20  ;;  %v660_v63 = vld [vmem:[#allocation2 + $0xe] sm:$0xff]  ;;  %v649_v37 = vld [vmem:[#allocation2 + $0x18] sm:$0xff] }
 0x335   :  { %v659_v62 = vld [vmem:[#allocation2 + $0x6] sm:$0xff]  ;;  %3781 = vrot.lane.b32.xlu0 %v3780_v58, %s4156_s0  ;;  %v3795_v1 = vpack.i.bf16 %v654_v61, %v653_v60  ;;  %v657_v6 = vld [vmem:[#allocation2 + $0x1c] sm:$0xff]  ;;  %v3872_v52 = vld [vmem:[%s5223_s3 + $0x10] sm:$0xff]  }
 0x336   :  { %3440 = vmatprep.mubr.msk.bf16.mxu0 %vm44_vm0, %v726_v59  ;;  %v3790_v2 = vpack.i.bf16 %v660_v63, %v659_v62  ;;  %v662_v5 = vld [vmem:[#allocation2 + $0x26] sm:$0xff]  ;;  %v3873_v53 = vld [vmem:[%s5223_s3 + $0x18] sm:$0xff]  }
 0x337   :  { %v658_v7 = vld [vmem:[#allocation2 + $0x24] sm:$0xff]  ;;  %v3805_v8 = vpack.i.bf16 %v662_v5, %v661_v3  ;;  %v3877_v57 = vld [vmem:[%s5223_s3 + $0x38] sm:$0xff]  }
 0x338   :  { %3796 = vrot.lane.b32.xlu1 %v3795_v1, %s4156_s0  ;;  %v3800_v9 = vpack.i.bf16 %v658_v7, %v657_v6  ;;  %v647_v18 = vld [vmem:[#allocation2] sm:$0xff]  ;;  %v664_v26 = vld [vmem:[#allocation2 + $0x28] sm:$0xff] }
 0x339   :  { %3791 = vrot.lane.b32.xlu0 %v3790_v2, %s4157_s19  ;;  %v650_v23 = vld [vmem:[#allocation2 + $0x20] sm:$0xff]  ;;  %v3871_v51 = vld [vmem:[%s5223_s3 + $0x8] sm:$0xff]  }
 0x33a   :  { %v728_v36 = vpack.c.bf16 %v664_v26, %v650_v23  ;;  %1110 = vmatpush1.bf16.msra.mxu1 %v3871_v51  ;;  %v3874_v54 = vld [vmem:[%s5223_s3 + $0x20] sm:$0xff]   ;;  %v3875_v55 = vld [vmem:[%s5223_s3 + $0x28] sm:$0xff]  }
 0x33b   :  { %1111 = vmatprep.subr.bf16.mxu1 %v4155_v4 }
 0x33c   :  { %3806 = vrot.lane.b32.xlu1 %v3805_v8, %s4157_s19 }
 0x33d   :  { %3801 = vrot.lane.b32.xlu0 %v3800_v9, %s4158_s20 }
 0x33e   :  { %1112 = vmatpush1.bf16.msra.mxu1 %v3872_v52 }
 0x33f   :  { %1113 = vmatprep.subr.bf16.mxu1 %v4155_v4 }
 0x342   :  { %1114 = vmatpush1.bf16.msra.mxu1 %v3873_v53 }
 0x343   :  { %1115 = vmatprep.subr.bf16.mxu1 %v4155_v4 }
 0x346   :  { %1116 = vmatpush1.bf16.msra.mxu1 %v3874_v54 }
 0x347   :  { %1117 = vmatprep.subr.bf16.mxu1 %v4155_v4 }
 0x34a   :  { %1118 = vmatpush1.bf16.msra.mxu1 %v3875_v55 }
 0x34b   :  { %1119 = vmatprep.subr.bf16.mxu1 %v4155_v4 }
 0x3a6   :  { %v3787_v10 = vpop.permute.xlu1 %3786 }
 0x3a7   :  { %v3782_v11 = vpop.permute.xlu0 %3781  ;;  %v3789_v15 = vunpack.i.h.bf16 %v3787_v10  ;;  %v3788_v16 = vunpack.i.l.bf16 %v3787_v10 }
 0x3a8   :  { %v3784_v13 = vunpack.i.h.bf16 %v3782_v11  ;;  %v3783_v14 = vunpack.i.l.bf16 %v3782_v11 }
 0x3aa   :  { %v713_v19 = vsel %vm44_vm0, %v647_v18, %v3783_v14  ;;  %v714_v20 = vsel %vm44_vm0, %v648_v56, %v3784_v13  ;;  %v3797_v21 = vpop.permute.xlu1 %3796  ;;  %v3876_v56 = vld [vmem:[%s5223_s3 + $0x30] sm:$0xff]  }
 0x3ab   :  { %v3792_v22 = vpop.permute.xlu0 %3791  ;;  %v3799_v27 = vunpack.i.h.bf16 %v3797_v21  ;;  %v3798_v28 = vunpack.i.l.bf16 %v3797_v21  ;;  %v717_v29 = vsel %vm132_vm2, %v713_v19, %v3788_v16  ;;  %v718_v30 = vsel %vm132_vm2, %v714_v20, %v3789_v15  ;;  %1120 = vmatpush1.bf16.msra.mxu1 %v3876_v56 }
 0x3ac   :  { %v3794_v24 = vunpack.i.h.bf16 %v3792_v22  ;;  %v3793_v25 = vunpack.i.l.bf16 %v3792_v22  ;;  %1121 = vmatprep.subr.bf16.mxu1 %v4155_v4 }
 0x3ad   :  { %v716_v43 = vsel %vm44_vm0, %v650_v23, %v3799_v27  ;;  %v715_v44 = vsel %vm44_vm0, %v649_v37, %v3798_v28 }
 0x3ae   :  { %v721_v31 = vsel %vm137_vm3, %v717_v29, %v3793_v25  ;;  %v722_v32 = vsel %vm137_vm3, %v718_v30, %v3794_v24  ;;  %v3807_v33 = vpop.permute.xlu1 %3806 }
 0x3af   :  { %v725_v34 = vpack.c.bf16 %v722_v32, %v721_v31  ;;  %v3802_v35 = vpop.permute.xlu0 %3801  ;;  %v3809_v39 = vunpack.i.h.bf16 %v3807_v33  ;;  %v3808_v40 = vunpack.i.l.bf16 %v3807_v33  ;;  %1122 = vmatpush1.bf16.msra.mxu1 %v3877_v57 }
 0x3b0   :  { %v3804_v41 = vunpack.i.h.bf16 %v3802_v35  ;;  %v3803_v42 = vunpack.i.l.bf16 %v3802_v35  ;;  %1123 = vmatprep.subr.bf16.mxu1 %v4155_v4 }
 0x3b1   :  { %855 = vmatmul.mubr.bf16.vlgmr.msra.gmra.mrb[8].mxu0 %v725_v34 }
 0x3b2   :  { %3441 = vmatprep.mubr.msk.bf16.mxu0 %vm44_vm0, %v728_v36  ;;  %v719_v45 = vsel %vm132_vm2, %v715_v44, %v3803_v42  ;;  %v720_v46 = vsel %vm132_vm2, %v716_v43, %v3804_v41 }
 0x3b3   :  { %v723_v47 = vsel %vm137_vm3, %v719_v45, %v3808_v40  ;;  %v724_v48 = vsel %vm137_vm3, %v720_v46, %v3809_v39 }
 0x3b4   :  { %v727_v49 = vpack.c.bf16 %v724_v48, %v723_v47 }
 0x3b9   :  { %863 = vmatmul.mubr.bf16.gmra.mrb[12].mxu0 %v727_v49 }
 0x484   :  { %v856_v58 = vpop.f32.mrb[8].mxu0 }
 0x485   :  { %v857_v59 = vadd.f32 %v4443_v38, %v856_v58  ;;  %v858_v60 = vpop.f32.mrb[9].mxu0 }
 0x486   :  { %v859_v61 = vpop.f32.mrb[10].mxu0 }
 0x487   :  { %v885_v62 = vmul.f32 %v857_v59, %v857_v59  ;;  %v860_v63 = vadd.f32 %v4443_v38, %v859_v61  ;;  %v861_v1 = vpop.f32.mrb[11].mxu0  ;;  %v871_v2 = vsel %vm44_vm0, %v857_v59, 0.0 }
 0x489   :  { %v872_v3 = vsel %vm44_vm0, %v860_v63, 0.0  ;;  %v886_v5 = vmul.f32 %v860_v63, %v860_v63  ;;  %v889_v7 = vsel %vm44_vm0, %v885_v62, 0.0 }
 0x48a   :  { %v873_v6 = vadd.f32 %v872_v3, %v871_v2 }
 0x48b   :  { %v890_v8 = vsel %vm44_vm0, %v886_v5, 0.0 }
 0x48c   :  { %v891_v9 = vadd.f32 %v890_v8, %v889_v7  ;;  %v864_v10 = vpop.f32.mrb[12].mxu0 }
 0x48d   :  { %v865_v11 = vadd.f32 %v4443_v38, %v864_v10  ;;  %v866_v13 = vpop.f32.mrb[13].mxu0 }
 0x48e   :  { %v867_v14 = vpop.f32.mrb[14].mxu0 }
 0x48f   :  { %v874_v15 = vsel %vm44_vm0, %v865_v11, 0.0  ;;  %v887_v16 = vmul.f32 %v865_v11, %v865_v11  ;;  %v868_v18 = vadd.f32 %v4443_v38, %v867_v14  ;;  %v869_v19 = vpop.f32.mrb[15].mxu0 }
 0x490   :  { %v875_v20 = vadd.f32 %v874_v15, %v873_v6 }
 0x491   :  { %v892_v21 = vsel %vm44_vm0, %v887_v16, 0.0  ;;  %v876_v22 = vsel %vm44_vm0, %v868_v18, 0.0  ;;  %v888_v23 = vmul.f32 %v868_v18, %v868_v18 }
 0x492   :  { %v893_v24 = vadd.f32 %v892_v21, %v891_v9  ;;  %v877_v25 = vadd.f32 %v876_v22, %v875_v20 }
 0x493   :  { %v894_v26 = vsel %vm44_vm0, %v888_v23, 0.0 }
 0x494   :  { %v878_v27 = vrot.slane %v877_v25, 4  ;;  %v895_v28 = vadd.f32 %v894_v26, %v893_v24 }
 0x496   :  { %v879_v29 = vadd.f32 %v878_v27, %v877_v25  ;;  %v896_v30 = vrot.slane %v895_v28, 4 }
 0x498   :  { %v880_v31 = vrot.slane %v879_v29, 2  ;;  %v897_v32 = vadd.f32 %v896_v30, %v895_v28 }
 0x49a   :  { %v881_v33 = vadd.f32 %v880_v31, %v879_v29  ;;  %v898_v34 = vrot.slane %v897_v32, 2 }
 0x49c   :  { %v882_v35 = vrot.slane %v881_v33, 1  ;;  %v899_v36 = vadd.f32 %v898_v34, %v897_v32 }
 0x49e   :  { %v883_v37 = vadd.f32 %v882_v35, %v881_v33  ;;  %v900_v39 = vrot.slane %v899_v36, 1 }
 0x4a0   :  { %v884_v40 = vmul.f32 0.03125, %v883_v37  ;;  %v901_v41 = vadd.f32 %v900_v39, %v899_v36 }
 0x4a2   :  { %v902_v42 = vmul.f32 0.03125, %v901_v41  ;;  %v903_v43 = vmul.f32 %v884_v40, %v884_v40  ;;  %v906_v44 = vsub.f32 %v857_v59, %v884_v40  ;;  %v907_v45 = vsub.f32 %v860_v63, %v884_v40 }
 0x4a3   :  { %v908_v46 = vsub.f32 %v865_v11, %v884_v40  ;;  %v909_v47 = vsub.f32 %v868_v18, %v884_v40 }
 0x4a4   :  { %v904_v48 = vsub.f32 %v902_v42, %v903_v43 }
 0x4a6   :  { %v905_v49 = vmax.f32 %v904_v48, 0.0 }
 0x4a8   :  { %v910_v50 = vadd.f32 1e-05, %v905_v49 }
 0x4aa   :  { %3890 = vrsqrt.f32 %v910_v50 }
 0x4b4   :  { %v3891_v51 = vpop.eup %3890 }
 0x4b5   :  { %v912_v52 = vmul.f32 %v3891_v51, %v906_v44  ;;  %v913_v53 = vmul.f32 %v3891_v51, %v907_v45  ;;  %v914_v54 = vmul.f32 %v3891_v51, %v908_v46  ;;  %v915_v55 = vmul.f32 %v3891_v51, %v909_v47 }
 0x4b7   :  { %v916_v56 = vmul.f32 %v4361_v12, %v912_v52  ;;  %v917_v57 = vmul.f32 %v4361_v12, %v913_v53  ;;  %v918_v58 = vmul.f32 %v4361_v12, %v914_v54  ;;  %v919_v59 = vmul.f32 %v4361_v12, %v915_v55  ;;  %v3878_v12 = vld [vmem:[%s5223_s3 + $0x40] sm:$0xff]  }
 0x4b8   :  { %1124 = vmatpush1.bf16.msra.mxu1 %v3878_v12  ;;  %v3880_v12 = vld [vmem:[%s5229_s7] sm:$0xff]  }
 0x4b9   :  { %v920_v60 = vadd.f32 %v4366_v17, %v916_v56  ;;  %v921_v61 = vadd.f32 %v4366_v17, %v917_v57  ;;  %v922_v62 = vadd.f32 %v4366_v17, %v918_v58  ;;  %v923_v63 = vadd.f32 %v4366_v17, %v919_v59  ;;  %1125 = vmatprep.subr.bf16.mxu1 %v4155_v4  ;;  %v3879_v17 = vld [vmem:[%s5223_s3 + $0x48] sm:$0xff]  }
 0x4ba   :  { %3570 = vmatprep.subr.bf16.mxu0 %v3880_v12 }
 0x4bb   :  { %v924_v1 = vmax.f32 %v920_v60, 0.0  ;;  %v925_v2 = vmax.f32 %v921_v61, 0.0  ;;  %v926_v3 = vmax.f32 %v922_v62, 0.0  ;;  %v927_v5 = vmax.f32 %v923_v63, 0.0  ;;  %3571 = vmatpush3.bf16.msra.mxu0 %v3880_v12 }
 0x4bc   :  { %1126 = vmatpush1.bf16.msra.mxu1 %v3879_v17  ;;  %v4593_v17 = vld [vmem:[%s5228_s8 + $0x8] sm:$0xff]  }
 0x4bd   :  { %928 = vst.msk [vmem:[#allocation2 + $0x4] sm:$0xff] %vm44_vm0, %v924_v1  ;;  %929 = vst.msk [vmem:[#allocation2 + $0xc] sm:$0xff] %vm44_vm0, %v925_v2  ;;  %3578 = vmatprep.subr.bf16.mxu1 %v4154_v0 }
 0x4be   :  { %930 = vst.msk [vmem:[#allocation2 + $0x1c] sm:$0xff] %vm44_vm0, %v926_v3  ;;  %931 = vst.msk [vmem:[#allocation2 + $0x24] sm:$0xff] %vm44_vm0, %v927_v5  ;;  %v4583_v5 = vld [vmem:[%s5228_s8] sm:$0xff]  }
 0x4c4   :  { %v940_v6 = vld [vmem:[#allocation2 + $0x4] sm:$0xff]  ;;  %v941_v7 = vld [vmem:[#allocation2 + $0xc] sm:$0xff] }
 0x4c5   :  { %v936_v8 = vld [vmem:[#allocation2 + $0x2] sm:$0xff]  ;;  %v3815_v9 = vpack.i.bf16 %v941_v7, %v940_v6  ;;  %v937_v10 = vld [vmem:[#allocation2 + $0xa] sm:$0xff]  ;;  %v938_v16 = vld [vmem:[#allocation2 + $0x1a] sm:$0xff] }
 0x4c6   :  { %v933_v11 = vld [vmem:[#allocation2 + $0x8] sm:$0xff]  ;;  %v948_v13 = vld [vmem:[#allocation2 + $0x10] sm:$0xff]  ;;  %v3810_v14 = vpack.i.bf16 %v937_v10, %v936_v8  ;;  %v946_v23 = vld [vmem:[#allocation2 + $0x1e] sm:$0xff] }
 0x4c7   :  { %v1011_v15 = vpack.c.bf16 %v948_v13, %v933_v11  ;;  %v939_v18 = vld [vmem:[#allocation2 + $0x22] sm:$0xff]  ;;  %3816 = vrot.lane.b32.xlu1 %v3815_v9, %s4158_s20  ;;  %v945_v20 = vld [vmem:[#allocation2 + $0xe] sm:$0xff]  ;;  %v934_v55 = vld [vmem:[#allocation2 + $0x18] sm:$0xff] }
 0x4c8   :  { %v944_v19 = vld [vmem:[#allocation2 + $0x6] sm:$0xff]  ;;  %3811 = vrot.lane.b32.xlu0 %v3810_v14, %s4156_s0  ;;  %v3825_v21 = vpack.i.bf16 %v939_v18, %v938_v16  ;;  %v942_v25 = vld [vmem:[#allocation2 + $0x1c] sm:$0xff] }
 0x4c9   :  { %3453 = vmatprep.mubr.msk.bf16.mxu1 %vm44_vm0, %v1011_v15  ;;  %v3820_v22 = vpack.i.bf16 %v945_v20, %v944_v19  ;;  %v947_v24 = vld [vmem:[#allocation2 + $0x26] sm:$0xff] }
 0x4ca   :  { %v943_v26 = vld [vmem:[#allocation2 + $0x24] sm:$0xff]  ;;  %v3835_v27 = vpack.i.bf16 %v947_v24, %v946_v23 }
 0x4cb   :  { %3826 = vrot.lane.b32.xlu1 %v3825_v21, %s4156_s0  ;;  %v3830_v28 = vpack.i.bf16 %v943_v26, %v942_v25  ;;  %v932_v35 = vld [vmem:[#allocation2] sm:$0xff]  ;;  %v949_v44 = vld [vmem:[#allocation2 + $0x28] sm:$0xff] }
 0x4cc   :  { %3821 = vrot.lane.b32.xlu0 %v3820_v22, %s4157_s19  ;;  %v935_v41 = vld [vmem:[#allocation2 + $0x20] sm:$0xff]  ;;  %v3882_v6 = vld [vmem:[%s5229_s7 + $0x8] sm:$0xff]  }
 0x4cd   :  { %v1013_v54 = vpack.c.bf16 %v949_v44, %v935_v41  ;;  %3572 = vmatprep.subr.bf16.mxu0 %v3882_v6 }
 0x4ce   :  { %3573 = vmatpush3.bf16.msra.mxu0 %v3882_v6 }
 0x4cf   :  { %3836 = vrot.lane.b32.xlu1 %v3835_v27, %s4157_s19  ;;  %3586 = vmatprep.subr.bf16.mxu0 %v4154_v0 }
 0x4d0   :  { %3831 = vrot.lane.b32.xlu0 %v3830_v28, %s4158_s20 }
 0x539   :  { %v3817_v29 = vpop.permute.xlu1 %3816 }
 0x53a   :  { %v3812_v30 = vpop.permute.xlu0 %3811  ;;  %v3819_v33 = vunpack.i.h.bf16 %v3817_v29  ;;  %v3818_v34 = vunpack.i.l.bf16 %v3817_v29 }
 0x53b   :  { %v3814_v31 = vunpack.i.h.bf16 %v3812_v30  ;;  %v3813_v32 = vunpack.i.l.bf16 %v3812_v30 }
 0x53d   :  { %v998_v36 = vsel %vm44_vm0, %v932_v35, %v3813_v32  ;;  %v999_v37 = vsel %vm44_vm0, %v933_v11, %v3814_v31  ;;  %v3827_v39 = vpop.permute.xlu1 %3826 }
 0x53e   :  { %v3822_v40 = vpop.permute.xlu0 %3821  ;;  %v3829_v45 = vunpack.i.h.bf16 %v3827_v39  ;;  %v3828_v46 = vunpack.i.l.bf16 %v3827_v39  ;;  %v1002_v47 = vsel %vm132_vm2, %v998_v36, %v3818_v34  ;;  %v1003_v48 = vsel %vm132_vm2, %v999_v37, %v3819_v33 }
 0x53f   :  { %v3824_v42 = vunpack.i.h.bf16 %v3822_v40  ;;  %v3823_v43 = vunpack.i.l.bf16 %v3822_v40 }
 0x540   :  { %v1001_v60 = vsel %vm44_vm0, %v935_v41, %v3829_v45  ;;  %v1000_v61 = vsel %vm44_vm0, %v934_v55, %v3828_v46 }
 0x541   :  { %v1006_v49 = vsel %vm137_vm3, %v1002_v47, %v3823_v43  ;;  %v1007_v50 = vsel %vm137_vm3, %v1003_v48, %v3824_v42  ;;  %v3837_v51 = vpop.permute.xlu1 %3836 }
 0x542   :  { %v1010_v52 = vpack.c.bf16 %v1007_v50, %v1006_v49  ;;  %v3832_v53 = vpop.permute.xlu0 %3831  ;;  %v3839_v56 = vunpack.i.h.bf16 %v3837_v51  ;;  %v3838_v57 = vunpack.i.l.bf16 %v3837_v51 }
 0x543   :  { %v3834_v58 = vunpack.i.h.bf16 %v3832_v53  ;;  %v3833_v59 = vunpack.i.l.bf16 %v3832_v53 }
 0x544   :  { %1140 = vmatmul.mubr.bf16.vlgmr.msra.gmra.mrb[8].mxu1 %v1010_v52 }
 0x545   :  { %3454 = vmatprep.mubr.msk.bf16.mxu1 %vm44_vm0, %v1013_v54  ;;  %v1004_v62 = vsel %vm132_vm2, %v1000_v61, %v3833_v59  ;;  %v1005_v63 = vsel %vm132_vm2, %v1001_v60, %v3834_v58  ;;  %3579 = vmatpush3.bf16.msra.mxu1 %v4583_v5 }
 0x546   :  { %v1008_v1 = vsel %vm137_vm3, %v1004_v62, %v3838_v57  ;;  %v1009_v2 = vsel %vm137_vm3, %v1005_v63, %v3839_v56  ;;  %3580 = vmatprep.subr.bf16.mxu1 %v4154_v0 }
 0x547   :  { %v1012_v3 = vpack.c.bf16 %v1009_v2, %v1008_v1  ;;  %v4150_v2 = vld [vmem:[%s5225_s5] ss:$0 sm:$0xff] }
 0x549   :  { %3581 = vmatpush3.bf16.msra.mxu1 %v4593_v17 }
 0x54a   :  { %3594 = vmatprep.subr.bf16.mxu1 %v4154_v0 }
 0x54c   :  { %1148 = vmatmul.mubr.bf16.gmra.mrb[12].mxu1 %v1012_v3 }
 0x54d   :  { %3582 = vmatprep.mubr.msk.bf16.mxu1 %vm4159_vm4, %v4154_v0 }
 0x554   :  { %3583 = vmatmul.mubr.bf16.vlgmr.msra.gmra.mrb[16].mxu1 %v4155_v4 }
 0x555   :  { %3595 = vmatpush3.bf16.msra.mxu1 %v4583_v5  ;;  %3598 = vmatprep.mubr.msk.bf16.mxu1 %vm4159_vm4, %v4154_v0 }
 0x556   :  { %3596 = vmatprep.subr.bf16.mxu1 %v4154_v0 }
 0x559   :  { %3597 = vmatpush3.bf16.msra.mxu1 %v4593_v17 }
 0x55a   :  { %3610 = vmatprep.subr.bf16.mxu1 %v4154_v0 }
 0x617   :  { %v1141_v7 = vpop.f32.mrb[8].mxu1 }
 0x618   :  { %v1142_v8 = vadd.f32 %v4443_v38, %v1141_v7  ;;  %v1143_v9 = vpop.f32.mrb[9].mxu1 }
 0x619   :  { %v1144_v10 = vpop.f32.mrb[10].mxu1 }
 0x61a   :  { %v1170_v11 = vmul.f32 %v1142_v8, %v1142_v8  ;;  %v1145_v4 = vadd.f32 %v4443_v38, %v1144_v10  ;;  %v1146_v13 = vpop.f32.mrb[11].mxu1  ;;  %v1156_v14 = vsel %vm44_vm0, %v1142_v8, 0.0 }
 0x61c   :  { %v1157_v15 = vsel %vm44_vm0, %v1145_v4, 0.0  ;;  %v1171_v16 = vmul.f32 %v1145_v4, %v1145_v4  ;;  %v1174_v19 = vsel %vm44_vm0, %v1170_v11, 0.0 }
 0x61d   :  { %v1158_v18 = vadd.f32 %v1157_v15, %v1156_v14 }
 0x61e   :  { %v1175_v20 = vsel %vm44_vm0, %v1171_v16, 0.0 }
 0x61f   :  { %v1176_v21 = vadd.f32 %v1175_v20, %v1174_v19  ;;  %v1149_v22 = vpop.f32.mrb[12].mxu1 }
 0x620   :  { %v1150_v23 = vadd.f32 %v4443_v38, %v1149_v22  ;;  %v1151_v24 = vpop.f32.mrb[13].mxu1 }
 0x621   :  { %v1152_v25 = vpop.f32.mrb[14].mxu1  ;;  %v3455_v24 = vld [vmem:[%s5230_s9] ss:$0 sm:$0xff] }
 0x622   :  { %v1159_v26 = vsel %vm44_vm0, %v1150_v23, 0.0  ;;  %v1172_v27 = vmul.f32 %v1150_v23, %v1150_v23  ;;  %v1153_v28 = vadd.f32 %v4443_v38, %v1152_v25  ;;  %v1154_v29 = vpop.f32.mrb[15].mxu1 }
 0x623   :  { %v1160_v30 = vadd.f32 %v1159_v26, %v1158_v18 }
 0x624   :  { %v1177_v31 = vsel %vm44_vm0, %v1172_v27, 0.0  ;;  %v1161_v32 = vsel %vm44_vm0, %v1153_v28, 0.0  ;;  %v1173_v33 = vmul.f32 %v1153_v28, %v1153_v28 }
 0x625   :  { %v1178_v34 = vadd.f32 %v1177_v31, %v1176_v21  ;;  %v1162_v35 = vadd.f32 %v1161_v32, %v1160_v30 }
 0x626   :  { %v1179_v36 = vsel %vm44_vm0, %v1173_v33, 0.0 }
 0x627   :  { %v1163_v37 = vrot.slane %v1162_v35, 4  ;;  %v1180_v39 = vadd.f32 %v1179_v36, %v1178_v34  ;;  %v1346_v20 = vpop.f32.mrb[16].mxu1 }
 0x628   :  { %v3584_v21 = vpop.f32.mrb[17].mxu1  ;;  %v1353_v25 = vrot.slane %v1346_v20, 1 }
 0x629   :  { %v1164_v40 = vadd.f32 %v1163_v37, %v1162_v35  ;;  %v1181_v41 = vrot.slane %v1180_v39, 4  ;;  %v1349_v22 = vpop.f32.mrb[18].mxu1 }
 0x62b   :  { %v1165_v42 = vrot.slane %v1164_v40, 2  ;;  %v1182_v43 = vadd.f32 %v1181_v41, %v1180_v39 }
 0x62d   :  { %v1166_v44 = vadd.f32 %v1165_v42, %v1164_v40  ;;  %v1183_v45 = vrot.slane %v1182_v43, 2 }
 0x62f   :  { %v1167_v38 = vrot.slane %v1166_v44, 1  ;;  %v1184_v46 = vadd.f32 %v1183_v45, %v1182_v43 }
 0x631   :  { %v1168_v47 = vadd.f32 %v1167_v38, %v1166_v44  ;;  %v1185_v48 = vrot.slane %v1184_v46, 1 }
 0x633   :  { %v1169_v49 = vmul.f32 0.03125, %v1168_v47  ;;  %v1186_v50 = vadd.f32 %v1185_v48, %v1184_v46 }
 0x635   :  { %v1187_v51 = vmul.f32 0.03125, %v1186_v50  ;;  %v1188_v52 = vmul.f32 %v1169_v49, %v1169_v49  ;;  %v1193_v53 = vsub.f32 %v1150_v23, %v1169_v49  ;;  %v1194_v54 = vsub.f32 %v1153_v28, %v1169_v49  ;;  %v3585_v23 = vpop.f32.mrb[19].mxu1 }
 0x636   :  { %v1191_v55 = vsub.f32 %v1142_v8, %v1169_v49  ;;  %v1192_v56 = vsub.f32 %v1145_v4, %v1169_v49  ;;  %v4151_v8 = vld [vmem:[%s5226_s6] ss:$0 sm:$0xff] }
 0x637   :  { %v1189_v57 = vsub.f32 %v1187_v51, %v1188_v52 }
 0x639   :  { %v1190_v58 = vmax.f32 %v1189_v57, 0.0 }
 0x63b   :  { %v1195_v59 = vadd.f32 1e-05, %v1190_v58 }
 0x63d   :  { %3892 = vrsqrt.f32 %v1195_v59 }
 0x647   :  { %v3893_v60 = vpop.eup %3892 }
 0x648   :  { %v1199_v61 = vmul.f32 %v3893_v60, %v1193_v53  ;;  %v1200_v62 = vmul.f32 %v3893_v60, %v1194_v54  ;;  %v1197_v63 = vmul.f32 %v3893_v60, %v1191_v55  ;;  %v1198_v1 = vmul.f32 %v3893_v60, %v1192_v56 }
 0x64a   :  { %v1203_v3 = vmul.f32 %v4150_v2, %v1199_v61  ;;  %v1204_v12 = vmul.f32 %v4150_v2, %v1200_v62  ;;  %v1201_v6 = vmul.f32 %v4150_v2, %v1197_v63  ;;  %v1202_v7 = vmul.f32 %v4150_v2, %v1198_v1 }
 0x64c   :  { %v1207_v9 = vadd.f32 %v4151_v8, %v1203_v3  ;;  %v1208_v10 = vadd.f32 %v4151_v8, %v1204_v12  ;;  %v1205_v11 = vadd.f32 %v4151_v8, %v1201_v6  ;;  %v1206_v4 = vadd.f32 %v4151_v8, %v1202_v7 }
 0x64e   :  { %v1211_v13 = vmax.f32 %v1207_v9, 0.0  ;;  %v1212_v14 = vmax.f32 %v1208_v10, 0.0  ;;  %v1209_v15 = vmax.f32 %v1205_v11, 0.0  ;;  %v1210_v16 = vmax.f32 %v1206_v4, 0.0 }
 0x650   :  { %v1214_v18 = vpack.c.bf16 %v1212_v14, %v1211_v13  ;;  %v1213_v19 = vpack.c.bf16 %v1210_v16, %v1209_v15 }
 0x652   :  { %3574 = vmatprep.mubr.msk.bf16.mxu0 %vm44_vm0, %v1213_v19 }
 0x653   :  { %3575 = vmatmul.mubr.msk.bf16.vlgmr.msra.gmra.mrb[16].mxu0 %vm44_vm0, %v1214_v18 }
 0x654   :  { %3587 = vmatpush3.bf16.msra.mxu0 %v4583_v5  ;;  %3590 = vmatprep.mubr.msk.bf16.mxu0 %vm4159_vm4, %v4154_v0 }
 0x655   :  { %3588 = vmatprep.subr.bf16.mxu0 %v4154_v0 }
 0x658   :  { %3589 = vmatpush3.bf16.msra.mxu0 %v4593_v17 }
 0x659   :  { %3602 = vmatprep.subr.bf16.mxu0 %v4154_v0 }
 0x726   :  { %v3576_v26 = vpop.f32.mrb[16].mxu0 }
 0x727   :  { %v4639_v27 = vadd.f32 %v3576_v26, %v3455_v24  ;;  %v1278_v28 = vpop.f32.mrb[17].mxu0 }
 0x728   :  { %v4641_v29 = vadd.f32 %v3455_v24, %v1278_v28  ;;  %v3577_v30 = vpop.f32.mrb[18].mxu0 }
 0x729   :  { %v4643_v31 = vadd.f32 %v3577_v30, %v3455_v24  ;;  %v1281_v32 = vpop.f32.mrb[19].mxu0  ;;  %v1357_v33 = vadd.f32 %v1353_v25, %v4639_v27 }
 0x72a   :  { %v4646_v34 = vadd.f32 %v3455_v24, %v1281_v32  ;;  %v1356_v35 = vadd.f32 %v1346_v20, %v4641_v29 }
 0x72b   :  { %3894 = vtanh.f32 %v1357_v33  ;;  %v3463_v39 = vmul.f32 -1.442695, %v1357_v33 }
 0x72c   :  { %3896 = vtanh.f32 %v1356_v35  ;;  %v3462_v40 = vmul.f32 -1.442695, %v1356_v35 }
 0x72d   :  { %3898 = vpow2.f32 %v3463_v39 }
 0x72e   :  { %3900 = vpow2.f32 %v3462_v40 }
 0x735   :  { %v3895_v36 = vpop.eup %3894 }
 0x736   :  { %v3897_v37 = vpop.eup %3896  ;;  %1378 = vrot.lane.b32.xlu0 %v3895_v36, %s4158_s20 }
 0x737   :  { %1376 = vrot.lane.b32.xlu1 %v3897_v37, %s4158_s20  ;;  %v3899_v41 = vpop.eup %3898 }
 0x738   :  { %v3901_v42 = vpop.eup %3900  ;;  %v1365_v43 = vadd.f32 1.0, %v3899_v41 }
 0x739   :  { %v1364_v44 = vadd.f32 1.0, %v3901_v42 }
 0x73a   :  { %3902 = vrcp.f32 %v1365_v43 }
 0x73b   :  { %3904 = vrcp.f32 %v1364_v44 }
 0x744   :  { %v3903_v45 = vpop.eup %3902 }
 0x745   :  { %v3905_v46 = vpop.eup %3904  ;;  %v1373_v50 = vmul.f32 0.0, %v3903_v45 }
 0x746   :  { %v1372_v52 = vmul.f32 0.0, %v3905_v46 }
 0x7a8   :  { %v1379_v38 = vpop.permute.xlu0 %1378 }
 0x7a9   :  { %v1383_v47 = vmul.f32 %v3903_v45, %v1379_v38  ;;  %v1377_v48 = vpop.permute.xlu1 %1376 }
 0x7aa   :  { %v1382_v49 = vmul.f32 %v3905_v46, %v1377_v48 }
 0x7ab   :  { %1388 = vrot.lane.b32.xlu0 %v1383_v47, %s4156_s0 }
 0x7ac   :  { %1386 = vrot.lane.b32.xlu1 %v1382_v49, %s4156_s0 }
 0x81d   :  { %v1389_v51 = vpop.permute.xlu0 %1388 }
 0x81e   :  { %v1393_v53 = vadd.f32 %v1389_v51, %v1373_v50  ;;  %v1387_v54 = vpop.permute.xlu1 %1386 }
 0x81f   :  { %v4653_v55 = vadd.f32 %v1387_v54, %v1372_v52 }
 0x820   :  { %3906 = vtanh.f32 %v1393_v53  ;;  %v1495_v33 = vrot.slane %v1393_v53, 7 }
 0x821   :  { %3908 = vtanh.f32 %v4653_v55  ;;  %v1494_v36 = vrot.slane %v4653_v55, 7 }
 0x82a   :  { %v3907_v56 = vpop.eup %3906 }
 0x82b   :  { %v3909_v57 = vpop.eup %3908  ;;  %1400 = vrot.lane.b32.xlu0 %v3907_v56, %s4158_s20 }
 0x82c   :  { %1398 = vrot.lane.b32.xlu1 %v3909_v57, %s4158_s20 }
 0x89d   :  { %v1401_v58 = vpop.permute.xlu0 %1400 }
 0x89e   :  { %v4658_v59 = vmul.f32 %v3903_v45, %v1401_v58  ;;  %v1399_v60 = vpop.permute.xlu1 %1398 }
 0x89f   :  { %v4660_v61 = vmul.f32 %v3905_v46, %v1399_v60 }
 0x8a0   :  { %v1418_v62 = vpack.c.bf16 %v4658_v59, %v4658_v59 }
 0x8a1   :  { %v1417_v63 = vpack.c.bf16 %v4660_v61, %v4660_v61 }
 0x8a2   :  { %v1422_v1 = vunpack.c.l.b16 %v1418_v62 }
 0x8a3   :  { %v1421_v2 = vunpack.c.l.b16 %v1417_v63 }
 0x8a4   :  { %v1423_v3 = vrot.slane %v1422_v1, 7 }
 0x8a6   :  { %v1425_v12 = vsel %vm1424_vm5, %v1423_v3, %v1421_v2 }
 0x8a7   :  { %v1426_v6 = vpack.c.b16 %v1425_v12, %v1425_v12 }
 0x8a9   :  { %1427 = vrot.lane.b32.xlu0 %v1426_v6, %s4156_s0 }
 0x91b   :  { %v1428_v7 = vpop.permute.xlu0 %1427 }
 0x91c   :  { %3591 = vmatmul.mubr.msk.bf16.vlgmr.msra.gmra.mrb[20].mxu0 %vm44_vm0, %v1428_v7 }
 0x91d   :  { %3603 = vmatpush3.bf16.msra.mxu0 %v4583_v5  ;;  %3606 = vmatprep.mubr.msk.bf16.mxu0 %vm4159_vm4, %v4154_v0 }
 0x91e   :  { %3604 = vmatprep.subr.bf16.mxu0 %v4154_v0 }
 0x921   :  { %3605 = vmatpush3.bf16.msra.mxu0 %v4593_v17 }
 0x922   :  { %3618 = vmatprep.subr.bf16.mxu0 %v4154_v0 }
 0x9ef   :  { %v1466_v8 = vpop.f32.mrb[20].mxu0 }
 0x9f0   :  { %v1473_v9 = vrot.slane %v1466_v8, 7  ;;  %v1477_v10 = vadd.f32 %v1466_v8, %v4639_v27  ;;  %v3592_v11 = vpop.f32.mrb[21].mxu0 }
 0x9f1   :  { %v1469_v4 = vpop.f32.mrb[22].mxu0 }
 0x9f2   :  { %v1476_v13 = vadd.f32 %v1473_v9, %v4641_v29  ;;  %3910 = vtanh.f32 %v1477_v10  ;;  %v3593_v14 = vpop.f32.mrb[23].mxu0  ;;  %v3466_v18 = vmul.f32 -1.442695, %v1477_v10 }
 0x9f4   :  { %3912 = vtanh.f32 %v1476_v13  ;;  %v3465_v19 = vmul.f32 -1.442695, %v1476_v13 }
 0x9f5   :  { %3914 = vpow2.f32 %v3466_v18 }
 0x9f6   :  { %3916 = vpow2.f32 %v3465_v19 }
 0x9fc   :  { %v3911_v15 = vpop.eup %3910 }
 0x9fd   :  { %1504 = vrot.lane.b32.xlu0 %v3911_v15, %s4158_s20 }
 0x9fe   :  { %v3913_v16 = vpop.eup %3912 }
 0x9ff   :  { %1502 = vrot.lane.b32.xlu1 %v3913_v16, %s4158_s20  ;;  %v3915_v20 = vpop.eup %3914 }
 0xa00   :  { %v3917_v21 = vpop.eup %3916  ;;  %v1485_v22 = vadd.f32 1.0, %v3915_v20 }
 0xa01   :  { %v1484_v23 = vadd.f32 1.0, %v3917_v21 }
 0xa02   :  { %3918 = vrcp.f32 %v1485_v22 }
 0xa03   :  { %3920 = vrcp.f32 %v1484_v23 }
 0xa0c   :  { %v3919_v24 = vpop.eup %3918 }
 0xa0d   :  { %v3921_v28 = vpop.eup %3920  ;;  %v1499_v35 = vmul.f32 %v3919_v24, %v1495_v33 }
 0xa0e   :  { %v1498_v40 = vmul.f32 %v3921_v28, %v1494_v36 }
 0xa6f   :  { %v1505_v25 = vpop.permute.xlu0 %1504 }
 0xa70   :  { %v1509_v26 = vmul.f32 %v3919_v24, %v1505_v25 }
 0xa71   :  { %v1503_v30 = vpop.permute.xlu1 %1502 }
 0xa72   :  { %1514 = vrot.lane.b32.xlu0 %v1509_v26, %s4156_s0  ;;  %v1508_v32 = vmul.f32 %v3921_v28, %v1503_v30 }
 0xa74   :  { %1512 = vrot.lane.b32.xlu1 %v1508_v32, %s4156_s0 }
 0xae4   :  { %v1515_v37 = vpop.permute.xlu0 %1514 }
 0xae5   :  { %v4682_v39 = vadd.f32 %v1515_v37, %v1499_v35 }
 0xae6   :  { %v1513_v41 = vpop.permute.xlu1 %1512 }
 0xae7   :  { %3922 = vtanh.f32 %v4682_v39  ;;  %v1518_v42 = vadd.f32 %v1513_v41, %v1498_v40  ;;  %v1621_v20 = vrot.slane %v4682_v39, 7 }
 0xae9   :  { %3924 = vtanh.f32 %v1518_v42  ;;  %v1620_v19 = vrot.slane %v1518_v42, 7 }
 0xaf1   :  { %v3923_v43 = vpop.eup %3922 }
 0xaf2   :  { %1526 = vrot.lane.b32.xlu0 %v3923_v43, %s4158_s20 }
 0xaf3   :  { %v3925_v44 = vpop.eup %3924 }
 0xaf4   :  { %1524 = vrot.lane.b32.xlu1 %v3925_v44, %s4158_s20 }
 0xb64   :  { %v1527_v45 = vpop.permute.xlu0 %1526 }
 0xb65   :  { %v4687_v38 = vmul.f32 %v3919_v24, %v1527_v45 }
 0xb66   :  { %v1525_v46 = vpop.permute.xlu1 %1524 }
 0xb67   :  { %v4689_v47 = vmul.f32 %v3921_v28, %v1525_v46  ;;  %v1544_v48 = vpack.c.bf16 %v4687_v38, %v4687_v38 }
 0xb69   :  { %v1543_v49 = vpack.c.bf16 %v4689_v47, %v4689_v47  ;;  %v1548_v51 = vunpack.c.l.b16 %v1544_v48 }
 0xb6b   :  { %v1547_v50 = vunpack.c.l.b16 %v1543_v49 }
 0xb6d   :  { %v1549_v52 = vrot.slane %v1547_v50, 1 }
 0xb6f   :  { %v1550_v53 = vsel %vm1424_vm5, %v1548_v51, %v1549_v52 }
 0xb70   :  { %v1551_v54 = vpack.c.b16 %v1550_v53, %v1550_v53 }
 0xb72   :  { %1552 = vrot.lane.b32.xlu1 %v1551_v54, %s4156_s0 }
 0xbe4   :  { %v1553_v55 = vpop.permute.xlu1 %1552 }
 0xbe5   :  { %3599 = vmatmul.mubr.msk.bf16.vlgmr.msra.gmra.mrb[20].mxu1 %vm44_vm0, %v1553_v55 }
 0xbe6   :  { %3611 = vmatpush3.bf16.msra.mxu1 %v4583_v5  ;;  %3614 = vmatprep.mubr.msk.bf16.mxu1 %vm4159_vm4, %v4154_v0 }
 0xbe7   :  { %3612 = vmatprep.subr.bf16.mxu1 %v4154_v0 }
 0xbea   :  { %3613 = vmatpush3.bf16.msra.mxu1 %v4593_v17 }
 0xbeb   :  { %3626 = vmatprep.subr.bf16.mxu1 %v4154_v0 }
 0xcb8   :  { %v1591_v56 = vpop.f32.mrb[20].mxu1 }
 0xcb9   :  { %v1598_v57 = vrot.slane %v1591_v56, 6  ;;  %v1599_v58 = vrot.slane %v1591_v56, 7  ;;  %v3600_v60 = vpop.f32.mrb[21].mxu1 }
 0xcba   :  { %v1594_v62 = vpop.f32.mrb[22].mxu1 }
 0xcbb   :  { %v1602_v63 = vadd.f32 %v1598_v57, %v4641_v29  ;;  %v1603_v1 = vadd.f32 %v1599_v58, %v4639_v27  ;;  %v3601_v2 = vpop.f32.mrb[23].mxu1 }
 0xcbd   :  { %3926 = vtanh.f32 %v1602_v63  ;;  %v3468_v6 = vmul.f32 -1.442695, %v1602_v63  ;;  %v3469_v7 = vmul.f32 -1.442695, %v1603_v1 }
 0xcbe   :  { %3928 = vtanh.f32 %v1603_v1 }
 0xcbf   :  { %3930 = vpow2.f32 %v3468_v6 }
 0xcc0   :  { %3932 = vpow2.f32 %v3469_v7 }
 0xcc7   :  { %v3927_v3 = vpop.eup %3926 }
 0xcc8   :  { %v3929_v12 = vpop.eup %3928  ;;  %1628 = vrot.lane.b32.xlu0 %v3927_v3, %s4158_s20 }
 0xcc9   :  { %1630 = vrot.lane.b32.xlu1 %v3929_v12, %s4158_s20  ;;  %v3931_v8 = vpop.eup %3930 }
 0xcca   :  { %v3933_v9 = vpop.eup %3932  ;;  %v1610_v10 = vadd.f32 1.0, %v3931_v8 }
 0xccb   :  { %v1611_v11 = vadd.f32 1.0, %v3933_v9 }
 0xccc   :  { %3934 = vrcp.f32 %v1610_v10 }
 0xccd   :  { %3936 = vrcp.f32 %v1611_v11 }
 0xcd6   :  { %v3935_v4 = vpop.eup %3934 }
 0xcd7   :  { %v3937_v14 = vpop.eup %3936  ;;  %v1624_v21 = vmul.f32 %v3935_v4, %v1620_v19 }
 0xcd8   :  { %v1625_v22 = vmul.f32 %v3937_v14, %v1621_v20 }
 0xd3a   :  { %v1629_v13 = vpop.permute.xlu0 %1628 }
 0xd3b   :  { %v1631_v15 = vpop.permute.xlu1 %1630  ;;  %v1634_v16 = vmul.f32 %v3935_v4, %v1629_v13 }
 0xd3c   :  { %v1635_v18 = vmul.f32 %v3937_v14, %v1631_v15 }
 0xd3d   :  { %1638 = vrot.lane.b32.xlu0 %v1634_v16, %s4156_s0 }
 0xd3e   :  { %1640 = vrot.lane.b32.xlu1 %v1635_v18, %s4156_s0 }
 0xdaf   :  { %v1639_v23 = vpop.permute.xlu0 %1638 }
 0xdb0   :  { %v1641_v24 = vpop.permute.xlu1 %1640  ;;  %v4711_v25 = vadd.f32 %v1639_v23, %v1624_v21 }
 0xdb1   :  { %v4713_v26 = vadd.f32 %v1641_v24, %v1625_v22 }
 0xdb2   :  { %3938 = vtanh.f32 %v4711_v25  ;;  %v1747_v10 = vrot.slane %v4711_v25, 7 }
 0xdb3   :  { %3940 = vtanh.f32 %v4713_v26  ;;  %v1748_v11 = vrot.slane %v4713_v26, 7 }
 0xdbc   :  { %v3939_v28 = vpop.eup %3938 }
 0xdbd   :  { %v3941_v30 = vpop.eup %3940  ;;  %1650 = vrot.lane.b32.xlu0 %v3939_v28, %s4158_s20 }
 0xdbe   :  { %1652 = vrot.lane.b32.xlu1 %v3941_v30, %s4158_s20 }
 0xe2f   :  { %v1651_v32 = vpop.permute.xlu0 %1650 }
 0xe30   :  { %v1653_v33 = vpop.permute.xlu1 %1652  ;;  %v4719_v35 = vmul.f32 %v3935_v4, %v1651_v32 }
 0xe31   :  { %v4721_v36 = vmul.f32 %v3937_v14, %v1653_v33 }
 0xe32   :  { %v1669_v37 = vpack.c.bf16 %v4719_v35, %v4719_v35 }
 0xe33   :  { %v1670_v39 = vpack.c.bf16 %v4721_v36, %v4721_v36 }
 0xe34   :  { %v1673_v40 = vunpack.c.l.b16 %v1669_v37 }
 0xe35   :  { %v1674_v41 = vunpack.c.l.b16 %v1670_v39 }
 0xe36   :  { %v1675_v42 = vrot.slane %v1673_v40, 2 }
 0xe37   :  { %v1676_v43 = vrot.slane %v1674_v41, 1 }
 0xe39   :  { %v1677_v44 = vsel %vm1424_vm5, %v1676_v43, %v1675_v42 }
 0xe3a   :  { %v1678_v45 = vpack.c.b16 %v1677_v44, %v1677_v44 }
 0xe3c   :  { %1679 = vrot.lane.b32.xlu0 %v1678_v45, %s4156_s0 }
 0xeae   :  { %v1680_v46 = vpop.permute.xlu0 %1679 }
 0xeaf   :  { %3607 = vmatmul.mubr.msk.bf16.vlgmr.msra.gmra.mrb[24].mxu0 %vm44_vm0, %v1680_v46 }
 0xeb0   :  { %3619 = vmatpush3.bf16.msra.mxu0 %v4583_v5  ;;  %3622 = vmatprep.mubr.msk.bf16.mxu0 %vm4159_vm4, %v4154_v0 }
 0xeb1   :  { %3620 = vmatprep.subr.bf16.mxu0 %v4154_v0 }
 0xeb4   :  { %3621 = vmatpush3.bf16.msra.mxu0 %v4593_v17 }
 0xeb5   :  { %3634 = vmatprep.subr.bf16.mxu0 %v4154_v0 }
 0xf82   :  { %v1718_v48 = vpop.f32.mrb[24].mxu0 }
 0xf83   :  { %v1725_v49 = vrot.slane %v1718_v48, 5  ;;  %v1726_v50 = vrot.slane %v1718_v48, 6  ;;  %v3608_v51 = vpop.f32.mrb[25].mxu0 }
 0xf84   :  { %v1721_v52 = vpop.f32.mrb[26].mxu0 }
 0xf85   :  { %v1729_v53 = vadd.f32 %v1725_v49, %v4641_v29  ;;  %v1730_v54 = vadd.f32 %v1726_v50, %v4639_v27  ;;  %v3609_v55 = vpop.f32.mrb[27].mxu0 }
 0xf87   :  { %3942 = vtanh.f32 %v1729_v53  ;;  %v3471_v58 = vmul.f32 -1.442695, %v1729_v53  ;;  %v3472_v60 = vmul.f32 -1.442695, %v1730_v54 }
 0xf88   :  { %3944 = vtanh.f32 %v1730_v54 }
 0xf89   :  { %3946 = vpow2.f32 %v3471_v58 }
 0xf8a   :  { %3948 = vpow2.f32 %v3472_v60 }
 0xf91   :  { %v3943_v56 = vpop.eup %3942 }
 0xf92   :  { %v3945_v57 = vpop.eup %3944  ;;  %1755 = vrot.lane.b32.xlu1 %v3943_v56, %s4158_s20 }
 0xf93   :  { %1757 = vrot.lane.b32.xlu0 %v3945_v57, %s4158_s20  ;;  %v3947_v62 = vpop.eup %3946 }
 0xf94   :  { %v3949_v63 = vpop.eup %3948  ;;  %v1737_v1 = vadd.f32 1.0, %v3947_v62 }
 0xf95   :  { %v1738_v2 = vadd.f32 1.0, %v3949_v63 }
 0xf96   :  { %3950 = vrcp.f32 %v1737_v1 }
 0xf97   :  { %3952 = vrcp.f32 %v1738_v2 }
 0xfa0   :  { %v3951_v3 = vpop.eup %3950 }
 0xfa1   :  { %v3953_v6 = vpop.eup %3952  ;;  %v1751_v4 = vmul.f32 %v3951_v3, %v1747_v10 }
 0xfa2   :  { %v1752_v13 = vmul.f32 %v3953_v6, %v1748_v11 }
0x1004   :  { %v1756_v12 = vpop.permute.xlu1 %1755 }
0x1005   :  { %v1758_v7 = vpop.permute.xlu0 %1757  ;;  %v1761_v8 = vmul.f32 %v3951_v3, %v1756_v12 }
0x1006   :  { %v1762_v9 = vmul.f32 %v3953_v6, %v1758_v7 }
0x1007   :  { %1765 = vrot.lane.b32.xlu1 %v1761_v8, %s4156_s0 }
0x1008   :  { %1767 = vrot.lane.b32.xlu0 %v1762_v9, %s4156_s0 }
0x1079   :  { %v1766_v14 = vpop.permute.xlu1 %1765 }
0x107a   :  { %v1768_v15 = vpop.permute.xlu0 %1767  ;;  %v4744_v16 = vadd.f32 %v1766_v14, %v1751_v4 }
0x107b   :  { %v4746_v18 = vadd.f32 %v1768_v15, %v1752_v13 }
0x107c   :  { %3954 = vtanh.f32 %v4744_v16 }
0x107d   :  { %3956 = vtanh.f32 %v4746_v18  ;;  %v1875_v12 = vrot.slane %v4746_v18, 7 }
0x1086   :  { %v3955_v19 = vpop.eup %3954 }
0x1087   :  { %v3957_v20 = vpop.eup %3956  ;;  %1777 = vrot.lane.b32.xlu1 %v3955_v19, %s4158_s20 }
0x1088   :  { %1779 = vrot.lane.b32.xlu0 %v3957_v20, %s4158_s20 }
0x10f9   :  { %v1778_v21 = vpop.permute.xlu1 %1777 }
0x10fa   :  { %v1780_v22 = vpop.permute.xlu0 %1779  ;;  %v4752_v23 = vmul.f32 %v3951_v3, %v1778_v21  ;;  %v1874_v3 = vrot.slane %v4744_v16, 7 }
0x10fb   :  { %v4754_v24 = vmul.f32 %v3953_v6, %v1780_v22 }
0x10fc   :  { %v1796_v25 = vpack.c.bf16 %v4752_v23, %v4752_v23 }
0x10fd   :  { %v1797_v26 = vpack.c.bf16 %v4754_v24, %v4754_v24 }
0x10fe   :  { %v1800_v28 = vunpack.c.l.b16 %v1796_v25 }
0x10ff   :  { %v1801_v30 = vunpack.c.l.b16 %v1797_v26 }
0x1100   :  { %v1802_v32 = vrot.slane %v1800_v28, 3 }
0x1101   :  { %v1803_v33 = vrot.slane %v1801_v30, 2 }
0x1103   :  { %v1804_v37 = vsel %vm1424_vm5, %v1803_v33, %v1802_v32 }
0x1104   :  { %v1805_v39 = vpack.c.b16 %v1804_v37, %v1804_v37 }
0x1106   :  { %1806 = vrot.lane.b32.xlu1 %v1805_v39, %s4156_s0 }
0x1178   :  { %v1807_v40 = vpop.permute.xlu1 %1806 }
0x1179   :  { %3615 = vmatmul.mubr.msk.bf16.vlgmr.msra.gmra.mrb[24].mxu1 %vm44_vm0, %v1807_v40 }
0x117a   :  { %3627 = vmatpush3.bf16.msra.mxu1 %v4583_v5  ;;  %3630 = vmatprep.mubr.msk.bf16.mxu1 %vm4159_vm4, %v4154_v0 }
0x117b   :  { %3628 = vmatprep.subr.bf16.mxu1 %v4154_v0 }
0x117e   :  { %3629 = vmatpush3.bf16.msra.mxu1 %v4593_v17 }
0x117f   :  { %3642 = vmatprep.subr.bf16.mxu1 %v4154_v0 }
0x124c   :  { %v1845_v41 = vpop.f32.mrb[24].mxu1 }
0x124d   :  { %v1852_v42 = vrot.slane %v1845_v41, 4  ;;  %v1853_v43 = vrot.slane %v1845_v41, 5  ;;  %v3616_v44 = vpop.f32.mrb[25].mxu1 }
0x124e   :  { %v1848_v45 = vpop.f32.mrb[26].mxu1 }
0x124f   :  { %v1856_v46 = vadd.f32 %v1852_v42, %v4641_v29  ;;  %v1857_v48 = vadd.f32 %v1853_v43, %v4639_v27  ;;  %v3617_v49 = vpop.f32.mrb[27].mxu1 }
0x1251   :  { %3958 = vtanh.f32 %v1856_v46  ;;  %v3474_v52 = vmul.f32 -1.442695, %v1856_v46  ;;  %v3475_v53 = vmul.f32 -1.442695, %v1857_v48 }
0x1252   :  { %3960 = vtanh.f32 %v1857_v48 }
0x1253   :  { %3962 = vpow2.f32 %v3474_v52 }
0x1254   :  { %3964 = vpow2.f32 %v3475_v53 }
0x125b   :  { %v3959_v50 = vpop.eup %3958 }
0x125c   :  { %v3961_v51 = vpop.eup %3960  ;;  %1882 = vrot.lane.b32.xlu0 %v3959_v50, %s4158_s20 }
0x125d   :  { %1884 = vrot.lane.b32.xlu1 %v3961_v51, %s4158_s20  ;;  %v3963_v54 = vpop.eup %3962 }
0x125e   :  { %v3965_v55 = vpop.eup %3964  ;;  %v1864_v56 = vadd.f32 1.0, %v3963_v54 }
0x125f   :  { %v1865_v57 = vadd.f32 1.0, %v3965_v55 }
0x1260   :  { %3966 = vrcp.f32 %v1864_v56 }
0x1261   :  { %3968 = vrcp.f32 %v1865_v57 }
0x126a   :  { %v3967_v58 = vpop.eup %3966 }
0x126b   :  { %v3969_v62 = vpop.eup %3968  ;;  %v1878_v6 = vmul.f32 %v3967_v58, %v1874_v3 }
0x126c   :  { %v1879_v7 = vmul.f32 %v3969_v62, %v1875_v12 }
0x12ce   :  { %v1883_v60 = vpop.permute.xlu0 %1882 }
0x12cf   :  { %v1885_v63 = vpop.permute.xlu1 %1884  ;;  %v1888_v1 = vmul.f32 %v3967_v58, %v1883_v60 }
0x12d0   :  { %v1889_v2 = vmul.f32 %v3969_v62, %v1885_v63 }
0x12d1   :  { %1892 = vrot.lane.b32.xlu0 %v1888_v1, %s4156_s0 }
0x12d2   :  { %1894 = vrot.lane.b32.xlu1 %v1889_v2, %s4156_s0 }
0x1343   :  { %v1893_v8 = vpop.permute.xlu0 %1892 }
0x1344   :  { %v1895_v9 = vpop.permute.xlu1 %1894  ;;  %v4777_v10 = vadd.f32 %v1893_v8, %v1878_v6 }
0x1345   :  { %v4779_v11 = vadd.f32 %v1895_v9, %v1879_v7 }
0x1346   :  { %3970 = vtanh.f32 %v4777_v10 }
0x1347   :  { %3972 = vtanh.f32 %v4779_v11  ;;  %v2002_v63 = vrot.slane %v4779_v11, 7 }
0x1350   :  { %v3971_v4 = vpop.eup %3970 }
0x1351   :  { %v3973_v13 = vpop.eup %3972  ;;  %1904 = vrot.lane.b32.xlu0 %v3971_v4, %s4158_s20 }
0x1352   :  { %1906 = vrot.lane.b32.xlu1 %v3973_v13, %s4158_s20 }
0x13c3   :  { %v1905_v14 = vpop.permute.xlu0 %1904 }
0x13c4   :  { %v1907_v15 = vpop.permute.xlu1 %1906  ;;  %v4785_v16 = vmul.f32 %v3967_v58, %v1905_v14 }
0x13c5   :  { %v4787_v18 = vmul.f32 %v3969_v62, %v1907_v15  ;;  %v2001_v62 = vrot.slane %v4777_v10, 7 }
0x13c6   :  { %v1923_v19 = vpack.c.bf16 %v4785_v16, %v4785_v16 }
0x13c7   :  { %v1924_v20 = vpack.c.bf16 %v4787_v18, %v4787_v18 }
0x13c8   :  { %v1927_v21 = vunpack.c.l.b16 %v1923_v19 }
0x13c9   :  { %v1928_v22 = vunpack.c.l.b16 %v1924_v20 }
0x13ca   :  { %v1929_v25 = vrot.slane %v1927_v21, 4 }
0x13cb   :  { %v1930_v26 = vrot.slane %v1928_v22, 3 }
0x13cd   :  { %v1931_v28 = vsel %vm1424_vm5, %v1930_v26, %v1929_v25 }
0x13ce   :  { %v1932_v30 = vpack.c.b16 %v1931_v28, %v1931_v28 }
0x13d0   :  { %1933 = vrot.lane.b32.xlu0 %v1932_v30, %s4156_s0 }
0x1442   :  { %v1934_v32 = vpop.permute.xlu0 %1933 }
0x1443   :  { %3623 = vmatmul.mubr.msk.bf16.vlgmr.msra.gmra.mrb[28].mxu0 %vm44_vm0, %v1934_v32 }
0x1444   :  { %3635 = vmatpush3.bf16.msra.mxu0 %v4583_v5  ;;  %3638 = vmatprep.mubr.msk.bf16.mxu0 %vm4159_vm4, %v4154_v0 }
0x1445   :  { %3636 = vmatprep.subr.bf16.mxu0 %v4154_v0 }
0x1448   :  { %3637 = vmatpush3.bf16.msra.mxu0 %v4593_v17 }
0x1449   :  { %3650 = vmatprep.subr.bf16.mxu0 %v4154_v0 }
0x1516   :  { %v1972_v33 = vpop.f32.mrb[28].mxu0 }
0x1517   :  { %v1979_v37 = vrot.slane %v1972_v33, 3  ;;  %v1980_v39 = vrot.slane %v1972_v33, 4  ;;  %v3624_v40 = vpop.f32.mrb[29].mxu0 }
0x1518   :  { %v1975_v41 = vpop.f32.mrb[30].mxu0 }
0x1519   :  { %v1983_v42 = vadd.f32 %v1979_v37, %v4641_v29  ;;  %v1984_v43 = vadd.f32 %v1980_v39, %v4639_v27  ;;  %v3625_v44 = vpop.f32.mrb[31].mxu0 }
0x151b   :  { %3974 = vtanh.f32 %v1983_v42  ;;  %v3477_v48 = vmul.f32 -1.442695, %v1983_v42  ;;  %v3478_v49 = vmul.f32 -1.442695, %v1984_v43 }
0x151c   :  { %3976 = vtanh.f32 %v1984_v43 }
0x151d   :  { %3978 = vpow2.f32 %v3477_v48 }
0x151e   :  { %3980 = vpow2.f32 %v3478_v49 }
0x1525   :  { %v3975_v45 = vpop.eup %3974 }
0x1526   :  { %v3977_v46 = vpop.eup %3976  ;;  %2009 = vrot.lane.b32.xlu1 %v3975_v45, %s4158_s20 }
0x1527   :  { %2011 = vrot.lane.b32.xlu0 %v3977_v46, %s4158_s20  ;;  %v3979_v50 = vpop.eup %3978 }
0x1528   :  { %v3981_v51 = vpop.eup %3980  ;;  %v1991_v52 = vadd.f32 1.0, %v3979_v50 }
0x1529   :  { %v1992_v53 = vadd.f32 1.0, %v3981_v51 }
0x152a   :  { %3982 = vrcp.f32 %v1991_v52 }
0x152b   :  { %3984 = vrcp.f32 %v1992_v53 }
0x1534   :  { %v3983_v54 = vpop.eup %3982 }
0x1535   :  { %v3985_v56 = vpop.eup %3984  ;;  %v2005_v1 = vmul.f32 %v3983_v54, %v2001_v62 }
0x1536   :  { %v2006_v2 = vmul.f32 %v3985_v56, %v2002_v63 }
0x1598   :  { %v2010_v55 = vpop.permute.xlu1 %2009 }
0x1599   :  { %v2012_v57 = vpop.permute.xlu0 %2011  ;;  %v2015_v58 = vmul.f32 %v3983_v54, %v2010_v55 }
0x159a   :  { %v2016_v60 = vmul.f32 %v3985_v56, %v2012_v57 }
0x159b   :  { %2019 = vrot.lane.b32.xlu1 %v2015_v58, %s4156_s0 }
0x159c   :  { %2021 = vrot.lane.b32.xlu0 %v2016_v60, %s4156_s0 }
0x160d   :  { %v2020_v3 = vpop.permute.xlu1 %2019 }
0x160e   :  { %v2022_v12 = vpop.permute.xlu0 %2021  ;;  %v4810_v6 = vadd.f32 %v2020_v3, %v2005_v1 }
0x160f   :  { %v4812_v7 = vadd.f32 %v2022_v12, %v2006_v2 }
0x1610   :  { %3986 = vtanh.f32 %v4810_v6 }
0x1611   :  { %3988 = vtanh.f32 %v4812_v7  ;;  %v2129_v57 = vrot.slane %v4812_v7, 7 }
0x161a   :  { %v3987_v8 = vpop.eup %3986 }
0x161b   :  { %v3989_v9 = vpop.eup %3988  ;;  %2031 = vrot.lane.b32.xlu1 %v3987_v8, %s4158_s20 }
0x161c   :  { %2033 = vrot.lane.b32.xlu0 %v3989_v9, %s4158_s20 }
0x168d   :  { %v2032_v10 = vpop.permute.xlu1 %2031 }
0x168e   :  { %v2034_v11 = vpop.permute.xlu0 %2033  ;;  %v4818_v4 = vmul.f32 %v3983_v54, %v2032_v10 }
0x168f   :  { %v4820_v13 = vmul.f32 %v3985_v56, %v2034_v11  ;;  %v2128_v56 = vrot.slane %v4810_v6, 7 }
0x1690   :  { %v2050_v14 = vpack.c.bf16 %v4818_v4, %v4818_v4 }
0x1691   :  { %v2051_v15 = vpack.c.bf16 %v4820_v13, %v4820_v13 }
0x1692   :  { %v2054_v19 = vunpack.c.l.b16 %v2050_v14 }
0x1693   :  { %v2055_v20 = vunpack.c.l.b16 %v2051_v15 }
0x1694   :  { %v2056_v21 = vrot.slane %v2054_v19, 5 }
0x1695   :  { %v2057_v22 = vrot.slane %v2055_v20, 4 }
0x1697   :  { %v2058_v25 = vsel %vm1424_vm5, %v2057_v22, %v2056_v21 }
0x1698   :  { %v2059_v26 = vpack.c.b16 %v2058_v25, %v2058_v25 }
0x169a   :  { %2060 = vrot.lane.b32.xlu1 %v2059_v26, %s4156_s0  ;;  %v4865_v26 = vld [vmem:[%s5228_s8] sm:$0xff]  }
0x170c   :  { %v2061_v28 = vpop.permute.xlu1 %2060 }
0x170d   :  { %3631 = vmatmul.mubr.msk.bf16.vlgmr.msra.gmra.mrb[28].mxu1 %vm44_vm0, %v2061_v28  ;;  %v4874_v28 = vld [vmem:[%s5228_s8 + $0x8] sm:$0xff]  }
0x170e   :  { %3643 = vmatpush3.bf16.msra.mxu1 %v4583_v5  ;;  %3646 = vmatprep.mubr.msk.bf16.mxu1 %vm4159_vm4, %v4154_v0 }
0x170f   :  { %3644 = vmatprep.subr.bf16.mxu1 %v4154_v0 }
0x1712   :  { %3645 = vmatpush3.bf16.msra.mxu1 %v4593_v17 }
0x1713   :  { %3658 = vmatprep.subr.bf16.mxu1 %v4154_v0 }
0x17e0   :  { %v2099_v30 = vpop.f32.mrb[28].mxu1 }
0x17e1   :  { %v2106_v32 = vrot.slane %v2099_v30, 2  ;;  %v2107_v33 = vrot.slane %v2099_v30, 3  ;;  %v3632_v37 = vpop.f32.mrb[29].mxu1 }
0x17e2   :  { %v2102_v39 = vpop.f32.mrb[30].mxu1 }
0x17e3   :  { %v2110_v40 = vadd.f32 %v2106_v32, %v4641_v29  ;;  %v2111_v41 = vadd.f32 %v2107_v33, %v4639_v27  ;;  %v3633_v42 = vpop.f32.mrb[31].mxu1 }
0x17e5   :  { %3990 = vtanh.f32 %v2110_v40  ;;  %v3480_v17 = vmul.f32 -1.442695, %v2110_v40  ;;  %v3481_v44 = vmul.f32 -1.442695, %v2111_v41 }
0x17e6   :  { %3992 = vtanh.f32 %v2111_v41 }
0x17e7   :  { %3994 = vpow2.f32 %v3480_v17 }
0x17e8   :  { %3996 = vpow2.f32 %v3481_v44 }
0x17ef   :  { %v3991_v5 = vpop.eup %3990 }
0x17f0   :  { %v3993_v43 = vpop.eup %3992  ;;  %2136 = vrot.lane.b32.xlu0 %v3991_v5, %s4158_s20 }
0x17f1   :  { %2138 = vrot.lane.b32.xlu1 %v3993_v43, %s4158_s20  ;;  %v3995_v45 = vpop.eup %3994 }
0x17f2   :  { %v3997_v46 = vpop.eup %3996  ;;  %v2118_v48 = vadd.f32 1.0, %v3995_v45 }
0x17f3   :  { %v2119_v49 = vadd.f32 1.0, %v3997_v46 }
0x17f4   :  { %3998 = vrcp.f32 %v2118_v48 }
0x17f5   :  { %4000 = vrcp.f32 %v2119_v49 }
0x17fe   :  { %v3999_v50 = vpop.eup %3998 }
0x17ff   :  { %v4001_v52 = vpop.eup %4000  ;;  %v2132_v58 = vmul.f32 %v3999_v50, %v2128_v56 }
0x1800   :  { %v2133_v60 = vmul.f32 %v4001_v52, %v2129_v57 }
0x1862   :  { %v2137_v51 = vpop.permute.xlu0 %2136 }
0x1863   :  { %v2139_v53 = vpop.permute.xlu1 %2138  ;;  %v2142_v54 = vmul.f32 %v3999_v50, %v2137_v51 }
0x1864   :  { %v2143_v55 = vmul.f32 %v4001_v52, %v2139_v53 }
0x1865   :  { %2146 = vrot.lane.b32.xlu0 %v2142_v54, %s4156_s0 }
0x1866   :  { %2148 = vrot.lane.b32.xlu1 %v2143_v55, %s4156_s0 }
0x18d7   :  { %v2147_v62 = vpop.permute.xlu0 %2146 }
0x18d8   :  { %v2149_v63 = vpop.permute.xlu1 %2148  ;;  %v4843_v1 = vadd.f32 %v2147_v62, %v2132_v58 }
0x18d9   :  { %v4845_v2 = vadd.f32 %v2149_v63, %v2133_v60 }
0x18da   :  { %4002 = vtanh.f32 %v4843_v1  ;;  %v2255_v54 = vrot.slane %v4843_v1, 7 }
0x18db   :  { %4004 = vtanh.f32 %v4845_v2  ;;  %v2256_v55 = vrot.slane %v4845_v2, 7 }
0x18e4   :  { %v4003_v3 = vpop.eup %4002 }
0x18e5   :  { %v4005_v12 = vpop.eup %4004  ;;  %2158 = vrot.lane.b32.xlu0 %v4003_v3, %s4158_s20 }
0x18e6   :  { %2160 = vrot.lane.b32.xlu1 %v4005_v12, %s4158_s20 }
0x1957   :  { %v2159_v6 = vpop.permute.xlu0 %2158 }
0x1958   :  { %v2161_v7 = vpop.permute.xlu1 %2160  ;;  %v4851_v8 = vmul.f32 %v3999_v50, %v2159_v6 }
0x1959   :  { %v4853_v9 = vmul.f32 %v4001_v52, %v2161_v7 }
0x195a   :  { %v2177_v10 = vpack.c.bf16 %v4851_v8, %v4851_v8 }
0x195b   :  { %v2178_v11 = vpack.c.bf16 %v4853_v9, %v4853_v9 }
0x195c   :  { %v2181_v14 = vunpack.c.l.b16 %v2177_v10 }
0x195d   :  { %v2182_v15 = vunpack.c.l.b16 %v2178_v11 }
0x195e   :  { %v2183_v19 = vrot.slane %v2181_v14, 6 }
0x195f   :  { %v2184_v20 = vrot.slane %v2182_v15, 5 }
0x1961   :  { %v2185_v21 = vsel %vm1424_vm5, %v2184_v20, %v2183_v19 }
0x1962   :  { %v2186_v22 = vpack.c.b16 %v2185_v21, %v2185_v21 }
0x1964   :  { %2187 = vrot.lane.b32.xlu0 %v2186_v22, %s4156_s0 }
0x19d6   :  { %v2188_v25 = vpop.permute.xlu0 %2187 }
0x19d7   :  { %3639 = vmatmul.mubr.msk.bf16.vlgmr.msra.gmra.mrb[32].mxu0 %vm44_vm0, %v2188_v25 }
0x19d8   :  { %3651 = vmatpush3.bf16.msra.mxu0 %v4865_v26  ;;  %3654 = vmatprep.mubr.msk.bf16.mxu0 %vm4159_vm4, %v4154_v0 }
0x19d9   :  { %3652 = vmatprep.subr.bf16.mxu0 %v4154_v0 }
0x19dc   :  { %3653 = vmatpush3.bf16.msra.mxu0 %v4874_v28 }
0x19dd   :  { %3666 = vmatprep.subr.bf16.mxu0 %v4154_v0 }
0x1aaa   :  { %v2226_v30 = vpop.f32.mrb[32].mxu0 }
0x1aab   :  { %v2233_v32 = vrot.slane %v2226_v30, 1  ;;  %v2234_v33 = vrot.slane %v2226_v30, 2  ;;  %v3640_v37 = vpop.f32.mrb[33].mxu0 }
0x1aac   :  { %v2229_v39 = vpop.f32.mrb[34].mxu0 }
0x1aad   :  { %v2237_v40 = vadd.f32 %v2233_v32, %v4641_v29  ;;  %v2238_v41 = vadd.f32 %v2234_v33, %v4639_v27  ;;  %v3641_v42 = vpop.f32.mrb[35].mxu0 }
0x1aaf   :  { %4006 = vtanh.f32 %v2237_v40  ;;  %v3483_v17 = vmul.f32 -1.442695, %v2237_v40  ;;  %v3484_v44 = vmul.f32 -1.442695, %v2238_v41 }
0x1ab0   :  { %4008 = vtanh.f32 %v2238_v41 }
0x1ab1   :  { %4010 = vpow2.f32 %v3483_v17 }
0x1ab2   :  { %4012 = vpow2.f32 %v3484_v44 }
0x1ab9   :  { %v4007_v5 = vpop.eup %4006 }
0x1aba   :  { %v4009_v43 = vpop.eup %4008  ;;  %2263 = vrot.lane.b32.xlu1 %v4007_v5, %s4158_s20 }
0x1abb   :  { %2265 = vrot.lane.b32.xlu0 %v4009_v43, %s4158_s20  ;;  %v4011_v45 = vpop.eup %4010 }
0x1abc   :  { %v4013_v46 = vpop.eup %4012  ;;  %v2245_v48 = vadd.f32 1.0, %v4011_v45 }
0x1abd   :  { %v2246_v49 = vadd.f32 1.0, %v4013_v46 }
0x1abe   :  { %4014 = vrcp.f32 %v2245_v48 }
0x1abf   :  { %4016 = vrcp.f32 %v2246_v49 }
0x1ac8   :  { %v4015_v27 = vpop.eup %4014 }
0x1ac9   :  { %v4017_v50 = vpop.eup %4016  ;;  %v2259_v56 = vmul.f32 %v4015_v27, %v2255_v54 }
0x1aca   :  { %v2260_v57 = vmul.f32 %v4017_v50, %v2256_v55 }
0x1b2c   :  { %v2264_v29 = vpop.permute.xlu1 %2263 }
0x1b2d   :  { %v2266_v51 = vpop.permute.xlu0 %2265  ;;  %v2269_v52 = vmul.f32 %v4015_v27, %v2264_v29 }
0x1b2e   :  { %v2270_v53 = vmul.f32 %v4017_v50, %v2266_v51 }
0x1b2f   :  { %2273 = vrot.lane.b32.xlu1 %v2269_v52, %s4156_s0 }
0x1b30   :  { %2275 = vrot.lane.b32.xlu0 %v2270_v53, %s4156_s0 }
0x1ba1   :  { %v2274_v58 = vpop.permute.xlu1 %2273 }
0x1ba2   :  { %v2276_v60 = vpop.permute.xlu0 %2275  ;;  %v2279_v62 = vadd.f32 %v2274_v58, %v2259_v56 }
0x1ba3   :  { %v4886_v63 = vadd.f32 %v2276_v60, %v2260_v57 }
0x1ba4   :  { %4018 = vtanh.f32 %v2279_v62  ;;  %v2381_v53 = vrot.slane %v2279_v62, 7 }
0x1ba5   :  { %4020 = vtanh.f32 %v4886_v63  ;;  %v2382_v55 = vrot.slane %v4886_v63, 7 }
0x1bae   :  { %v4019_v3 = vpop.eup %4018 }
0x1baf   :  { %v4021_v12 = vpop.eup %4020  ;;  %2285 = vrot.lane.b32.xlu1 %v4019_v3, %s4158_s20 }
0x1bb0   :  { %2287 = vrot.lane.b32.xlu0 %v4021_v12, %s4158_s20 }
0x1c21   :  { %v2286_v6 = vpop.permute.xlu1 %2285 }
0x1c22   :  { %v2288_v1 = vpop.permute.xlu0 %2287  ;;  %v4891_v7 = vmul.f32 %v4015_v27, %v2286_v6 }
0x1c23   :  { %v4893_v2 = vmul.f32 %v4017_v50, %v2288_v1 }
0x1c24   :  { %v2304_v10 = vpack.c.bf16 %v4891_v7, %v4891_v7 }
0x1c25   :  { %v2305_v11 = vpack.c.bf16 %v4893_v2, %v4893_v2 }
0x1c26   :  { %v2308_v14 = vunpack.c.l.b16 %v2304_v10 }
0x1c27   :  { %v2309_v15 = vunpack.c.l.b16 %v2305_v11 }
0x1c28   :  { %v2310_v19 = vrot.slane %v2308_v14, 7 }
0x1c29   :  { %v2311_v20 = vrot.slane %v2309_v15, 6 }
0x1c2b   :  { %v2312_v21 = vsel %vm1424_vm5, %v2311_v20, %v2310_v19 }
0x1c2c   :  { %v2313_v22 = vpack.c.b16 %v2312_v21, %v2312_v21 }
0x1c2e   :  { %2314 = vrot.lane.b32.xlu1 %v2313_v22, %s4156_s0 }
0x1ca0   :  { %v2315_v25 = vpop.permute.xlu1 %2314 }
0x1ca1   :  { %3647 = vmatmul.mubr.msk.bf16.vlgmr.msra.gmra.mrb[32].mxu1 %vm44_vm0, %v2315_v25 }
0x1ca2   :  { %3659 = vmatpush3.bf16.msra.mxu1 %v4865_v26  ;;  %3662 = vmatprep.mubr.msk.bf16.mxu1 %vm4159_vm4, %v4154_v0 }
0x1ca3   :  { %3660 = vmatprep.subr.bf16.mxu1 %v4154_v0 }
0x1ca6   :  { %3661 = vmatpush3.bf16.msra.mxu1 %v4874_v28 }
0x1ca7   :  { %3674 = vmatprep.subr.bf16.mxu1 %v4154_v0 }
0x1d74   :  { %v2353_v30 = vpop.f32.mrb[32].mxu1 }
0x1d75   :  { %v2360_v32 = vrot.slane %v2353_v30, 1  ;;  %v2363_v33 = vadd.f32 %v2353_v30, %v4646_v34  ;;  %v3648_v37 = vpop.f32.mrb[33].mxu1 }
0x1d76   :  { %v2356_v39 = vpop.f32.mrb[34].mxu1 }
0x1d77   :  { %v2364_v40 = vadd.f32 %v2360_v32, %v4643_v31  ;;  %4022 = vtanh.f32 %v2363_v33  ;;  %v3649_v41 = vpop.f32.mrb[35].mxu1  ;;  %v3486_v43 = vmul.f32 -1.442695, %v2363_v33 }
0x1d79   :  { %4024 = vtanh.f32 %v2364_v40  ;;  %v3487_v17 = vmul.f32 -1.442695, %v2364_v40 }
0x1d7a   :  { %4026 = vpow2.f32 %v3486_v43 }
0x1d7b   :  { %4028 = vpow2.f32 %v3487_v17 }
0x1d81   :  { %v4023_v42 = vpop.eup %4022 }
0x1d82   :  { %2389 = vrot.lane.b32.xlu1 %v4023_v42, %s4158_s20 }
0x1d83   :  { %v4025_v5 = vpop.eup %4024 }
0x1d84   :  { %2391 = vrot.lane.b32.xlu0 %v4025_v5, %s4158_s20  ;;  %v4027_v44 = vpop.eup %4026 }
0x1d85   :  { %v4029_v45 = vpop.eup %4028  ;;  %v2371_v46 = vadd.f32 1.0, %v4027_v44 }
0x1d86   :  { %v2372_v48 = vadd.f32 1.0, %v4029_v45 }
0x1d87   :  { %4030 = vrcp.f32 %v2371_v46 }
0x1d88   :  { %4032 = vrcp.f32 %v2372_v48 }
0x1d91   :  { %v4031_v49 = vpop.eup %4030 }
0x1d92   :  { %v4033_v50 = vpop.eup %4032  ;;  %v2385_v54 = vmul.f32 %v4031_v49, %v2381_v53 }
0x1d93   :  { %v2386_v58 = vmul.f32 %v4033_v50, %v2382_v55 }
0x1df4   :  { %v2390_v27 = vpop.permute.xlu1 %2389 }
0x1df5   :  { %v2395_v29 = vmul.f32 %v4031_v49, %v2390_v27 }
0x1df6   :  { %v2392_v51 = vpop.permute.xlu0 %2391 }
0x1df7   :  { %2399 = vrot.lane.b32.xlu1 %v2395_v29, %s4156_s0  ;;  %v2396_v52 = vmul.f32 %v4033_v50, %v2392_v51 }
0x1df9   :  { %2401 = vrot.lane.b32.xlu0 %v2396_v52, %s4156_s0 }
0x1e69   :  { %v2400_v56 = vpop.permute.xlu1 %2399 }
0x1e6a   :  { %v4915_v57 = vadd.f32 %v2400_v56, %v2385_v54 }
0x1e6b   :  { %v2402_v60 = vpop.permute.xlu0 %2401 }
0x1e6c   :  { %4034 = vtanh.f32 %v4915_v57  ;;  %v2406_v3 = vadd.f32 %v2402_v60, %v2386_v58  ;;  %v2505_v55 = vrot.slane %v4915_v57, 7 }
0x1e6e   :  { %4036 = vtanh.f32 %v2406_v3  ;;  %v2506_v53 = vrot.slane %v2406_v3, 7 }
0x1e76   :  { %v4035_v12 = vpop.eup %4034 }
0x1e77   :  { %2411 = vrot.lane.b32.xlu1 %v4035_v12, %s4158_s20 }
0x1e78   :  { %v4037_v6 = vpop.eup %4036 }
0x1e79   :  { %2413 = vrot.lane.b32.xlu0 %v4037_v6, %s4158_s20 }
0x1ee9   :  { %v2412_v1 = vpop.permute.xlu1 %2411 }
0x1eea   :  { %v4920_v62 = vmul.f32 %v4031_v49, %v2412_v1 }
0x1eeb   :  { %v2414_v10 = vpop.permute.xlu0 %2413 }
0x1eec   :  { %v4922_v63 = vmul.f32 %v4033_v50, %v2414_v10  ;;  %v2429_v11 = vpack.c.bf16 %v4920_v62, %v4920_v62 }
0x1eee   :  { %v2430_v14 = vpack.c.bf16 %v4922_v63, %v4922_v63  ;;  %v2433_v19 = vunpack.c.l.b16 %v2429_v11 }
0x1ef0   :  { %v2434_v15 = vunpack.c.l.b16 %v2430_v14 }
0x1ef2   :  { %v2435_v20 = vrot.slane %v2434_v15, 7 }
0x1ef4   :  { %v2436_v21 = vsel %vm1424_vm5, %v2435_v20, %v2433_v19 }
0x1ef5   :  { %v2437_v22 = vpack.c.b16 %v2436_v21, %v2436_v21 }
0x1ef7   :  { %2438 = vrot.lane.b32.xlu0 %v2437_v22, %s4156_s0 }
0x1f69   :  { %v2439_v25 = vpop.permute.xlu0 %2438 }
0x1f6a   :  { %3655 = vmatmul.mubr.msk.bf16.vlgmr.msra.gmra.mrb[36].mxu0 %vm44_vm0, %v2439_v25 }
0x1f6b   :  { %3667 = vmatpush3.bf16.msra.mxu0 %v4865_v26  ;;  %3670 = vmatprep.mubr.msk.bf16.mxu0 %vm4159_vm4, %v4154_v0 }
0x1f6c   :  { %3668 = vmatprep.subr.bf16.mxu0 %v4154_v0 }
0x1f6f   :  { %3669 = vmatpush3.bf16.msra.mxu0 %v4874_v28 }
0x1f70   :  { %3682 = vmatprep.subr.bf16.mxu0 %v4154_v0 }
0x203d   :  { %v2477_v30 = vpop.f32.mrb[36].mxu0 }
0x203e   :  { %v2484_v32 = vrot.slane %v2477_v30, 7  ;;  %v2488_v33 = vadd.f32 %v2477_v30, %v4643_v31  ;;  %v3656_v37 = vpop.f32.mrb[37].mxu0 }
0x203f   :  { %v2480_v39 = vpop.f32.mrb[38].mxu0 }
0x2040   :  { %v2487_v40 = vadd.f32 %v2484_v32, %v4646_v34  ;;  %4038 = vtanh.f32 %v2488_v33  ;;  %v3657_v41 = vpop.f32.mrb[39].mxu0  ;;  %v3490_v43 = vmul.f32 -1.442695, %v2488_v33 }
0x2042   :  { %4040 = vtanh.f32 %v2487_v40  ;;  %v3489_v17 = vmul.f32 -1.442695, %v2487_v40 }
0x2043   :  { %4042 = vpow2.f32 %v3490_v43 }
0x2044   :  { %4044 = vpow2.f32 %v3489_v17 }
0x204a   :  { %v4039_v42 = vpop.eup %4038 }
0x204b   :  { %2515 = vrot.lane.b32.xlu0 %v4039_v42, %s4158_s20 }
0x204c   :  { %v4041_v5 = vpop.eup %4040 }
0x204d   :  { %2513 = vrot.lane.b32.xlu1 %v4041_v5, %s4158_s20  ;;  %v4043_v44 = vpop.eup %4042 }
0x204e   :  { %v4045_v45 = vpop.eup %4044  ;;  %v2496_v46 = vadd.f32 1.0, %v4043_v44 }
0x204f   :  { %v2495_v48 = vadd.f32 1.0, %v4045_v45 }
0x2050   :  { %4046 = vrcp.f32 %v2496_v46 }
0x2051   :  { %4048 = vrcp.f32 %v2495_v48 }
0x205a   :  { %v4047_v49 = vpop.eup %4046 }
0x205b   :  { %v4049_v50 = vpop.eup %4048  ;;  %v2510_v54 = vmul.f32 %v4047_v49, %v2506_v53 }
0x205c   :  { %v2509_v60 = vmul.f32 %v4049_v50, %v2505_v55 }
0x20bd   :  { %v2516_v27 = vpop.permute.xlu0 %2515 }
0x20be   :  { %v2520_v29 = vmul.f32 %v4047_v49, %v2516_v27 }
0x20bf   :  { %v2514_v51 = vpop.permute.xlu1 %2513 }
0x20c0   :  { %2525 = vrot.lane.b32.xlu0 %v2520_v29, %s4156_s0  ;;  %v2519_v52 = vmul.f32 %v4049_v50, %v2514_v51 }
0x20c2   :  { %2523 = vrot.lane.b32.xlu1 %v2519_v52, %s4156_s0 }
0x2132   :  { %v2526_v56 = vpop.permute.xlu0 %2525 }
0x2133   :  { %v4944_v58 = vadd.f32 %v2526_v56, %v2510_v54 }
0x2134   :  { %v2524_v12 = vpop.permute.xlu1 %2523 }
0x2135   :  { %4050 = vtanh.f32 %v4944_v58  ;;  %v2529_v6 = vadd.f32 %v2524_v12, %v2509_v60  ;;  %v2631_v60 = vrot.slane %v4944_v58, 7 }
0x2137   :  { %4052 = vtanh.f32 %v2529_v6  ;;  %v2630_v56 = vrot.slane %v2529_v6, 7 }
0x213f   :  { %v4051_v1 = vpop.eup %4050 }
0x2140   :  { %2537 = vrot.lane.b32.xlu0 %v4051_v1, %s4158_s20 }
0x2141   :  { %v4053_v10 = vpop.eup %4052 }
0x2142   :  { %2535 = vrot.lane.b32.xlu1 %v4053_v10, %s4158_s20 }
0x21b2   :  { %v2538_v11 = vpop.permute.xlu0 %2537 }
0x21b3   :  { %v4949_v3 = vmul.f32 %v4047_v49, %v2538_v11 }
0x21b4   :  { %v2536_v14 = vpop.permute.xlu1 %2535 }
0x21b5   :  { %v4951_v57 = vmul.f32 %v4049_v50, %v2536_v14  ;;  %v2554_v15 = vpack.c.bf16 %v4949_v3, %v4949_v3 }
0x21b7   :  { %v2553_v19 = vpack.c.bf16 %v4951_v57, %v4951_v57  ;;  %v2558_v21 = vunpack.c.l.b16 %v2554_v15 }
0x21b9   :  { %v2557_v20 = vunpack.c.l.b16 %v2553_v19 }
0x21bb   :  { %v2559_v22 = vrot.slane %v2557_v20, 1 }
0x21bd   :  { %v2560_v25 = vsel %vm1424_vm5, %v2558_v21, %v2559_v22 }
0x21be   :  { %v2561_v30 = vpack.c.b16 %v2560_v25, %v2560_v25 }
0x21c0   :  { %2562 = vrot.lane.b32.xlu1 %v2561_v30, %s4156_s0 }
0x2232   :  { %v2563_v32 = vpop.permute.xlu1 %2562 }
0x2233   :  { %3663 = vmatmul.mubr.msk.bf16.vlgmr.msra.gmra.mrb[36].mxu1 %vm44_vm0, %v2563_v32 }
0x2234   :  { %3675 = vmatpush3.bf16.msra.mxu1 %v4865_v26  ;;  %3678 = vmatprep.mubr.msk.bf16.mxu1 %vm4159_vm4, %v4154_v0 }
0x2235   :  { %3676 = vmatprep.subr.bf16.mxu1 %v4154_v0 }
0x2238   :  { %3677 = vmatpush3.bf16.msra.mxu1 %v4874_v28 }
0x2239   :  { %3690 = vmatprep.subr.bf16.mxu1 %v4154_v0 }
0x2306   :  { %v2601_v33 = vpop.f32.mrb[36].mxu1 }
0x2307   :  { %v2608_v37 = vrot.slane %v2601_v33, 6  ;;  %v2609_v39 = vrot.slane %v2601_v33, 7  ;;  %v3664_v40 = vpop.f32.mrb[37].mxu1 }
0x2308   :  { %v2604_v41 = vpop.f32.mrb[38].mxu1 }
0x2309   :  { %v2612_v42 = vadd.f32 %v2608_v37, %v4646_v34  ;;  %v2613_v5 = vadd.f32 %v2609_v39, %v4643_v31  ;;  %v3665_v43 = vpop.f32.mrb[39].mxu1 }
0x230b   :  { %4054 = vtanh.f32 %v2612_v42  ;;  %v3492_v45 = vmul.f32 -1.442695, %v2612_v42  ;;  %v3493_v46 = vmul.f32 -1.442695, %v2613_v5 }
0x230c   :  { %4056 = vtanh.f32 %v2613_v5 }
0x230d   :  { %4058 = vpow2.f32 %v3492_v45 }
0x230e   :  { %4060 = vpow2.f32 %v3493_v46 }
0x2315   :  { %v4055_v17 = vpop.eup %4054 }
0x2316   :  { %v4057_v44 = vpop.eup %4056  ;;  %2638 = vrot.lane.b32.xlu0 %v4055_v17, %s4158_s20 }
0x2317   :  { %2640 = vrot.lane.b32.xlu1 %v4057_v44, %s4158_s20  ;;  %v4059_v48 = vpop.eup %4058 }
0x2318   :  { %v4061_v49 = vpop.eup %4060  ;;  %v2620_v27 = vadd.f32 1.0, %v4059_v48 }
0x2319   :  { %v2621_v29 = vadd.f32 1.0, %v4061_v49 }
0x231a   :  { %4062 = vrcp.f32 %v2620_v27 }
0x231b   :  { %4064 = vrcp.f32 %v2621_v29 }
0x2324   :  { %v4063_v50 = vpop.eup %4062 }
0x2325   :  { %v4065_v52 = vpop.eup %4064  ;;  %v2634_v12 = vmul.f32 %v4063_v50, %v2630_v56 }
0x2326   :  { %v2635_v1 = vmul.f32 %v4065_v52, %v2631_v60 }
0x2388   :  { %v2639_v51 = vpop.permute.xlu0 %2638 }
0x2389   :  { %v2641_v53 = vpop.permute.xlu1 %2640  ;;  %v2644_v54 = vmul.f32 %v4063_v50, %v2639_v51 }
0x238a   :  { %v2645_v55 = vmul.f32 %v4065_v52, %v2641_v53 }
0x238b   :  { %2648 = vrot.lane.b32.xlu0 %v2644_v54, %s4156_s0 }
0x238c   :  { %2650 = vrot.lane.b32.xlu1 %v2645_v55, %s4156_s0 }
0x23fd   :  { %v2649_v10 = vpop.permute.xlu0 %2648 }
0x23fe   :  { %v2651_v11 = vpop.permute.xlu1 %2650  ;;  %v4973_v14 = vadd.f32 %v2649_v10, %v2634_v12 }
0x23ff   :  { %v4975_v15 = vadd.f32 %v2651_v11, %v2635_v1 }
0x2400   :  { %4066 = vtanh.f32 %v4973_v14 }
0x2401   :  { %4068 = vtanh.f32 %v4975_v15 }
0x240a   :  { %v4067_v19 = vpop.eup %4066 }
0x240b   :  { %v4069_v20 = vpop.eup %4068  ;;  %2660 = vrot.lane.b32.xlu0 %v4067_v19, %s4158_s20  ;;  %v2756_v19 = vrot.slane %v4973_v14, 7 }
0x240c   :  { %2662 = vrot.lane.b32.xlu1 %v4069_v20, %s4158_s20  ;;  %v2757_v20 = vrot.slane %v4975_v15, 7 }
0x247d   :  { %v2661_v6 = vpop.permute.xlu0 %2660 }
0x247e   :  { %v2663_v58 = vpop.permute.xlu1 %2662  ;;  %v4981_v21 = vmul.f32 %v4063_v50, %v2661_v6 }
0x247f   :  { %v4983_v22 = vmul.f32 %v4065_v52, %v2663_v58 }
0x2480   :  { %v2678_v25 = vpack.c.bf16 %v4981_v21, %v4981_v21 }
0x2481   :  { %v2679_v30 = vpack.c.bf16 %v4983_v22, %v4983_v22 }
0x2482   :  { %v2682_v32 = vunpack.c.l.b16 %v2678_v25 }
0x2483   :  { %v2683_v33 = vunpack.c.l.b16 %v2679_v30 }
0x2484   :  { %v2684_v37 = vrot.slane %v2682_v32, 2 }
0x2485   :  { %v2685_v39 = vrot.slane %v2683_v33, 1 }
0x2487   :  { %v2686_v40 = vsel %vm1424_vm5, %v2685_v39, %v2684_v37 }
0x2488   :  { %v2687_v41 = vpack.c.b16 %v2686_v40, %v2686_v40 }
0x248a   :  { %2688 = vrot.lane.b32.xlu0 %v2687_v41, %s4156_s0 }
0x24fc   :  { %v2689_v42 = vpop.permute.xlu0 %2688 }
0x24fd   :  { %3671 = vmatmul.mubr.msk.bf16.vlgmr.msra.gmra.mrb[40].mxu0 %vm44_vm0, %v2689_v42 }
0x24fe   :  { %3683 = vmatpush3.bf16.msra.mxu0 %v4865_v26  ;;  %3686 = vmatprep.mubr.msk.bf16.mxu0 %vm4159_vm4, %v4154_v0 }
0x24ff   :  { %3684 = vmatprep.subr.bf16.mxu0 %v4154_v0 }
0x2502   :  { %3685 = vmatpush3.bf16.msra.mxu0 %v4874_v28 }
0x2503   :  { %3698 = vmatprep.subr.bf16.mxu0 %v4154_v0 }
0x25d0   :  { %v2727_v5 = vpop.f32.mrb[40].mxu0 }
0x25d1   :  { %v2734_v43 = vrot.slane %v2727_v5, 5  ;;  %v2735_v17 = vrot.slane %v2727_v5, 6  ;;  %v3672_v44 = vpop.f32.mrb[41].mxu0 }
0x25d2   :  { %v2730_v45 = vpop.f32.mrb[42].mxu0 }
0x25d3   :  { %v2738_v46 = vadd.f32 %v2734_v43, %v4646_v34  ;;  %v2739_v48 = vadd.f32 %v2735_v17, %v4643_v31  ;;  %v3673_v49 = vpop.f32.mrb[43].mxu0 }
0x25d5   :  { %4070 = vtanh.f32 %v2738_v46  ;;  %v3495_v50 = vmul.f32 -1.442695, %v2738_v46  ;;  %v3496_v51 = vmul.f32 -1.442695, %v2739_v48 }
0x25d6   :  { %4072 = vtanh.f32 %v2739_v48 }
0x25d7   :  { %4074 = vpow2.f32 %v3495_v50 }
0x25d8   :  { %4076 = vpow2.f32 %v3496_v51 }
0x25df   :  { %v4071_v27 = vpop.eup %4070 }
0x25e0   :  { %v4073_v29 = vpop.eup %4072  ;;  %2764 = vrot.lane.b32.xlu1 %v4071_v27, %s4158_s20 }
0x25e1   :  { %2766 = vrot.lane.b32.xlu0 %v4073_v29, %s4158_s20  ;;  %v4075_v52 = vpop.eup %4074 }
0x25e2   :  { %v4077_v53 = vpop.eup %4076  ;;  %v2746_v54 = vadd.f32 1.0, %v4075_v52 }
0x25e3   :  { %v2747_v55 = vadd.f32 1.0, %v4077_v53 }
0x25e4   :  { %4078 = vrcp.f32 %v2746_v54 }
0x25e5   :  { %4080 = vrcp.f32 %v2747_v55 }
0x25ee   :  { %v4079_v56 = vpop.eup %4078 }
0x25ef   :  { %v4081_v12 = vpop.eup %4080  ;;  %v2760_v6 = vmul.f32 %v4079_v56, %v2756_v19 }
0x25f0   :  { %v2761_v58 = vmul.f32 %v4081_v12, %v2757_v20 }
0x2652   :  { %v2765_v60 = vpop.permute.xlu1 %2764 }
0x2653   :  { %v2767_v1 = vpop.permute.xlu0 %2766  ;;  %v2770_v10 = vmul.f32 %v4079_v56, %v2765_v60 }
0x2654   :  { %v2771_v11 = vmul.f32 %v4081_v12, %v2767_v1 }
0x2655   :  { %2774 = vrot.lane.b32.xlu1 %v2770_v10, %s4156_s0 }
0x2656   :  { %2776 = vrot.lane.b32.xlu0 %v2771_v11, %s4156_s0 }
0x26c7   :  { %v2775_v25 = vpop.permute.xlu1 %2774 }
0x26c8   :  { %v2777_v30 = vpop.permute.xlu0 %2776  ;;  %v2780_v32 = vadd.f32 %v2775_v25, %v2760_v6 }
0x26c9   :  { %v2781_v33 = vadd.f32 %v2777_v30, %v2761_v58 }
0x26ca   :  { %4082 = vtanh.f32 %v2780_v32 }
0x26cb   :  { %4084 = vtanh.f32 %v2781_v33 }
0x26d4   :  { %v4083_v37 = vpop.eup %4082 }
0x26d5   :  { %v4085_v39 = vpop.eup %4084  ;;  %2786 = vrot.lane.b32.xlu1 %v4083_v37, %s4158_s20 }
0x26d6   :  { %2788 = vrot.lane.b32.xlu0 %v4085_v39, %s4158_s20 }
0x2747   :  { %v2787_v40 = vpop.permute.xlu1 %2786 }
0x2748   :  { %v2789_v41 = vpop.permute.xlu0 %2788  ;;  %v5008_v42 = vmul.f32 %v4079_v56, %v2787_v40  ;;  %v2882_v40 = vrot.slane %v2780_v32, 7 }
0x2749   :  { %v5010_v14 = vmul.f32 %v4081_v12, %v2789_v41  ;;  %v2883_v41 = vrot.slane %v2781_v33, 7 }
0x274a   :  { %v2804_v15 = vpack.c.bf16 %v5008_v42, %v5008_v42 }
0x274b   :  { %v2805_v5 = vpack.c.bf16 %v5010_v14, %v5010_v14 }
0x274c   :  { %v2808_v43 = vunpack.c.l.b16 %v2804_v15 }
0x274d   :  { %v2809_v17 = vunpack.c.l.b16 %v2805_v5 }
0x274e   :  { %v2810_v44 = vrot.slane %v2808_v43, 3 }
0x274f   :  { %v2811_v45 = vrot.slane %v2809_v17, 2 }
0x2751   :  { %v2812_v46 = vsel %vm1424_vm5, %v2811_v45, %v2810_v44 }
0x2752   :  { %v2813_v48 = vpack.c.b16 %v2812_v46, %v2812_v46 }
0x2754   :  { %2814 = vrot.lane.b32.xlu1 %v2813_v48, %s4156_s0 }
0x27c6   :  { %v2815_v49 = vpop.permute.xlu1 %2814 }
0x27c7   :  { %3679 = vmatmul.mubr.msk.bf16.vlgmr.msra.gmra.mrb[40].mxu1 %vm44_vm0, %v2815_v49 }
0x27c8   :  { %3691 = vmatpush3.bf16.msra.mxu1 %v4865_v26  ;;  %3694 = vmatprep.mubr.msk.bf16.mxu1 %vm4159_vm4, %v4154_v0 }
0x27c9   :  { %3692 = vmatprep.subr.bf16.mxu1 %v4154_v0 }
0x27cc   :  { %3693 = vmatpush3.bf16.msra.mxu1 %v4874_v28 }
0x289a   :  { %v2853_v27 = vpop.f32.mrb[40].mxu1 }
0x289b   :  { %v2860_v29 = vrot.slane %v2853_v27, 4  ;;  %v2861_v50 = vrot.slane %v2853_v27, 5  ;;  %v3680_v51 = vpop.f32.mrb[41].mxu1 }
0x289c   :  { %v2856_v52 = vpop.f32.mrb[42].mxu1 }
0x289d   :  { %v2864_v53 = vadd.f32 %v2860_v29, %v4646_v34  ;;  %v2865_v54 = vadd.f32 %v2861_v50, %v4643_v31  ;;  %v3681_v55 = vpop.f32.mrb[43].mxu1 }
0x289f   :  { %4086 = vtanh.f32 %v2864_v53  ;;  %v3498_v12 = vmul.f32 -1.442695, %v2864_v53  ;;  %v3499_v1 = vmul.f32 -1.442695, %v2865_v54 }
0x28a0   :  { %4088 = vtanh.f32 %v2865_v54 }
0x28a1   :  { %4090 = vpow2.f32 %v3498_v12 }
0x28a2   :  { %4092 = vpow2.f32 %v3499_v1 }
0x28a9   :  { %v4087_v56 = vpop.eup %4086 }
0x28aa   :  { %v4089_v60 = vpop.eup %4088  ;;  %2890 = vrot.lane.b32.xlu0 %v4087_v56, %s4158_s20 }
0x28ab   :  { %2892 = vrot.lane.b32.xlu1 %v4089_v60, %s4158_s20  ;;  %v4091_v10 = vpop.eup %4090 }
0x28ac   :  { %v4093_v11 = vpop.eup %4092  ;;  %v2872_v19 = vadd.f32 1.0, %v4091_v10 }
0x28ad   :  { %v2873_v20 = vadd.f32 1.0, %v4093_v11 }
0x28ae   :  { %4094 = vrcp.f32 %v2872_v19 }
0x28af   :  { %4096 = vrcp.f32 %v2873_v20 }
0x28b8   :  { %v4095_v6 = vpop.eup %4094 }
0x28b9   :  { %v4097_v25 = vpop.eup %4096  ;;  %v2886_v15 = vmul.f32 %v4095_v6, %v2882_v40 }
0x28ba   :  { %v2887_v5 = vmul.f32 %v4097_v25, %v2883_v41 }
0x291c   :  { %v2891_v58 = vpop.permute.xlu0 %2890 }
0x291d   :  { %v2893_v30 = vpop.permute.xlu1 %2892  ;;  %v2896_v37 = vmul.f32 %v4095_v6, %v2891_v58 }
0x291e   :  { %v2897_v39 = vmul.f32 %v4097_v25, %v2893_v30 }
0x291f   :  { %2900 = vrot.lane.b32.xlu0 %v2896_v37, %s4156_s0 }
0x2920   :  { %2902 = vrot.lane.b32.xlu1 %v2897_v39, %s4156_s0 }
0x2991   :  { %v2901_v43 = vpop.permute.xlu0 %2900 }
0x2992   :  { %v2903_v17 = vpop.permute.xlu1 %2902  ;;  %v2906_v44 = vadd.f32 %v2901_v43, %v2886_v15 }
0x2993   :  { %v2907_v45 = vadd.f32 %v2903_v17, %v2887_v5 }
0x2994   :  { %4098 = vtanh.f32 %v2906_v44 }
0x2995   :  { %4100 = vtanh.f32 %v2907_v45 }
0x299e   :  { %v4099_v46 = vpop.eup %4098 }
0x299f   :  { %v4101_v48 = vpop.eup %4100  ;;  %2912 = vrot.lane.b32.xlu0 %v4099_v46, %s4158_s20 }
0x29a0   :  { %2914 = vrot.lane.b32.xlu1 %v4101_v48, %s4158_s20  ;;  %v3008_v48 = vrot.slane %v2906_v44, 7 }
0x2a11   :  { %v2913_v49 = vpop.permute.xlu0 %2912 }
0x2a12   :  { %v2915_v27 = vpop.permute.xlu1 %2914  ;;  %v5032_v29 = vmul.f32 %v4095_v6, %v2913_v49  ;;  %v3009_v49 = vrot.slane %v2907_v45, 7 }
0x2a13   :  { %v5034_v32 = vmul.f32 %v4097_v25, %v2915_v27 }
0x2a14   :  { %v2930_v33 = vpack.c.bf16 %v5032_v29, %v5032_v29 }
0x2a15   :  { %v2931_v50 = vpack.c.bf16 %v5034_v32, %v5034_v32 }
0x2a16   :  { %v2934_v51 = vunpack.c.l.b16 %v2930_v33 }
0x2a17   :  { %v2935_v52 = vunpack.c.l.b16 %v2931_v50 }
0x2a18   :  { %v2936_v53 = vrot.slane %v2934_v51, 4 }
0x2a19   :  { %v2937_v54 = vrot.slane %v2935_v52, 3 }
0x2a1b   :  { %v2938_v55 = vsel %vm1424_vm5, %v2937_v54, %v2936_v53 }
0x2a1c   :  { %v2939_v56 = vpack.c.b16 %v2938_v55, %v2938_v55 }
0x2a1e   :  { %2940 = vrot.lane.b32.xlu0 %v2939_v56, %s4156_s0 }
0x2a90   :  { %v2941_v60 = vpop.permute.xlu0 %2940 }
0x2a91   :  { %3687 = vmatmul.mubr.msk.bf16.vlgmr.msra.gmra.mrb[44].mxu0 %vm44_vm0, %v2941_v60 }
0x2a92   :  { %3699 = vmatpush3.bf16.msra.mxu0 %v4865_v26  ;;  %3702 = vmatprep.mubr.msk.bf16.mxu0 %vm4159_vm4, %v4154_v0 }
0x2a93   :  { %3700 = vmatprep.subr.bf16.mxu0 %v4154_v0 }
0x2a96   :  { %3701 = vmatpush3.bf16.msra.mxu0 %v4874_v28 }
0x2b64   :  { %v2979_v12 = vpop.f32.mrb[44].mxu0 }
0x2b65   :  { %v2986_v1 = vrot.slane %v2979_v12, 3  ;;  %v2987_v10 = vrot.slane %v2979_v12, 4  ;;  %v3688_v11 = vpop.f32.mrb[45].mxu0 }
0x2b66   :  { %v2982_v19 = vpop.f32.mrb[46].mxu0 }
0x2b67   :  { %v2990_v20 = vadd.f32 %v2986_v1, %v4646_v34  ;;  %v2991_v6 = vadd.f32 %v2987_v10, %v4643_v31  ;;  %v3689_v58 = vpop.f32.mrb[47].mxu0 }
0x2b69   :  { %4102 = vtanh.f32 %v2990_v20  ;;  %v3501_v0 = vmul.f32 -1.442695, %v2990_v20  ;;  %v3502_v28 = vmul.f32 -1.442695, %v2991_v6 }
0x2b6a   :  { %4104 = vtanh.f32 %v2991_v6 }
0x2b6b   :  { %4106 = vpow2.f32 %v3501_v0 }
0x2b6c   :  { %4108 = vpow2.f32 %v3502_v28 }
0x2b73   :  { %v4103_v26 = vpop.eup %4102 }
0x2b74   :  { %v4105_v25 = vpop.eup %4104  ;;  %3016 = vrot.lane.b32.xlu1 %v4103_v26, %s4158_s20 }
0x2b75   :  { %3018 = vrot.lane.b32.xlu0 %v4105_v25, %s4158_s20  ;;  %v4107_v30 = vpop.eup %4106 }
0x2b76   :  { %v4109_v37 = vpop.eup %4108  ;;  %v2998_v39 = vadd.f32 1.0, %v4107_v30 }
0x2b77   :  { %v2999_v40 = vadd.f32 1.0, %v4109_v37 }
0x2b78   :  { %4110 = vrcp.f32 %v2998_v39 }
0x2b79   :  { %4112 = vrcp.f32 %v2999_v40 }
0x2b82   :  { %v4111_v41 = vpop.eup %4110 }
0x2b83   :  { %v4113_v5 = vpop.eup %4112  ;;  %v3012_v27 = vmul.f32 %v4111_v41, %v3008_v48 }
0x2b84   :  { %v3013_v33 = vmul.f32 %v4113_v5, %v3009_v49 }
0x2be6   :  { %v3017_v15 = vpop.permute.xlu1 %3016 }
0x2be7   :  { %v3019_v43 = vpop.permute.xlu0 %3018  ;;  %v3022_v17 = vmul.f32 %v4111_v41, %v3017_v15 }
0x2be8   :  { %v3023_v46 = vmul.f32 %v4113_v5, %v3019_v43 }
0x2be9   :  { %3026 = vrot.lane.b32.xlu1 %v3022_v17, %s4156_s0 }
0x2bea   :  { %3028 = vrot.lane.b32.xlu0 %v3023_v46, %s4156_s0 }
0x2c5b   :  { %v3027_v50 = vpop.permute.xlu1 %3026 }
0x2c5c   :  { %v3029_v51 = vpop.permute.xlu0 %3028  ;;  %v3032_v52 = vadd.f32 %v3027_v50, %v3012_v27 }
0x2c5d   :  { %v3033_v53 = vadd.f32 %v3029_v51, %v3013_v33 }
0x2c5e   :  { %4114 = vtanh.f32 %v3032_v52 }
0x2c5f   :  { %4116 = vtanh.f32 %v3033_v53 }
0x2c68   :  { %v4115_v54 = vpop.eup %4114 }
0x2c69   :  { %v4117_v55 = vpop.eup %4116  ;;  %3038 = vrot.lane.b32.xlu1 %v4115_v54, %s4158_s20 }
0x2c6a   :  { %3040 = vrot.lane.b32.xlu0 %v4117_v55, %s4158_s20 }
0x2cdb   :  { %v3039_v56 = vpop.permute.xlu1 %3038 }
0x2cdc   :  { %v3041_v60 = vpop.permute.xlu0 %3040  ;;  %v5056_v12 = vmul.f32 %v4111_v41, %v3039_v56 }
0x2cdd   :  { %v5058_v44 = vmul.f32 %v4113_v5, %v3041_v60  ;;  %v3134_v60 = vrot.slane %v3032_v52, 7 }
0x2cde   :  { %v3056_v45 = vpack.c.bf16 %v5056_v12, %v5056_v12 }
0x2cdf   :  { %v3057_v1 = vpack.c.bf16 %v5058_v44, %v5058_v44 }
0x2ce0   :  { %v3060_v10 = vunpack.c.l.b16 %v3056_v45  ;;  %v3135_v45 = vrot.slane %v3033_v53, 7 }
0x2ce1   :  { %v3061_v11 = vunpack.c.l.b16 %v3057_v1 }
0x2ce2   :  { %v3062_v19 = vrot.slane %v3060_v10, 5 }
0x2ce3   :  { %v3063_v20 = vrot.slane %v3061_v11, 4 }
0x2ce5   :  { %v3064_v6 = vsel %vm1424_vm5, %v3063_v20, %v3062_v19 }
0x2ce6   :  { %v3065_v58 = vpack.c.b16 %v3064_v6, %v3064_v6 }
0x2ce8   :  { %3066 = vrot.lane.b32.xlu1 %v3065_v58, %s4156_s0 }
0x2d5a   :  { %v3067_v26 = vpop.permute.xlu1 %3066 }
0x2d5b   :  { %3695 = vmatmul.mubr.msk.bf16.vlgmr.msra.gmra.mrb[44].mxu1 %vm44_vm0, %v3067_v26 }
0x2e2e   :  { %v3105_v25 = vpop.f32.mrb[44].mxu1 }
0x2e2f   :  { %v3112_v0 = vrot.slane %v3105_v25, 2  ;;  %v3113_v28 = vrot.slane %v3105_v25, 3  ;;  %v3696_v30 = vpop.f32.mrb[45].mxu1 }
0x2e30   :  { %v3108_v37 = vpop.f32.mrb[46].mxu1 }
0x2e31   :  { %v3116_v39 = vadd.f32 %v3112_v0, %v4646_v34  ;;  %v3117_v40 = vadd.f32 %v3113_v28, %v4643_v31  ;;  %v3697_v41 = vpop.f32.mrb[47].mxu1 }
0x2e33   :  { %4118 = vtanh.f32 %v3116_v39  ;;  %v3504_v43 = vmul.f32 -1.442695, %v3116_v39  ;;  %v3505_v17 = vmul.f32 -1.442695, %v3117_v40 }
0x2e34   :  { %4120 = vtanh.f32 %v3117_v40 }
0x2e35   :  { %4122 = vpow2.f32 %v3504_v43 }
0x2e36   :  { %4124 = vpow2.f32 %v3505_v17 }
0x2e3d   :  { %v4119_v15 = vpop.eup %4118 }
0x2e3e   :  { %v4121_v5 = vpop.eup %4120  ;;  %3142 = vrot.lane.b32.xlu0 %v4119_v15, %s4158_s20 }
0x2e3f   :  { %3144 = vrot.lane.b32.xlu1 %v4121_v5, %s4158_s20  ;;  %v4123_v46 = vpop.eup %4122 }
0x2e40   :  { %v4125_v48 = vpop.eup %4124  ;;  %v3124_v49 = vadd.f32 1.0, %v4123_v46 }
0x2e41   :  { %v3125_v27 = vadd.f32 1.0, %v4125_v48 }
0x2e42   :  { %4126 = vrcp.f32 %v3124_v49 }
0x2e43   :  { %4128 = vrcp.f32 %v3125_v27 }
0x2e4c   :  { %v4127_v33 = vpop.eup %4126 }
0x2e4d   :  { %v4129_v51 = vpop.eup %4128  ;;  %v3138_v1 = vmul.f32 %v4127_v33, %v3134_v60 }
0x2e4e   :  { %v3139_v10 = vmul.f32 %v4129_v51, %v3135_v45 }
0x2eb0   :  { %v3143_v50 = vpop.permute.xlu0 %3142 }
0x2eb1   :  { %v3145_v54 = vpop.permute.xlu1 %3144  ;;  %v3148_v55 = vmul.f32 %v4127_v33, %v3143_v50 }
0x2eb2   :  { %v3149_v56 = vmul.f32 %v4129_v51, %v3145_v54 }
0x2eb3   :  { %3152 = vrot.lane.b32.xlu0 %v3148_v55, %s4156_s0 }
0x2eb4   :  { %3154 = vrot.lane.b32.xlu1 %v3149_v56, %s4156_s0 }
0x2f25   :  { %v3153_v11 = vpop.permute.xlu0 %3152 }
0x2f26   :  { %v3155_v19 = vpop.permute.xlu1 %3154  ;;  %v3158_v20 = vadd.f32 %v3153_v11, %v3138_v1 }
0x2f27   :  { %v3159_v6 = vadd.f32 %v3155_v19, %v3139_v10 }
0x2f28   :  { %4130 = vtanh.f32 %v3158_v20 }
0x2f29   :  { %4132 = vtanh.f32 %v3159_v6 }
0x2f32   :  { %v4131_v58 = vpop.eup %4130 }
0x2f33   :  { %v4133_v26 = vpop.eup %4132  ;;  %3164 = vrot.lane.b32.xlu0 %v4131_v58, %s4158_s20 }
0x2f34   :  { %3166 = vrot.lane.b32.xlu1 %v4133_v26, %s4158_s20 }
0x2fa5   :  { %v3165_v25 = vpop.permute.xlu0 %3164 }
0x2fa6   :  { %v3167_v0 = vpop.permute.xlu1 %3166  ;;  %v5075_v28 = vmul.f32 %v4127_v33, %v3165_v25 }
0x2fa7   :  { %v5077_v52 = vmul.f32 %v4129_v51, %v3167_v0  ;;  %v3260_v0 = vrot.slane %v3158_v20, 7 }
0x2fa8   :  { %v3182_v53 = vpack.c.bf16 %v5075_v28, %v5075_v28 }
0x2fa9   :  { %v3183_v30 = vpack.c.bf16 %v5077_v52, %v5077_v52 }
0x2faa   :  { %v3186_v37 = vunpack.c.l.b16 %v3182_v53  ;;  %v3261_v53 = vrot.slane %v3159_v6, 7 }
0x2fab   :  { %v3187_v39 = vunpack.c.l.b16 %v3183_v30 }
0x2fac   :  { %v3188_v40 = vrot.slane %v3186_v37, 6 }
0x2fad   :  { %v3189_v41 = vrot.slane %v3187_v39, 5 }
0x2faf   :  { %v3190_v15 = vsel %vm1424_vm5, %v3189_v41, %v3188_v40 }
0x2fb0   :  { %v3191_v5 = vpack.c.b16 %v3190_v15, %v3190_v15 }
0x2fb2   :  { %3192 = vrot.lane.b32.xlu0 %v3191_v5, %s4156_s0 }
0x3024   :  { %v3193_v43 = vpop.permute.xlu0 %3192 }
0x3025   :  { %3703 = vmatmul.mubr.msk.bf16.vlgmr.msra.gmra.mrb[48].mxu0 %vm44_vm0, %v3193_v43 }
0x30f8   :  { %v3231_v17 = vpop.f32.mrb[48].mxu0 }
0x30f9   :  { %v3238_v46 = vrot.slane %v3231_v17, 1  ;;  %v3239_v48 = vrot.slane %v3231_v17, 2  ;;  %v3704_v49 = vpop.f32.mrb[49].mxu0 }
0x30fa   :  { %v3234_v27 = vpop.f32.mrb[50].mxu0 }
0x30fb   :  { %v3242_v33 = vadd.f32 %v3238_v46, %v4646_v34  ;;  %v3243_v50 = vadd.f32 %v3239_v48, %v4643_v31  ;;  %v3705_v51 = vpop.f32.mrb[51].mxu0 }
0x30fd   :  { %4134 = vtanh.f32 %v3242_v33  ;;  %v3507_v56 = vmul.f32 -1.442695, %v3242_v33  ;;  %v3508_v60 = vmul.f32 -1.442695, %v3243_v50 }
0x30fe   :  { %4136 = vtanh.f32 %v3243_v50 }
0x30ff   :  { %4138 = vpow2.f32 %v3507_v56 }
0x3100   :  { %4140 = vpow2.f32 %v3508_v60 }
0x3107   :  { %v4135_v54 = vpop.eup %4134 }
0x3108   :  { %v4137_v55 = vpop.eup %4136  ;;  %3268 = vrot.lane.b32.xlu1 %v4135_v54, %s4158_s20 }
0x3109   :  { %3270 = vrot.lane.b32.xlu0 %v4137_v55, %s4158_s20  ;;  %v4139_v45 = vpop.eup %4138 }
0x310a   :  { %v4141_v1 = vpop.eup %4140  ;;  %v3250_v10 = vadd.f32 1.0, %v4139_v45 }
0x310b   :  { %v3251_v11 = vadd.f32 1.0, %v4141_v1 }
0x310c   :  { %4142 = vrcp.f32 %v3250_v10 }
0x310d   :  { %4144 = vrcp.f32 %v3251_v11 }
0x3116   :  { %v5090_v31 = vpop.eup %4142 }
0x3117   :  { %v5092_v19 = vpop.eup %4144  ;;  %v3264_v30 = vmul.f32 %v5090_v31, %v3260_v0 }
0x3118   :  { %v3265_v37 = vmul.f32 %v5092_v19, %v3261_v53 }
0x317a   :  { %v3269_v34 = vpop.permute.xlu1 %3268 }
0x317b   :  { %v3271_v58 = vpop.permute.xlu0 %3270  ;;  %v3274_v26 = vmul.f32 %v5090_v31, %v3269_v34 }
0x317c   :  { %v3275_v25 = vmul.f32 %v5092_v19, %v3271_v58 }
0x317d   :  { %3278 = vrot.lane.b32.xlu1 %v3274_v26, %s4156_s0 }
0x317e   :  { %3280 = vrot.lane.b32.xlu0 %v3275_v25, %s4156_s0 }
0x3182   :  { %1534 = vrot.lane.b32.xlu0 %v4689_v47, %s4156_s0 }
0x31ef   :  { %v3279_v39 = vpop.permute.xlu1 %3278 }
0x31f0   :  { %v3281_v40 = vpop.permute.xlu0 %3280  ;;  %v3284_v41 = vadd.f32 %v3279_v39, %v3264_v30 }
0x31f1   :  { %v3285_v15 = vadd.f32 %v3281_v40, %v3265_v37 }
0x31f2   :  { %4146 = vtanh.f32 %v3284_v41 }
0x31f3   :  { %4148 = vtanh.f32 %v3285_v15 }
0x31f4   :  { %v1535_v5 = vpop.permute.xlu0 %1534 }
0x31f5   :  { %1541 = vst.msk [vmem:[#allocation3] sm:$0x2] %vm1540_vm6, %v1535_v5 }
0x31fc   :  { %v4147_v43 = vpop.eup %4146 }
0x31fd   :  { %v4149_v17 = vpop.eup %4148  ;;  %3290 = vrot.lane.b32.xlu1 %v4147_v43, %s4158_s20 }
0x31fe   :  { %3292 = vrot.lane.b32.xlu0 %v4149_v17, %s4158_s20 }
0x3201   :  { %1408 = vrot.lane.b32.xlu1 %v4660_v61, %s4156_s0  ;;  %v3885_v61 = vld [vmem:[%s5231_s10 + $0x8] sm:$0xff]  }
0x3202   :  { %1787 = vrot.lane.b32.xlu0 %v4752_v23, %s4156_s0 }
0x3205   :  { %1660 = vrot.lane.b32.xlu1 %v4719_v35, %s4156_s0 }
0x3206   :  { %2041 = vrot.lane.b32.xlu0 %v4818_v4, %s4156_s0 }
0x3209   :  { %1914 = vrot.lane.b32.xlu1 %v4785_v16, %s4156_s0  ;;  %v17_v16 = vstv %s5232_s11 }
0x320a   :  { %2295 = vrot.lane.b32.xlu0 %v4891_v7, %s4156_s0  ;;  %18 = vst [vmem:[#allocation4] sm:$0x1] %v17_v16 }
0x320d   :  { %2168 = vrot.lane.b32.xlu1 %v4851_v8, %s4156_s0 }
0x320e   :  { %2545 = vrot.lane.b32.xlu0 %v4951_v57, %s4156_s0 }
0x3211   :  { %2421 = vrot.lane.b32.xlu1 %v4920_v62, %s4156_s0  ;;  %v3509_v1 = vld [vmem:[#allocation4] ss:$0 sm:$0xff] }
0x3212   :  { %2796 = vrot.lane.b32.xlu0 %v5008_v42, %s4156_s0 }
0x3215   :  { %2670 = vrot.lane.b32.xlu1 %v4981_v21, %s4156_s0 }
0x3216   :  { %3048 = vrot.lane.b32.xlu0 %v5056_v12, %s4156_s0 }
0x3219   :  { %2922 = vrot.lane.b32.xlu1 %v5032_v29, %s4156_s0 }
0x321a   :  { %1536 = vrot.lane.b32.xlu0 %v4687_v38, %s4156_s0 }
0x321d   :  { %3174 = vrot.lane.b32.xlu1 %v5075_v28, %s4156_s0 }
0x321e   :  { %1789 = vrot.lane.b32.xlu0 %v4754_v24, %s4156_s0 }
0x3221   :  { %1410 = vrot.lane.b32.xlu1 %v4658_v59, %s4156_s0  ;;  %v3884_v59 = vld [vmem:[%s5231_s10] sm:$0xff]  }
0x3222   :  { %2043 = vrot.lane.b32.xlu0 %v4820_v13, %s4156_s0  ;;  %3706 = vmatprep.subr.bf16.mxu1 %v3884_v59 }
0x3223   :  { %3707 = vmatpush3.bf16.msra.mxu1 %v3884_v59 }
0x3224   :  { %3708 = vmatprep.subr.bf16.mxu1 %v3885_v61 }
0x3225   :  { %1662 = vrot.lane.b32.xlu1 %v4721_v36, %s4156_s0 }
0x3226   :  { %2297 = vrot.lane.b32.xlu0 %v4893_v2, %s4156_s0 }
0x3227   :  { %3709 = vmatpush3.bf16.msra.mxu1 %v3885_v61 }
0x3229   :  { %1916 = vrot.lane.b32.xlu1 %v4787_v18, %s4156_s0 }
0x322a   :  { %2547 = vrot.lane.b32.xlu0 %v4949_v3, %s4156_s0 }
0x322d   :  { %2170 = vrot.lane.b32.xlu1 %v4853_v9, %s4156_s0 }
0x322e   :  { %2798 = vrot.lane.b32.xlu0 %v5010_v14, %s4156_s0 }
0x3231   :  { %2423 = vrot.lane.b32.xlu1 %v4922_v63, %s4156_s0 }
0x3232   :  { %3050 = vrot.lane.b32.xlu0 %v5058_v44, %s4156_s0 }
0x3235   :  { %2672 = vrot.lane.b32.xlu1 %v4983_v22, %s4156_s0 }
0x3239   :  { %2924 = vrot.lane.b32.xlu1 %v5034_v32, %s4156_s0 }
0x323d   :  { %3176 = vrot.lane.b32.xlu1 %v5077_v52, %s4156_s0 }
0x326f   :  { %v3291_v38 = vpop.permute.xlu1 %3290 }
0x3270   :  { %v3293_v47 = vpop.permute.xlu0 %3292  ;;  %v3296_v35 = vmul.f32 %v5090_v31, %v3291_v38 }
0x3271   :  { %v3297_v23 = vmul.f32 %v5092_v19, %v3293_v47 }
0x3272   :  { %3300 = vrot.lane.b32.xlu0 %v3296_v35, %s4156_s0 }
0x3273   :  { %v1409_v36 = vpop.permute.xlu1 %1408 }
0x3274   :  { %v1788_v24 = vpop.permute.xlu0 %1787  ;;  %1415 = vst.msk [vmem:[#allocation3] sm:$0x1] %vm1414_vm7, %v1409_v36 }
0x3275   :  { %1794 = vst.msk [vmem:[#allocation3] sm:$0x8] %vm1793_vm8, %v1788_v24 }
0x3276   :  { %3302 = vrot.lane.b32.xlu0 %v3297_v23, %s4156_s0 }
0x3277   :  { %v1661_v18 = vpop.permute.xlu1 %1660 }
0x3278   :  { %v2042_v4 = vpop.permute.xlu0 %2041  ;;  %1667 = vst.msk [vmem:[#allocation3] sm:$0x4] %vm1666_vm9, %v1661_v18 }
0x3279   :  { %2048 = vst.msk [vmem:[#allocation3] sm:$0x20] %vm2047_vm10, %v2042_v4 }
0x327b   :  { %v1915_v13 = vpop.permute.xlu1 %1914 }
0x327c   :  { %v2296_v8 = vpop.permute.xlu0 %2295  ;;  %1921 = vst.msk [vmem:[#allocation3] sm:$0x10] %vm1920_vm11, %v1915_v13 }
0x327d   :  { %2302 = vst.msk [vmem:[#allocation3] sm:$0x80] %vm2301_vm12, %v2296_v8 }
0x327f   :  { %v2169_v9 = vpop.permute.xlu1 %2168 }
0x3280   :  { %v2546_v7 = vpop.permute.xlu0 %2545  ;;  %2175 = vst.msk [vmem:[#allocation3] sm:$0x40] %vm2174_vm13, %v2169_v9 }
0x3281   :  { %2551 = vst.msk [vmem:[#allocation3 + $0x8] sm:$0x2] %vm1540_vm6, %v2546_v7 }
0x3283   :  { %v2422_v2 = vpop.permute.xlu1 %2421 }
0x3284   :  { %v2797_v62 = vpop.permute.xlu0 %2796  ;;  %2427 = vst.msk [vmem:[#allocation3 + $0x8] sm:$0x1] %vm1414_vm7, %v2422_v2 }
0x3285   :  { %2802 = vst.msk [vmem:[#allocation3 + $0x8] sm:$0x8] %vm1793_vm8, %v2797_v62 }
0x3287   :  { %v2671_v63 = vpop.permute.xlu1 %2670  ;;  %v3308_v51 = vld [vmem:[#allocation3] sm:$0xff] }
0x3288   :  { %v3049_v3 = vpop.permute.xlu0 %3048  ;;  %2676 = vst.msk [vmem:[#allocation3 + $0x8] sm:$0x4] %vm1666_vm9, %v2671_v63 }
0x3289   :  { %3054 = vst.msk [vmem:[#allocation3 + $0x8] sm:$0x20] %vm2047_vm10, %v3049_v3 }
0x328b   :  { %v2923_v57 = vpop.permute.xlu1 %2922 }
0x328c   :  { %v1537_v21 = vpop.permute.xlu0 %1536  ;;  %2928 = vst.msk [vmem:[#allocation3 + $0x8] sm:$0x10] %vm1920_vm11, %v2923_v57 }
0x328d   :  { %1542 = vst.msk [vmem:[#allocation3 + $0x10] sm:$0x2] %vm1540_vm6, %v1537_v21 }
0x328f   :  { %v3175_v22 = vpop.permute.xlu1 %3174 }
0x3290   :  { %v1790_v42 = vpop.permute.xlu0 %1789  ;;  %3180 = vst.msk [vmem:[#allocation3 + $0x8] sm:$0x40] %vm2174_vm13, %v3175_v22 }
0x3291   :  { %1795 = vst.msk [vmem:[#allocation3 + $0x10] sm:$0x8] %vm1793_vm8, %v1790_v42 }
0x3293   :  { %v1411_v14 = vpop.permute.xlu1 %1410 }
0x3294   :  { %v2044_v29 = vpop.permute.xlu0 %2043  ;;  %1416 = vst.msk [vmem:[#allocation3 + $0x10] sm:$0x1] %vm1414_vm7, %v1411_v14 }
0x3295   :  { %2049 = vst.msk [vmem:[#allocation3 + $0x10] sm:$0x20] %vm2047_vm10, %v2044_v29 }
0x3297   :  { %v1663_v32 = vpop.permute.xlu1 %1662 }
0x3298   :  { %v2298_v12 = vpop.permute.xlu0 %2297  ;;  %1668 = vst.msk [vmem:[#allocation3 + $0x10] sm:$0x4] %vm1666_vm9, %v1663_v32 }
0x3299   :  { %2303 = vst.msk [vmem:[#allocation3 + $0x10] sm:$0x80] %vm2301_vm12, %v2298_v12 }
0x329b   :  { %v1917_v44 = vpop.permute.xlu1 %1916 }
0x329c   :  { %v2548_v20 = vpop.permute.xlu0 %2547  ;;  %1922 = vst.msk [vmem:[#allocation3 + $0x10] sm:$0x10] %vm1920_vm11, %v1917_v44 }
0x329d   :  { %2552 = vst.msk [vmem:[#allocation3 + $0x18] sm:$0x2] %vm1540_vm6, %v2548_v20 }
0x329f   :  { %v2171_v6 = vpop.permute.xlu1 %2170 }
0x32a0   :  { %v2799_v28 = vpop.permute.xlu0 %2798  ;;  %2176 = vst.msk [vmem:[#allocation3 + $0x10] sm:$0x40] %vm2174_vm13, %v2171_v6 }
0x32a1   :  { %2803 = vst.msk [vmem:[#allocation3 + $0x18] sm:$0x8] %vm1793_vm8, %v2799_v28 }
0x32a3   :  { %v2424_v52 = vpop.permute.xlu1 %2423 }
0x32a4   :  { %v3051_v46 = vpop.permute.xlu0 %3050  ;;  %2428 = vst.msk [vmem:[#allocation3 + $0x18] sm:$0x1] %vm1414_vm7, %v2424_v52 }
0x32a5   :  { %3055 = vst.msk [vmem:[#allocation3 + $0x18] sm:$0x20] %vm2047_vm10, %v3051_v46 }
0x32a7   :  { %v2673_v48 = vpop.permute.xlu1 %2672  ;;  %v3310_v56 = vld [vmem:[#allocation3 + $0x10] sm:$0xff] }
0x32a8   :  { %2677 = vst.msk [vmem:[#allocation3 + $0x18] sm:$0x4] %vm1666_vm9, %v2673_v48 }
0x32ab   :  { %v2925_v49 = vpop.permute.xlu1 %2924 }
0x32ac   :  { %2929 = vst.msk [vmem:[#allocation3 + $0x18] sm:$0x10] %vm1920_vm11, %v2925_v49 }
0x32af   :  { %v3177_v27 = vpop.permute.xlu1 %3176 }
0x32b0   :  { %3181 = vst.msk [vmem:[#allocation3 + $0x18] sm:$0x40] %vm2174_vm13, %v3177_v27 }
0x32e4   :  { %v3301_v33 = vpop.permute.xlu0 %3300 }
0x32e5   :  { %3306 = vst.msk [vmem:[#allocation3 + $0x8] sm:$0x80] %vm2301_vm12, %v3301_v33 }
0x32e8   :  { %v3303_v50 = vpop.permute.xlu0 %3302 }
0x32e9   :  { %3307 = vst.msk [vmem:[#allocation3 + $0x18] sm:$0x80] %vm2301_vm12, %v3303_v50 }
0x32ec   :  { %v3309_v54 = vld [vmem:[#allocation3 + $0x8] sm:$0xff] }
0x32ed   :  { %v3312_v55 = vpack.c.bf16 %v3309_v54, %v3308_v51 }
0x32ef   :  { %3710 = vmatprep.mubr.msk.bf16.mxu1 %vm44_vm0, %v3312_v55 }
0x32f0   :  { %v3311_v60 = vld [vmem:[#allocation3 + $0x18] sm:$0xff] }
0x32f1   :  { %v3313_v45 = vpack.c.bf16 %v3311_v60, %v3310_v56 }
0x32f3   :  { %3711 = vmatmul.mubr.msk.bf16.vlgmr.msra.gmra.mrb[48].mxu1 %vm44_vm0, %v3313_v45 }
0x33c6   :  { %v3712_v10 = vpop.f32.mrb[48].mxu1 }
0x33c7   :  { %v3386_v11 = vadd.f32 %v3712_v10, %v3509_v1  ;;  %v3377_v31 = vpop.f32.mrb[49].mxu1 }
0x33c8   :  { %v3378_v34 = vadd.f32 %v3509_v1, %v3377_v31  ;;  %v3713_v19 = vpop.f32.mrb[50].mxu1 }
0x33c9   :  { %3395 = vst.msk [vmem:[%s5233_s12 + $0x10] sm:$0xff] %vm3392_vm14, %v3386_v11  ;;  %v3389_v58 = vadd.f32 %v3713_v19, %v3509_v1  ;;  %v3380_v26 = vpop.f32.mrb[51].mxu1 }
0x33ca   :  { %3393 = vst.msk [vmem:[%s5233_s12] sm:$0xff] %vm3392_vm14, %v3378_v34  ;;  %v3381_v25 = vadd.f32 %v3509_v1, %v3380_v26 }
0x33cb   :  { %3396 = vst.msk [vmem:[%s5233_s12 + $0x18] sm:$0xff] %vm3392_vm14, %v3389_v58 }
0x33cc   :  { %3394 = vst.msk [vmem:[%s5233_s12 + $0x8] sm:$0xff] %vm3392_vm14, %v3381_v25 }

</bundles_post_ra>
